<compile_context>
chip_gen: v6e
topology: v6e:2x2x1
jax: 0.10.0
libtpu: 0.0.40
codegen_flags: <defaults>
</compile_context>

<pallas_src>
import jax
import jax.numpy as jnp
from jax import lax
from jax.experimental import pallas as pl
from jax.experimental.pallas import tpu as pltpu


# ----------------------------- fused forward --------------------------------

def note_prediction_forward(x_nchw, diff, kp):
    B = x_nchw.shape[0]
    S1 = x_nchw.shape[2]                 # conv1 spatial (input_size)
    assert S1 % 4 == 0 and x_nchw.shape[3] == S1
    S2, S3 = S1 // 2, S1 // 4            # after pool1 / pool2
    C1 = kp["conv1_w"].shape[1]          # 32
    C2 = kp["conv2_w"].shape[2]          # 64
    hid = kp["fc1_w"].shape[2]
    out_size = kp["fc2_w"].shape[1]
    assert kp["fc1_w"].shape[0] == S3 * S3

    # conv1 im2col in glue (Cin=1, ~18 KB): the only XLA prep per call.
    x = x_nchw.reshape(B, S1, S1)
    xp = jnp.pad(x, ((0, 0), (1, 1), (1, 1)))
    patches1 = jnp.stack([xp[:, dy:dy + S1, dx:dx + S1]
                          for dy in range(3) for dx in range(3)], axis=-1)
    patches1 = patches1.reshape(B * S1 * S1, 9)

    def kernel(pat_ref, diff_ref, w1_ref, b1_ref, w2_ref, b2_ref,
               wf1_ref, bf1_ref, wad_ref, wah_ref, ba_ref,
               wat_ref, bat_ref, wf2_ref, bf2_ref,
               out_ref, s1_ref, spad_ref, s2_ref):
        # ---- conv1 + ReLU: im2col-patch matmul; rows ordered (b, h, w) ----
        y1 = jnp.dot(pat_ref[...], w1_ref[...], preferred_element_type=jnp.float32)
        s1_ref[...] = jnp.maximum(y1 + b1_ref[...], 0.0)

        # ---- maxpool 2x2 #1 (all in VMEM) ----
        # stride-2 sublane reads pool along W; reshape + contiguous halves pool H.
        half = B * S1 * S1 // 2
        pw = jnp.maximum(s1_ref[pl.ds(0, half, 2), :],
                         s1_ref[pl.ds(1, half, 2), :])        # (B*S1*S2, C1)
        pw = pw.reshape(B * S2, S1, C1)                       # inner = (h%2)*S2 + wp
        p1 = jnp.maximum(pw[:, :S2, :], pw[:, S2:, :])        # (B*S2, S2, C1) rows (b,hp)

        # ---- zero-padded conv2 input, NHWC, resident in VMEM ----
        spad_ref[...] = jnp.zeros(spad_ref.shape, spad_ref.dtype)
        spad_ref[:, 1:1 + S2, 1:1 + S2, :] = p1.reshape(B, S2, S2, C1)

        # ---- conv2 + ReLU: 9 shifted-window matmuls accumulated in f32 ----
        acc = jnp.zeros((B * S2 * S2, C2), jnp.float32)
        for k in range(9):
            dy, dx = k // 3, k % 3
            patch = spad_ref[:, dy:dy + S2, dx:dx + S2, :]    # (B, S2, S2, C1)
            acc = acc + jnp.dot(patch.reshape(B * S2 * S2, C1), w2_ref[k],
                                preferred_element_type=jnp.float32)
        s2_ref[...] = jnp.maximum(acc + b2_ref[...], 0.0)     # (B*S2*S2, C2)

        # ---- maxpool 2x2 #2 ----
        half2 = B * S2 * S2 // 2
        qw = jnp.maximum(s2_ref[pl.ds(0, half2, 2), :],
                         s2_ref[pl.ds(1, half2, 2), :])
        qw = qw.reshape(B * S3, S2, C2)
        p2 = jnp.maximum(qw[:, :S3, :], qw[:, S3:, :])        # (B*S3, S3, C2) rows (b,hp)

        # ---- fc1 with torch's NCHW flatten folded into permuted weight blocks ----
        rows = []
        for b in range(B):
            hb = bf1_ref[...]                                 # (1, hid)
            for hp in range(S3):
                slab = p2[b * S3 + hp]                        # (S3, C2)
                for wp in range(S3):
                    hb = hb + jnp.dot(slab[wp:wp + 1, :], wf1_ref[hp * S3 + wp],
                                      preferred_element_type=jnp.float32)
            rows.append(hb)
        h = jnp.concatenate(rows, axis=0)                     # (B, hid)

        # ---- attn_fc on cat((diff, h)) via split weights; attn; scale; fc2 ----
        comb = (jnp.dot(h, wah_ref[...], preferred_element_type=jnp.float32)
                + diff_ref[...] * wad_ref[...] + ba_ref[...])
        attn = jnp.sum(comb * wat_ref[...], axis=-1, keepdims=True) + bat_ref[...]
        out_ref[...] = (jnp.dot(h * attn, wf2_ref[...],
                                preferred_element_type=jnp.float32) + bf2_ref[...])

    vspec = pl.BlockSpec(memory_space=pltpu.MemorySpace.VMEM)
    args = (patches1, diff,
            kp["conv1_w"], kp["conv1_b"], kp["conv2_w"], kp["conv2_b"],
            kp["fc1_w"], kp["fc1_b"],
            kp["attn_fc_wd"], kp["attn_fc_wh"], kp["attn_fc_b"],
            kp["attn_w"], kp["attn_b"], kp["fc2_w"], kp["fc2_b"])
    return pl.pallas_call(
        kernel,
        out_shape=jax.ShapeDtypeStruct((B, out_size), jnp.float32),
        in_specs=[vspec] * len(args),
        out_specs=vspec,
        scratch_shapes=[
            pltpu.VMEM((B * S1 * S1, C1), jnp.float32),       # conv1 output
            pltpu.VMEM((B, S2 + 2, S2 + 2, C1), jnp.float32), # padded pool1 (conv2 in)
            pltpu.VMEM((B * S2 * S2, C2), jnp.float32),       # conv2 output
        ],
    )(*args)


# --------------------------- one-time param prep -----------------------------

def prepare_params(p):
    """Reshape/permute torch-layout params into kernel-ready layouts (one time)."""
    hid = p["fc1_w"].shape[1]
    c2 = p["conv2_w"].shape[1]
    n_pos = p["fc1_w"].shape[0] // c2
    return {
        "conv1_w": p["conv1_w"],                              # (9, 32)
        "conv1_b": p["conv1_b"].reshape(1, -1),
        "conv2_w": p["conv2_w"].reshape(9, -1, c2),           # (9, 32, 64)
        "conv2_b": p["conv2_b"].reshape(1, -1),
        # rows reordered from NCHW-flatten (c*HW + pos) to (pos, c):
        "fc1_w": p["fc1_w"].reshape(c2, n_pos, hid).transpose(1, 0, 2),
        "fc1_b": p["fc1_b"].reshape(1, -1),
        "attn_fc_wd": p["attn_fc_w"][0:1, :],                 # multiplies diff
        "attn_fc_wh": p["attn_fc_w"][1:, :],                  # multiplies fc1 output
        "attn_fc_b": p["attn_fc_b"].reshape(1, -1),
        "attn_w": p["attn_w"].reshape(1, -1),
        "attn_b": p["attn_b"].reshape(1, 1),
        "fc2_w": p["fc2_w"],
        "fc2_b": p["fc2_b"].reshape(1, -1),
    }


# --------------------------- pure-JAX reference ------------------------------

def reference_forward(x_nchw, diff, p):
    hp = lax.Precision.HIGHEST
    B = x_nchw.shape[0]
    x = jnp.transpose(x_nchw, (0, 2, 3, 1))
    dn = ('NHWC', 'HWIO', 'NHWC')
    w1 = p["conv1_w"].reshape(3, 3, 1, -1)
    y = lax.conv_general_dilated(x, w1, (1, 1), 'SAME', dimension_numbers=dn,
                                 precision=hp)
    y = jnp.maximum(y + p["conv1_b"], 0.0)
    y = lax.reduce_window(y, -jnp.inf, lax.max, (1, 2, 2, 1), (1, 2, 2, 1), 'VALID')
    w2 = p["conv2_w"].reshape(3, 3, -1, p["conv2_w"].shape[1])
    z = lax.conv_general_dilated(y, w2, (1, 1), 'SAME', dimension_numbers=dn,
                                 precision=hp)
    z = jnp.maximum(z + p["conv2_b"], 0.0)
    z = lax.reduce_window(z, -jnp.inf, lax.max, (1, 2, 2, 1), (1, 2, 2, 1), 'VALID')
    feat = jnp.transpose(z, (0, 3, 1, 2)).reshape(B, -1)       # NCHW flatten
    h = jnp.dot(feat, p["fc1_w"], precision=hp) + p["fc1_b"]
    comb = jnp.concatenate([diff, h], axis=-1)
    c = jnp.dot(comb, p["attn_fc_w"], precision=hp) + p["attn_fc_b"]
    a = jnp.dot(c, p["attn_w"], precision=hp) + p["attn_b"]
    return jnp.dot(h * a, p["fc2_w"], precision=hp) + p["fc2_b"]


# ------------------------------- params --------------------------------------

def init_params(key, input_size=16, hidden_size=32, output_size=17):
    ks = jax.random.split(key, 12)

    def w(k, shape, fan_in):
        return jax.random.normal(k, shape, jnp.float32) / jnp.sqrt(float(fan_in))

    feat_dim = 64 * (input_size // 4) * (input_size // 4)
    return {
        # conv weights stored directly in im2col layout (9*Cin, Cout)
        "conv1_w": w(ks[0], (9 * 1, 32), 9),
        "conv1_b": 0.1 * jax.random.normal(ks[1], (32,), jnp.float32),
        "conv2_w": w(ks[2], (9 * 32, 64), 9 * 32),
        "conv2_b": 0.1 * jax.random.normal(ks[3], (64,), jnp.float32),
        "fc1_w": w(ks[4], (feat_dim, hidden_size), feat_dim),
        "fc1_b": 0.1 * jax.random.normal(ks[5], (hidden_size,), jnp.float32),
        "attn_fc_w": w(ks[6], (hidden_size + 1, hidden_size), hidden_size + 1),
        "attn_fc_b": 0.1 * jax.random.normal(ks[7], (hidden_size,), jnp.float32),
        "attn_w": w(ks[8], (hidden_size, 1), hidden_size),
        "attn_b": 0.1 * jax.random.normal(ks[9], (1,), jnp.float32),
        "fc2_w": w(ks[10], (hidden_size, output_size), hidden_size),
        "fc2_b": 0.1 * jax.random.normal(ks[11], (output_size,), jnp.float32),
    }


# --------------------------------- main ---------------------------------------

if __name__ == "__main__":
    B, S = 2, 16                 # batch, spatial size (input_size)
    hidden, out_size = 32, 17
    key = jax.random.PRNGKey(0)
    kx, kd, kw = jax.random.split(key, 3)
    x = jax.random.normal(kx, (B, 1, S, S), jnp.float32)     # NCHW, like PyTorch
    diff = jax.random.normal(kd, (B, 1), jnp.float32)
    params = init_params(kw, input_size=S, hidden_size=hidden, output_size=out_size)
    kparams = prepare_params(params)                          # one-time prep

    fwd = jax.jit(note_prediction_forward)
    out = jax.block_until_ready(fwd(x, diff, kparams))
    ref = jax.block_until_ready(reference_forward(x, diff, params))

    assert out.shape == (B, out_size), out.shape
    assert bool(jnp.all(jnp.isfinite(out)))
    max_err = float(jnp.max(jnp.abs(out - ref)))
    assert max_err < 1e-3, f"mismatch vs reference: {max_err}"
    print("KERNEL_OK")
</pallas_src>

<mosaic_0001>
module attributes {stable_mosaic.version = 11 : i64} {
  func.func @kernel(%arg0: memref<512x9xf32, #tpu.memory_space<vmem>>, %arg1: memref<2x1xf32, #tpu.memory_space<vmem>>, %arg2: memref<9x32xf32, #tpu.memory_space<vmem>>, %arg3: memref<1x32xf32, #tpu.memory_space<vmem>>, %arg4: memref<9x32x64xf32, #tpu.memory_space<vmem>>, %arg5: memref<1x64xf32, #tpu.memory_space<vmem>>, %arg6: memref<16x64x32xf32, #tpu.memory_space<vmem>>, %arg7: memref<1x32xf32, #tpu.memory_space<vmem>>, %arg8: memref<1x32xf32, #tpu.memory_space<vmem>>, %arg9: memref<32x32xf32, #tpu.memory_space<vmem>>, %arg10: memref<1x32xf32, #tpu.memory_space<vmem>>, %arg11: memref<1x32xf32, #tpu.memory_space<vmem>>, %arg12: memref<1x1xf32, #tpu.memory_space<vmem>>, %arg13: memref<32x17xf32, #tpu.memory_space<vmem>>, %arg14: memref<1x17xf32, #tpu.memory_space<vmem>>, %arg15: memref<2x17xf32, #tpu.memory_space<vmem>>, %arg16: memref<512x32xf32, #tpu.memory_space<vmem>>, %arg17: memref<2x10x10x32xf32, #tpu.memory_space<vmem>>, %arg18: memref<128x64xf32, #tpu.memory_space<vmem>>) attributes {dimension_semantics = [], scalar_prefetch = 0 : i64, scratch_operands = 3 : i64, tpu.core_type = #tpu.core_type<tc>} {
    %c0 = arith.constant 0 : index
    %c0_0 = arith.constant 0 : index
    %0 = vector.load %arg0[%c0, %c0_0] : memref<512x9xf32, #tpu.memory_space<vmem>>, vector<512x9xf32>
    %c0_1 = arith.constant 0 : index
    %c0_2 = arith.constant 0 : index
    %1 = vector.load %arg2[%c0_1, %c0_2] : memref<9x32xf32, #tpu.memory_space<vmem>>, vector<9x32xf32>
    %cst = arith.constant dense<0.000000e+00> : vector<512x32xf32>
    %2 = tpu.matmul %0, %1, %cst {dimension_numbers = #tpu.dot_dimension_numbers<[1], [0], [0], [1], [0, 0, 1, 1], [], []>} : vector<512x9xf32>, vector<9x32xf32>, vector<512x32xf32> -> vector<512x32xf32>
    %c0_3 = arith.constant 0 : index
    %c0_4 = arith.constant 0 : index
    %3 = vector.load %arg3[%c0_3, %c0_4] : memref<1x32xf32, #tpu.memory_space<vmem>>, vector<1x32xf32>
    %4 = vector.broadcast %3 : vector<1x32xf32> to vector<512x32xf32>
    %5 = arith.addf %2, %4 : vector<512x32xf32>
    %cst_5 = arith.constant 0.000000e+00 : f32
    %6 = vector.broadcast %cst_5 : f32 to vector<512x32xf32>
    %7 = arith.maximumf %5, %6 : vector<512x32xf32>
    %c0_6 = arith.constant 0 : index
    %c0_7 = arith.constant 0 : index
    %8 = vector.load %arg16[%c0_6, %c0_7] : memref<512x32xf32, #tpu.memory_space<vmem>>, vector<512x32xf32>
    tpu.vector_store %arg16[%c0_6, %c0_7], %7 {strides = array<i32>} : memref<512x32xf32, #tpu.memory_space<vmem>>, vector<512x32xf32>,
    %c0_8 = arith.constant 0 : index
    %c0_9 = arith.constant 0 : index
    %9 = tpu.strided_load %arg16[%c0_8, %c0_9] {strides = array<i32: 2, 1>} : memref<512x32xf32, #tpu.memory_space<vmem>>, vector<256x32xf32>
    %c1 = arith.constant 1 : index
    %c0_10 = arith.constant 0 : index
    %10 = tpu.strided_load %arg16[%c1, %c0_10] {strides = array<i32: 2, 1>} : memref<512x32xf32, #tpu.memory_space<vmem>>, vector<256x32xf32>
    %11 = arith.maximumf %9, %10 : vector<256x32xf32>
    %12 = vector.shape_cast %11 : vector<256x32xf32> to vector<16x16x32xf32>
    %13 = vector.extract_strided_slice %12 {offsets = [0, 0, 0], sizes = [16, 8, 32], strides = [1, 1, 1]} : vector<16x16x32xf32> to vector<16x8x32xf32>
    %14 = vector.extract_strided_slice %12 {offsets = [0, 8, 0], sizes = [16, 8, 32], strides = [1, 1, 1]} : vector<16x16x32xf32> to vector<16x8x32xf32>
    %15 = arith.maximumf %13, %14 : vector<16x8x32xf32>
    %cst_11 = arith.constant 0.000000e+00 : f32
    %16 = vector.broadcast %cst_11 : f32 to vector<2x10x10x32xf32>
    %c0_12 = arith.constant 0 : index
    %c0_13 = arith.constant 0 : index
    %c0_14 = arith.constant 0 : index
    %c0_15 = arith.constant 0 : index
    %17 = vector.load %arg17[%c0_12, %c0_13, %c0_14, %c0_15] : memref<2x10x10x32xf32, #tpu.memory_space<vmem>>, vector<2x10x10x32xf32>
    tpu.vector_store %arg17[%c0_12, %c0_13, %c0_14, %c0_15], %16 {strides = array<i32>} : memref<2x10x10x32xf32, #tpu.memory_space<vmem>>, vector<2x10x10x32xf32>,
    %18 = vector.shape_cast %15 : vector<16x8x32xf32> to vector<2x8x8x32xf32>
    %c0_16 = arith.constant 0 : index
    %c1_17 = arith.constant 1 : index
    %c1_18 = arith.constant 1 : index
    %c0_19 = arith.constant 0 : index
    %19 = vector.load %arg17[%c0_16, %c1_17, %c1_18, %c0_19] : memref<2x10x10x32xf32, #tpu.memory_space<vmem>>, vector<2x8x8x32xf32>
    tpu.vector_store %arg17[%c0_16, %c1_17, %c1_18, %c0_19], %18 {strides = array<i32>} : memref<2x10x10x32xf32, #tpu.memory_space<vmem>>, vector<2x8x8x32xf32>,
    %cst_20 = arith.constant 0.000000e+00 : f32
    %20 = vector.broadcast %cst_20 : f32 to vector<128x64xf32>
    %c0_21 = arith.constant 0 : index
    %c0_22 = arith.constant 0 : index
    %c0_23 = arith.constant 0 : index
    %c0_24 = arith.constant 0 : index
    %21 = vector.load %arg17[%c0_21, %c0_22, %c0_23, %c0_24] : memref<2x10x10x32xf32, #tpu.memory_space<vmem>>, vector<2x8x8x32xf32>
    %22 = vector.shape_cast %21 : vector<2x8x8x32xf32> to vector<128x32xf32>
    %c0_25 = arith.constant 0 : index
    %c0_26 = arith.constant 0 : index
    %c0_27 = arith.constant 0 : index
    %23 = vector.load %arg4[%c0_25, %c0_26, %c0_27] : memref<9x32x64xf32, #tpu.memory_space<vmem>>, vector<1x32x64xf32>
    %24 = vector.shape_cast %23 : vector<1x32x64xf32> to vector<32x64xf32>
    %cst_28 = arith.constant dense<0.000000e+00> : vector<128x64xf32>
    %25 = tpu.matmul %22, %24, %cst_28 {dimension_numbers = #tpu.dot_dimension_numbers<[1], [0], [0], [1], [0, 0, 1, 1], [], []>} : vector<128x32xf32>, vector<32x64xf32>, vector<128x64xf32> -> vector<128x64xf32>
    %26 = arith.addf %20, %25 : vector<128x64xf32>
    %c0_29 = arith.constant 0 : index
    %c0_30 = arith.constant 0 : index
    %c1_31 = arith.constant 1 : index
    %c0_32 = arith.constant 0 : index
    %27 = vector.load %arg17[%c0_29, %c0_30, %c1_31, %c0_32] : memref<2x10x10x32xf32, #tpu.memory_space<vmem>>, vector<2x8x8x32xf32>
    %28 = vector.shape_cast %27 : vector<2x8x8x32xf32> to vector<128x32xf32>
    %c1_33 = arith.constant 1 : index
    %c0_34 = arith.constant 0 : index
    %c0_35 = arith.constant 0 : index
    %29 = vector.load %arg4[%c1_33, %c0_34, %c0_35] : memref<9x32x64xf32, #tpu.memory_space<vmem>>, vector<1x32x64xf32>
    %30 = vector.shape_cast %29 : vector<1x32x64xf32> to vector<32x64xf32>
    %cst_36 = arith.constant dense<0.000000e+00> : vector<128x64xf32>
    %31 = tpu.matmul %28, %30, %cst_36 {dimension_numbers = #tpu.dot_dimension_numbers<[1], [0], [0], [1], [0, 0, 1, 1], [], []>} : vector<128x32xf32>, vector<32x64xf32>, vector<128x64xf32> -> vector<128x64xf32>
    %32 = arith.addf %26, %31 : vector<128x64xf32>
    %c0_37 = arith.constant 0 : index
    %c0_38 = arith.constant 0 : index
    %c2 = arith.constant 2 : index
    %c0_39 = arith.constant 0 : index
    %33 = vector.load %arg17[%c0_37, %c0_38, %c2, %c0_39] : memref<2x10x10x32xf32, #tpu.memory_space<vmem>>, vector<2x8x8x32xf32>
    %34 = vector.shape_cast %33 : vector<2x8x8x32xf32> to vector<128x32xf32>
    %c2_40 = arith.constant 2 : index
    %c0_41 = arith.constant 0 : index
    %c0_42 = arith.constant 0 : index
    %35 = vector.load %arg4[%c2_40, %c0_41, %c0_42] : memref<9x32x64xf32, #tpu.memory_space<vmem>>, vector<1x32x64xf32>
    %36 = vector.shape_cast %35 : vector<1x32x64xf32> to vector<32x64xf32>
    %cst_43 = arith.constant dense<0.000000e+00> : vector<128x64xf32>
    %37 = tpu.matmul %34, %36, %cst_43 {dimension_numbers = #tpu.dot_dimension_numbers<[1], [0], [0], [1], [0, 0, 1, 1], [], []>} : vector<128x32xf32>, vector<32x64xf32>, vector<128x64xf32> -> vector<128x64xf32>
    %38 = arith.addf %32, %37 : vector<128x64xf32>
    %c0_44 = arith.constant 0 : index
    %c1_45 = arith.constant 1 : index
    %c0_46 = arith.constant 0 : index
    %c0_47 = arith.constant 0 : index
    %39 = vector.load %arg17[%c0_44, %c1_45, %c0_46, %c0_47] : memref<2x10x10x32xf32, #tpu.memory_space<vmem>>, vector<2x8x8x32xf32>
    %40 = vector.shape_cast %39 : vector<2x8x8x32xf32> to vector<128x32xf32>
    %c3 = arith.constant 3 : index
    %c0_48 = arith.constant 0 : index
    %c0_49 = arith.constant 0 : index
    %41 = vector.load %arg4[%c3, %c0_48, %c0_49] : memref<9x32x64xf32, #tpu.memory_space<vmem>>, vector<1x32x64xf32>
    %42 = vector.shape_cast %41 : vector<1x32x64xf32> to vector<32x64xf32>
    %cst_50 = arith.constant dense<0.000000e+00> : vector<128x64xf32>
    %43 = tpu.matmul %40, %42, %cst_50 {dimension_numbers = #tpu.dot_dimension_numbers<[1], [0], [0], [1], [0, 0, 1, 1], [], []>} : vector<128x32xf32>, vector<32x64xf32>, vector<128x64xf32> -> vector<128x64xf32>
    %44 = arith.addf %38, %43 : vector<128x64xf32>
    %c0_51 = arith.constant 0 : index
    %c1_52 = arith.constant 1 : index
    %c1_53 = arith.constant 1 : index
    %c0_54 = arith.constant 0 : index
    %45 = vector.load %arg17[%c0_51, %c1_52, %c1_53, %c0_54] : memref<2x10x10x32xf32, #tpu.memory_space<vmem>>, vector<2x8x8x32xf32>
    %46 = vector.shape_cast %45 : vector<2x8x8x32xf32> to vector<128x32xf32>
    %c4 = arith.constant 4 : index
    %c0_55 = arith.constant 0 : index
    %c0_56 = arith.constant 0 : index
    %47 = vector.load %arg4[%c4, %c0_55, %c0_56] : memref<9x32x64xf32, #tpu.memory_space<vmem>>, vector<1x32x64xf32>
    %48 = vector.shape_cast %47 : vector<1x32x64xf32> to vector<32x64xf32>
    %cst_57 = arith.constant dense<0.000000e+00> : vector<128x64xf32>
    %49 = tpu.matmul %46, %48, %cst_57 {dimension_numbers = #tpu.dot_dimension_numbers<[1], [0], [0], [1], [0, 0, 1, 1], [], []>} : vector<128x32xf32>, vector<32x64xf32>, vector<128x64xf32> -> vector<128x64xf32>
    %50 = arith.addf %44, %49 : vector<128x64xf32>
    %c0_58 = arith.constant 0 : index
    %c1_59 = arith.constant 1 : index
    %c2_60 = arith.constant 2 : index
    %c0_61 = arith.constant 0 : index
    %51 = vector.load %arg17[%c0_58, %c1_59, %c2_60, %c0_61] : memref<2x10x10x32xf32, #tpu.memory_space<vmem>>, vector<2x8x8x32xf32>
    %52 = vector.shape_cast %51 : vector<2x8x8x32xf32> to vector<128x32xf32>
    %c5 = arith.constant 5 : index
    %c0_62 = arith.constant 0 : index
    %c0_63 = arith.constant 0 : index
    %53 = vector.load %arg4[%c5, %c0_62, %c0_63] : memref<9x32x64xf32, #tpu.memory_space<vmem>>, vector<1x32x64xf32>
    %54 = vector.shape_cast %53 : vector<1x32x64xf32> to vector<32x64xf32>
    %cst_64 = arith.constant dense<0.000000e+00> : vector<128x64xf32>
    %55 = tpu.matmul %52, %54, %cst_64 {dimension_numbers = #tpu.dot_dimension_numbers<[1], [0], [0], [1], [0, 0, 1, 1], [], []>} : vector<128x32xf32>, vector<32x64xf32>, vector<128x64xf32> -> vector<128x64xf32>
    %56 = arith.addf %50, %55 : vector<128x64xf32>
    %c0_65 = arith.constant 0 : index
    %c2_66 = arith.constant 2 : index
    %c0_67 = arith.constant 0 : index
    %c0_68 = arith.constant 0 : index
    %57 = vector.load %arg17[%c0_65, %c2_66, %c0_67, %c0_68] : memref<2x10x10x32xf32, #tpu.memory_space<vmem>>, vector<2x8x8x32xf32>
    %58 = vector.shape_cast %57 : vector<2x8x8x32xf32> to vector<128x32xf32>
    %c6 = arith.constant 6 : index
    %c0_69 = arith.constant 0 : index
    %c0_70 = arith.constant 0 : index
    %59 = vector.load %arg4[%c6, %c0_69, %c0_70] : memref<9x32x64xf32, #tpu.memory_space<vmem>>, vector<1x32x64xf32>
    %60 = vector.shape_cast %59 : vector<1x32x64xf32> to vector<32x64xf32>
    %cst_71 = arith.constant dense<0.000000e+00> : vector<128x64xf32>
    %61 = tpu.matmul %58, %60, %cst_71 {dimension_numbers = #tpu.dot_dimension_numbers<[1], [0], [0], [1], [0, 0, 1, 1], [], []>} : vector<128x32xf32>, vector<32x64xf32>, vector<128x64xf32> -> vector<128x64xf32>
    %62 = arith.addf %56, %61 : vector<128x64xf32>
    %c0_72 = arith.constant 0 : index
    %c2_73 = arith.constant 2 : index
    %c1_74 = arith.constant 1 : index
    %c0_75 = arith.constant 0 : index
    %63 = vector.load %arg17[%c0_72, %c2_73, %c1_74, %c0_75] : memref<2x10x10x32xf32, #tpu.memory_space<vmem>>, vector<2x8x8x32xf32>
    %64 = vector.shape_cast %63 : vector<2x8x8x32xf32> to vector<128x32xf32>
    %c7 = arith.constant 7 : index
    %c0_76 = arith.constant 0 : index
    %c0_77 = arith.constant 0 : index
    %65 = vector.load %arg4[%c7, %c0_76, %c0_77] : memref<9x32x64xf32, #tpu.memory_space<vmem>>, vector<1x32x64xf32>
    %66 = vector.shape_cast %65 : vector<1x32x64xf32> to vector<32x64xf32>
    %cst_78 = arith.constant dense<0.000000e+00> : vector<128x64xf32>
    %67 = tpu.matmul %64, %66, %cst_78 {dimension_numbers = #tpu.dot_dimension_numbers<[1], [0], [0], [1], [0, 0, 1, 1], [], []>} : vector<128x32xf32>, vector<32x64xf32>, vector<128x64xf32> -> vector<128x64xf32>
    %68 = arith.addf %62, %67 : vector<128x64xf32>
    %c0_79 = arith.constant 0 : index
    %c2_80 = arith.constant 2 : index
    %c2_81 = arith.constant 2 : index
    %c0_82 = arith.constant 0 : index
    %69 = vector.load %arg17[%c0_79, %c2_80, %c2_81, %c0_82] : memref<2x10x10x32xf32, #tpu.memory_space<vmem>>, vector<2x8x8x32xf32>
    %70 = vector.shape_cast %69 : vector<2x8x8x32xf32> to vector<128x32xf32>
    %c8 = arith.constant 8 : index
    %c0_83 = arith.constant 0 : index
    %c0_84 = arith.constant 0 : index
    %71 = vector.load %arg4[%c8, %c0_83, %c0_84] : memref<9x32x64xf32, #tpu.memory_space<vmem>>, vector<1x32x64xf32>
    %72 = vector.shape_cast %71 : vector<1x32x64xf32> to vector<32x64xf32>
    %cst_85 = arith.constant dense<0.000000e+00> : vector<128x64xf32>
    %73 = tpu.matmul %70, %72, %cst_85 {dimension_numbers = #tpu.dot_dimension_numbers<[1], [0], [0], [1], [0, 0, 1, 1], [], []>} : vector<128x32xf32>, vector<32x64xf32>, vector<128x64xf32> -> vector<128x64xf32>
    %74 = arith.addf %68, %73 : vector<128x64xf32>
    %c0_86 = arith.constant 0 : index
    %c0_87 = arith.constant 0 : index
    %75 = vector.load %arg5[%c0_86, %c0_87] : memref<1x64xf32, #tpu.memory_space<vmem>>, vector<1x64xf32>
    %76 = vector.broadcast %75 : vector<1x64xf32> to vector<128x64xf32>
    %77 = arith.addf %74, %76 : vector<128x64xf32>
    %cst_88 = arith.constant 0.000000e+00 : f32
    %78 = vector.broadcast %cst_88 : f32 to vector<128x64xf32>
    %79 = arith.maximumf %77, %78 : vector<128x64xf32>
    %c0_89 = arith.constant 0 : index
    %c0_90 = arith.constant 0 : index
    %80 = vector.load %arg18[%c0_89, %c0_90] : memref<128x64xf32, #tpu.memory_space<vmem>>, vector<128x64xf32>
    tpu.vector_store %arg18[%c0_89, %c0_90], %79 {strides = array<i32>} : memref<128x64xf32, #tpu.memory_space<vmem>>, vector<128x64xf32>,
    %c0_91 = arith.constant 0 : index
    %c0_92 = arith.constant 0 : index
    %81 = tpu.strided_load %arg18[%c0_91, %c0_92] {strides = array<i32: 2, 1>} : memref<128x64xf32, #tpu.memory_space<vmem>>, vector<64x64xf32>
    %c1_93 = arith.constant 1 : index
    %c0_94 = arith.constant 0 : index
    %82 = tpu.strided_load %arg18[%c1_93, %c0_94] {strides = array<i32: 2, 1>} : memref<128x64xf32, #tpu.memory_space<vmem>>, vector<64x64xf32>
    %83 = arith.maximumf %81, %82 : vector<64x64xf32>
    %84 = vector.shape_cast %83 : vector<64x64xf32> to vector<8x8x64xf32>
    %85 = vector.extract_strided_slice %84 {offsets = [0, 0, 0], sizes = [8, 4, 64], strides = [1, 1, 1]} : vector<8x8x64xf32> to vector<8x4x64xf32>
    %86 = vector.extract_strided_slice %84 {offsets = [0, 4, 0], sizes = [8, 4, 64], strides = [1, 1, 1]} : vector<8x8x64xf32> to vector<8x4x64xf32>
    %87 = arith.maximumf %85, %86 : vector<8x4x64xf32>
    %c0_95 = arith.constant 0 : index
    %c0_96 = arith.constant 0 : index
    %88 = vector.load %arg7[%c0_95, %c0_96] : memref<1x32xf32, #tpu.memory_space<vmem>>, vector<1x32xf32>
    %89 = vector.extract_strided_slice %87 {offsets = [0, 0, 0], sizes = [1, 4, 64], strides = [1, 1, 1]} : vector<8x4x64xf32> to vector<1x4x64xf32>
    %90 = vector.shape_cast %89 : vector<1x4x64xf32> to vector<4x64xf32>
    %91 = vector.extract_strided_slice %90 {offsets = [0, 0], sizes = [1, 64], strides = [1, 1]} : vector<4x64xf32> to vector<1x64xf32>
    %c0_97 = arith.constant 0 : index
    %c0_98 = arith.constant 0 : index
    %c0_99 = arith.constant 0 : index
    %92 = vector.load %arg6[%c0_97, %c0_98, %c0_99] : memref<16x64x32xf32, #tpu.memory_space<vmem>>, vector<1x64x32xf32>
    %93 = vector.shape_cast %92 : vector<1x64x32xf32> to vector<64x32xf32>
    %cst_100 = arith.constant dense<0.000000e+00> : vector<1x32xf32>
    %94 = tpu.matmul %91, %93, %cst_100 {dimension_numbers = #tpu.dot_dimension_numbers<[1], [0], [0], [1], [0, 0, 1, 1], [], []>} : vector<1x64xf32>, vector<64x32xf32>, vector<1x32xf32> -> vector<1x32xf32>
    %95 = arith.addf %88, %94 : vector<1x32xf32>
    %96 = vector.extract_strided_slice %90 {offsets = [1, 0], sizes = [1, 64], strides = [1, 1]} : vector<4x64xf32> to vector<1x64xf32>
    %c1_101 = arith.constant 1 : index
    %c0_102 = arith.constant 0 : index
    %c0_103 = arith.constant 0 : index
    %97 = vector.load %arg6[%c1_101, %c0_102, %c0_103] : memref<16x64x32xf32, #tpu.memory_space<vmem>>, vector<1x64x32xf32>
    %98 = vector.shape_cast %97 : vector<1x64x32xf32> to vector<64x32xf32>
    %cst_104 = arith.constant dense<0.000000e+00> : vector<1x32xf32>
    %99 = tpu.matmul %96, %98, %cst_104 {dimension_numbers = #tpu.dot_dimension_numbers<[1], [0], [0], [1], [0, 0, 1, 1], [], []>} : vector<1x64xf32>, vector<64x32xf32>, vector<1x32xf32> -> vector<1x32xf32>
    %100 = arith.addf %95, %99 : vector<1x32xf32>
    %101 = vector.extract_strided_slice %90 {offsets = [2, 0], sizes = [1, 64], strides = [1, 1]} : vector<4x64xf32> to vector<1x64xf32>
    %c2_105 = arith.constant 2 : index
    %c0_106 = arith.constant 0 : index
    %c0_107 = arith.constant 0 : index
    %102 = vector.load %arg6[%c2_105, %c0_106, %c0_107] : memref<16x64x32xf32, #tpu.memory_space<vmem>>, vector<1x64x32xf32>
    %103 = vector.shape_cast %102 : vector<1x64x32xf32> to vector<64x32xf32>
    %cst_108 = arith.constant dense<0.000000e+00> : vector<1x32xf32>
    %104 = tpu.matmul %101, %103, %cst_108 {dimension_numbers = #tpu.dot_dimension_numbers<[1], [0], [0], [1], [0, 0, 1, 1], [], []>} : vector<1x64xf32>, vector<64x32xf32>, vector<1x32xf32> -> vector<1x32xf32>
    %105 = arith.addf %100, %104 : vector<1x32xf32>
    %106 = vector.extract_strided_slice %90 {offsets = [3, 0], sizes = [1, 64], strides = [1, 1]} : vector<4x64xf32> to vector<1x64xf32>
    %c3_109 = arith.constant 3 : index
    %c0_110 = arith.constant 0 : index
    %c0_111 = arith.constant 0 : index
    %107 = vector.load %arg6[%c3_109, %c0_110, %c0_111] : memref<16x64x32xf32, #tpu.memory_space<vmem>>, vector<1x64x32xf32>
    %108 = vector.shape_cast %107 : vector<1x64x32xf32> to vector<64x32xf32>
    %cst_112 = arith.constant dense<0.000000e+00> : vector<1x32xf32>
    %109 = tpu.matmul %106, %108, %cst_112 {dimension_numbers = #tpu.dot_dimension_numbers<[1], [0], [0], [1], [0, 0, 1, 1], [], []>} : vector<1x64xf32>, vector<64x32xf32>, vector<1x32xf32> -> vector<1x32xf32>
    %110 = arith.addf %105, %109 : vector<1x32xf32>
    %111 = vector.extract_strided_slice %87 {offsets = [1, 0, 0], sizes = [1, 4, 64], strides = [1, 1, 1]} : vector<8x4x64xf32> to vector<1x4x64xf32>
    %112 = vector.shape_cast %111 : vector<1x4x64xf32> to vector<4x64xf32>
    %113 = vector.extract_strided_slice %112 {offsets = [0, 0], sizes = [1, 64], strides = [1, 1]} : vector<4x64xf32> to vector<1x64xf32>
    %c4_113 = arith.constant 4 : index
    %c0_114 = arith.constant 0 : index
    %c0_115 = arith.constant 0 : index
    %114 = vector.load %arg6[%c4_113, %c0_114, %c0_115] : memref<16x64x32xf32, #tpu.memory_space<vmem>>, vector<1x64x32xf32>
    %115 = vector.shape_cast %114 : vector<1x64x32xf32> to vector<64x32xf32>
    %cst_116 = arith.constant dense<0.000000e+00> : vector<1x32xf32>
    %116 = tpu.matmul %113, %115, %cst_116 {dimension_numbers = #tpu.dot_dimension_numbers<[1], [0], [0], [1], [0, 0, 1, 1], [], []>} : vector<1x64xf32>, vector<64x32xf32>, vector<1x32xf32> -> vector<1x32xf32>
    %117 = arith.addf %110, %116 : vector<1x32xf32>
    %118 = vector.extract_strided_slice %112 {offsets = [1, 0], sizes = [1, 64], strides = [1, 1]} : vector<4x64xf32> to vector<1x64xf32>
    %c5_117 = arith.constant 5 : index
    %c0_118 = arith.constant 0 : index
    %c0_119 = arith.constant 0 : index
    %119 = vector.load %arg6[%c5_117, %c0_118, %c0_119] : memref<16x64x32xf32, #tpu.memory_space<vmem>>, vector<1x64x32xf32>
    %120 = vector.shape_cast %119 : vector<1x64x32xf32> to vector<64x32xf32>
    %cst_120 = arith.constant dense<0.000000e+00> : vector<1x32xf32>
    %121 = tpu.matmul %118, %120, %cst_120 {dimension_numbers = #tpu.dot_dimension_numbers<[1], [0], [0], [1], [0, 0, 1, 1], [], []>} : vector<1x64xf32>, vector<64x32xf32>, vector<1x32xf32> -> vector<1x32xf32>
    %122 = arith.addf %117, %121 : vector<1x32xf32>
    %123 = vector.extract_strided_slice %112 {offsets = [2, 0], sizes = [1, 64], strides = [1, 1]} : vector<4x64xf32> to vector<1x64xf32>
    %c6_121 = arith.constant 6 : index
    %c0_122 = arith.constant 0 : index
    %c0_123 = arith.constant 0 : index
    %124 = vector.load %arg6[%c6_121, %c0_122, %c0_123] : memref<16x64x32xf32, #tpu.memory_space<vmem>>, vector<1x64x32xf32>
    %125 = vector.shape_cast %124 : vector<1x64x32xf32> to vector<64x32xf32>
    %cst_124 = arith.constant dense<0.000000e+00> : vector<1x32xf32>
    %126 = tpu.matmul %123, %125, %cst_124 {dimension_numbers = #tpu.dot_dimension_numbers<[1], [0], [0], [1], [0, 0, 1, 1], [], []>} : vector<1x64xf32>, vector<64x32xf32>, vector<1x32xf32> -> vector<1x32xf32>
    %127 = arith.addf %122, %126 : vector<1x32xf32>
    %128 = vector.extract_strided_slice %112 {offsets = [3, 0], sizes = [1, 64], strides = [1, 1]} : vector<4x64xf32> to vector<1x64xf32>
    %c7_125 = arith.constant 7 : index
    %c0_126 = arith.constant 0 : index
    %c0_127 = arith.constant 0 : index
    %129 = vector.load %arg6[%c7_125, %c0_126, %c0_127] : memref<16x64x32xf32, #tpu.memory_space<vmem>>, vector<1x64x32xf32>
    %130 = vector.shape_cast %129 : vector<1x64x32xf32> to vector<64x32xf32>
    %cst_128 = arith.constant dense<0.000000e+00> : vector<1x32xf32>
    %131 = tpu.matmul %128, %130, %cst_128 {dimension_numbers = #tpu.dot_dimension_numbers<[1], [0], [0], [1], [0, 0, 1, 1], [], []>} : vector<1x64xf32>, vector<64x32xf32>, vector<1x32xf32> -> vector<1x32xf32>
    %132 = arith.addf %127, %131 : vector<1x32xf32>
    %133 = vector.extract_strided_slice %87 {offsets = [2, 0, 0], sizes = [1, 4, 64], strides = [1, 1, 1]} : vector<8x4x64xf32> to vector<1x4x64xf32>
    %134 = vector.shape_cast %133 : vector<1x4x64xf32> to vector<4x64xf32>
    %135 = vector.extract_strided_slice %134 {offsets = [0, 0], sizes = [1, 64], strides = [1, 1]} : vector<4x64xf32> to vector<1x64xf32>
    %c8_129 = arith.constant 8 : index
    %c0_130 = arith.constant 0 : index
    %c0_131 = arith.constant 0 : index
    %136 = vector.load %arg6[%c8_129, %c0_130, %c0_131] : memref<16x64x32xf32, #tpu.memory_space<vmem>>, vector<1x64x32xf32>
    %137 = vector.shape_cast %136 : vector<1x64x32xf32> to vector<64x32xf32>
    %cst_132 = arith.constant dense<0.000000e+00> : vector<1x32xf32>
    %138 = tpu.matmul %135, %137, %cst_132 {dimension_numbers = #tpu.dot_dimension_numbers<[1], [0], [0], [1], [0, 0, 1, 1], [], []>} : vector<1x64xf32>, vector<64x32xf32>, vector<1x32xf32> -> vector<1x32xf32>
    %139 = arith.addf %132, %138 : vector<1x32xf32>
    %140 = vector.extract_strided_slice %134 {offsets = [1, 0], sizes = [1, 64], strides = [1, 1]} : vector<4x64xf32> to vector<1x64xf32>
    %c9 = arith.constant 9 : index
    %c0_133 = arith.constant 0 : index
    %c0_134 = arith.constant 0 : index
    %141 = vector.load %arg6[%c9, %c0_133, %c0_134] : memref<16x64x32xf32, #tpu.memory_space<vmem>>, vector<1x64x32xf32>
    %142 = vector.shape_cast %141 : vector<1x64x32xf32> to vector<64x32xf32>
    %cst_135 = arith.constant dense<0.000000e+00> : vector<1x32xf32>
    %143 = tpu.matmul %140, %142, %cst_135 {dimension_numbers = #tpu.dot_dimension_numbers<[1], [0], [0], [1], [0, 0, 1, 1], [], []>} : vector<1x64xf32>, vector<64x32xf32>, vector<1x32xf32> -> vector<1x32xf32>
    %144 = arith.addf %139, %143 : vector<1x32xf32>
    %145 = vector.extract_strided_slice %134 {offsets = [2, 0], sizes = [1, 64], strides = [1, 1]} : vector<4x64xf32> to vector<1x64xf32>
    %c10 = arith.constant 10 : index
    %c0_136 = arith.constant 0 : index
    %c0_137 = arith.constant 0 : index
    %146 = vector.load %arg6[%c10, %c0_136, %c0_137] : memref<16x64x32xf32, #tpu.memory_space<vmem>>, vector<1x64x32xf32>
    %147 = vector.shape_cast %146 : vector<1x64x32xf32> to vector<64x32xf32>
    %cst_138 = arith.constant dense<0.000000e+00> : vector<1x32xf32>
    %148 = tpu.matmul %145, %147, %cst_138 {dimension_numbers = #tpu.dot_dimension_numbers<[1], [0], [0], [1], [0, 0, 1, 1], [], []>} : vector<1x64xf32>, vector<64x32xf32>, vector<1x32xf32> -> vector<1x32xf32>
    %149 = arith.addf %144, %148 : vector<1x32xf32>
    %150 = vector.extract_strided_slice %134 {offsets = [3, 0], sizes = [1, 64], strides = [1, 1]} : vector<4x64xf32> to vector<1x64xf32>
    %c11 = arith.constant 11 : index
    %c0_139 = arith.constant 0 : index
    %c0_140 = arith.constant 0 : index
    %151 = vector.load %arg6[%c11, %c0_139, %c0_140] : memref<16x64x32xf32, #tpu.memory_space<vmem>>, vector<1x64x32xf32>
    %152 = vector.shape_cast %151 : vector<1x64x32xf32> to vector<64x32xf32>
    %cst_141 = arith.constant dense<0.000000e+00> : vector<1x32xf32>
    %153 = tpu.matmul %150, %152, %cst_141 {dimension_numbers = #tpu.dot_dimension_numbers<[1], [0], [0], [1], [0, 0, 1, 1], [], []>} : vector<1x64xf32>, vector<64x32xf32>, vector<1x32xf32> -> vector<1x32xf32>
    %154 = arith.addf %149, %153 : vector<1x32xf32>
    %155 = vector.extract_strided_slice %87 {offsets = [3, 0, 0], sizes = [1, 4, 64], strides = [1, 1, 1]} : vector<8x4x64xf32> to vector<1x4x64xf32>
    %156 = vector.shape_cast %155 : vector<1x4x64xf32> to vector<4x64xf32>
    %157 = vector.extract_strided_slice %156 {offsets = [0, 0], sizes = [1, 64], strides = [1, 1]} : vector<4x64xf32> to vector<1x64xf32>
    %c12 = arith.constant 12 : index
    %c0_142 = arith.constant 0 : index
    %c0_143 = arith.constant 0 : index
    %158 = vector.load %arg6[%c12, %c0_142, %c0_143] : memref<16x64x32xf32, #tpu.memory_space<vmem>>, vector<1x64x32xf32>
    %159 = vector.shape_cast %158 : vector<1x64x32xf32> to vector<64x32xf32>
    %cst_144 = arith.constant dense<0.000000e+00> : vector<1x32xf32>
    %160 = tpu.matmul %157, %159, %cst_144 {dimension_numbers = #tpu.dot_dimension_numbers<[1], [0], [0], [1], [0, 0, 1, 1], [], []>} : vector<1x64xf32>, vector<64x32xf32>, vector<1x32xf32> -> vector<1x32xf32>
    %161 = arith.addf %154, %160 : vector<1x32xf32>
    %162 = vector.extract_strided_slice %156 {offsets = [1, 0], sizes = [1, 64], strides = [1, 1]} : vector<4x64xf32> to vector<1x64xf32>
    %c13 = arith.constant 13 : index
    %c0_145 = arith.constant 0 : index
    %c0_146 = arith.constant 0 : index
    %163 = vector.load %arg6[%c13, %c0_145, %c0_146] : memref<16x64x32xf32, #tpu.memory_space<vmem>>, vector<1x64x32xf32>
    %164 = vector.shape_cast %163 : vector<1x64x32xf32> to vector<64x32xf32>
    %cst_147 = arith.constant dense<0.000000e+00> : vector<1x32xf32>
    %165 = tpu.matmul %162, %164, %cst_147 {dimension_numbers = #tpu.dot_dimension_numbers<[1], [0], [0], [1], [0, 0, 1, 1], [], []>} : vector<1x64xf32>, vector<64x32xf32>, vector<1x32xf32> -> vector<1x32xf32>
    %166 = arith.addf %161, %165 : vector<1x32xf32>
    %167 = vector.extract_strided_slice %156 {offsets = [2, 0], sizes = [1, 64], strides = [1, 1]} : vector<4x64xf32> to vector<1x64xf32>
    %c14 = arith.constant 14 : index
    %c0_148 = arith.constant 0 : index
    %c0_149 = arith.constant 0 : index
    %168 = vector.load %arg6[%c14, %c0_148, %c0_149] : memref<16x64x32xf32, #tpu.memory_space<vmem>>, vector<1x64x32xf32>
    %169 = vector.shape_cast %168 : vector<1x64x32xf32> to vector<64x32xf32>
    %cst_150 = arith.constant dense<0.000000e+00> : vector<1x32xf32>
    %170 = tpu.matmul %167, %169, %cst_150 {dimension_numbers = #tpu.dot_dimension_numbers<[1], [0], [0], [1], [0, 0, 1, 1], [], []>} : vector<1x64xf32>, vector<64x32xf32>, vector<1x32xf32> -> vector<1x32xf32>
    %171 = arith.addf %166, %170 : vector<1x32xf32>
    %172 = vector.extract_strided_slice %156 {offsets = [3, 0], sizes = [1, 64], strides = [1, 1]} : vector<4x64xf32> to vector<1x64xf32>
    %c15 = arith.constant 15 : index
    %c0_151 = arith.constant 0 : index
    %c0_152 = arith.constant 0 : index
    %173 = vector.load %arg6[%c15, %c0_151, %c0_152] : memref<16x64x32xf32, #tpu.memory_space<vmem>>, vector<1x64x32xf32>
    %174 = vector.shape_cast %173 : vector<1x64x32xf32> to vector<64x32xf32>
    %cst_153 = arith.constant dense<0.000000e+00> : vector<1x32xf32>
    %175 = tpu.matmul %172, %174, %cst_153 {dimension_numbers = #tpu.dot_dimension_numbers<[1], [0], [0], [1], [0, 0, 1, 1], [], []>} : vector<1x64xf32>, vector<64x32xf32>, vector<1x32xf32> -> vector<1x32xf32>
    %176 = arith.addf %171, %175 : vector<1x32xf32>
    %c0_154 = arith.constant 0 : index
    %c0_155 = arith.constant 0 : index
    %177 = vector.load %arg7[%c0_154, %c0_155] : memref<1x32xf32, #tpu.memory_space<vmem>>, vector<1x32xf32>
    %178 = vector.extract_strided_slice %87 {offsets = [4, 0, 0], sizes = [1, 4, 64], strides = [1, 1, 1]} : vector<8x4x64xf32> to vector<1x4x64xf32>
    %179 = vector.shape_cast %178 : vector<1x4x64xf32> to vector<4x64xf32>
    %180 = vector.extract_strided_slice %179 {offsets = [0, 0], sizes = [1, 64], strides = [1, 1]} : vector<4x64xf32> to vector<1x64xf32>
    %c0_156 = arith.constant 0 : index
    %c0_157 = arith.constant 0 : index
    %c0_158 = arith.constant 0 : index
    %181 = vector.load %arg6[%c0_156, %c0_157, %c0_158] : memref<16x64x32xf32, #tpu.memory_space<vmem>>, vector<1x64x32xf32>
    %182 = vector.shape_cast %181 : vector<1x64x32xf32> to vector<64x32xf32>
    %cst_159 = arith.constant dense<0.000000e+00> : vector<1x32xf32>
    %183 = tpu.matmul %180, %182, %cst_159 {dimension_numbers = #tpu.dot_dimension_numbers<[1], [0], [0], [1], [0, 0, 1, 1], [], []>} : vector<1x64xf32>, vector<64x32xf32>, vector<1x32xf32> -> vector<1x32xf32>
    %184 = arith.addf %177, %183 : vector<1x32xf32>
    %185 = vector.extract_strided_slice %179 {offsets = [1, 0], sizes = [1, 64], strides = [1, 1]} : vector<4x64xf32> to vector<1x64xf32>
    %c1_160 = arith.constant 1 : index
    %c0_161 = arith.constant 0 : index
    %c0_162 = arith.constant 0 : index
    %186 = vector.load %arg6[%c1_160, %c0_161, %c0_162] : memref<16x64x32xf32, #tpu.memory_space<vmem>>, vector<1x64x32xf32>
    %187 = vector.shape_cast %186 : vector<1x64x32xf32> to vector<64x32xf32>
    %cst_163 = arith.constant dense<0.000000e+00> : vector<1x32xf32>
    %188 = tpu.matmul %185, %187, %cst_163 {dimension_numbers = #tpu.dot_dimension_numbers<[1], [0], [0], [1], [0, 0, 1, 1], [], []>} : vector<1x64xf32>, vector<64x32xf32>, vector<1x32xf32> -> vector<1x32xf32>
    %189 = arith.addf %184, %188 : vector<1x32xf32>
    %190 = vector.extract_strided_slice %179 {offsets = [2, 0], sizes = [1, 64], strides = [1, 1]} : vector<4x64xf32> to vector<1x64xf32>
    %c2_164 = arith.constant 2 : index
    %c0_165 = arith.constant 0 : index
    %c0_166 = arith.constant 0 : index
    %191 = vector.load %arg6[%c2_164, %c0_165, %c0_166] : memref<16x64x32xf32, #tpu.memory_space<vmem>>, vector<1x64x32xf32>
    %192 = vector.shape_cast %191 : vector<1x64x32xf32> to vector<64x32xf32>
    %cst_167 = arith.constant dense<0.000000e+00> : vector<1x32xf32>
    %193 = tpu.matmul %190, %192, %cst_167 {dimension_numbers = #tpu.dot_dimension_numbers<[1], [0], [0], [1], [0, 0, 1, 1], [], []>} : vector<1x64xf32>, vector<64x32xf32>, vector<1x32xf32> -> vector<1x32xf32>
    %194 = arith.addf %189, %193 : vector<1x32xf32>
    %195 = vector.extract_strided_slice %179 {offsets = [3, 0], sizes = [1, 64], strides = [1, 1]} : vector<4x64xf32> to vector<1x64xf32>
    %c3_168 = arith.constant 3 : index
    %c0_169 = arith.constant 0 : index
    %c0_170 = arith.constant 0 : index
    %196 = vector.load %arg6[%c3_168, %c0_169, %c0_170] : memref<16x64x32xf32, #tpu.memory_space<vmem>>, vector<1x64x32xf32>
    %197 = vector.shape_cast %196 : vector<1x64x32xf32> to vector<64x32xf32>
    %cst_171 = arith.constant dense<0.000000e+00> : vector<1x32xf32>
    %198 = tpu.matmul %195, %197, %cst_171 {dimension_numbers = #tpu.dot_dimension_numbers<[1], [0], [0], [1], [0, 0, 1, 1], [], []>} : vector<1x64xf32>, vector<64x32xf32>, vector<1x32xf32> -> vector<1x32xf32>
    %199 = arith.addf %194, %198 : vector<1x32xf32>
    %200 = vector.extract_strided_slice %87 {offsets = [5, 0, 0], sizes = [1, 4, 64], strides = [1, 1, 1]} : vector<8x4x64xf32> to vector<1x4x64xf32>
    %201 = vector.shape_cast %200 : vector<1x4x64xf32> to vector<4x64xf32>
    %202 = vector.extract_strided_slice %201 {offsets = [0, 0], sizes = [1, 64], strides = [1, 1]} : vector<4x64xf32> to vector<1x64xf32>
    %c4_172 = arith.constant 4 : index
    %c0_173 = arith.constant 0 : index
    %c0_174 = arith.constant 0 : index
    %203 = vector.load %arg6[%c4_172, %c0_173, %c0_174] : memref<16x64x32xf32, #tpu.memory_space<vmem>>, vector<1x64x32xf32>
    %204 = vector.shape_cast %203 : vector<1x64x32xf32> to vector<64x32xf32>
    %cst_175 = arith.constant dense<0.000000e+00> : vector<1x32xf32>
    %205 = tpu.matmul %202, %204, %cst_175 {dimension_numbers = #tpu.dot_dimension_numbers<[1], [0], [0], [1], [0, 0, 1, 1], [], []>} : vector<1x64xf32>, vector<64x32xf32>, vector<1x32xf32> -> vector<1x32xf32>
    %206 = arith.addf %199, %205 : vector<1x32xf32>
    %207 = vector.extract_strided_slice %201 {offsets = [1, 0], sizes = [1, 64], strides = [1, 1]} : vector<4x64xf32> to vector<1x64xf32>
    %c5_176 = arith.constant 5 : index
    %c0_177 = arith.constant 0 : index
    %c0_178 = arith.constant 0 : index
    %208 = vector.load %arg6[%c5_176, %c0_177, %c0_178] : memref<16x64x32xf32, #tpu.memory_space<vmem>>, vector<1x64x32xf32>
    %209 = vector.shape_cast %208 : vector<1x64x32xf32> to vector<64x32xf32>
    %cst_179 = arith.constant dense<0.000000e+00> : vector<1x32xf32>
    %210 = tpu.matmul %207, %209, %cst_179 {dimension_numbers = #tpu.dot_dimension_numbers<[1], [0], [0], [1], [0, 0, 1, 1], [], []>} : vector<1x64xf32>, vector<64x32xf32>, vector<1x32xf32> -> vector<1x32xf32>
    %211 = arith.addf %206, %210 : vector<1x32xf32>
    %212 = vector.extract_strided_slice %201 {offsets = [2, 0], sizes = [1, 64], strides = [1, 1]} : vector<4x64xf32> to vector<1x64xf32>
    %c6_180 = arith.constant 6 : index
    %c0_181 = arith.constant 0 : index
    %c0_182 = arith.constant 0 : index
    %213 = vector.load %arg6[%c6_180, %c0_181, %c0_182] : memref<16x64x32xf32, #tpu.memory_space<vmem>>, vector<1x64x32xf32>
    %214 = vector.shape_cast %213 : vector<1x64x32xf32> to vector<64x32xf32>
    %cst_183 = arith.constant dense<0.000000e+00> : vector<1x32xf32>
    %215 = tpu.matmul %212, %214, %cst_183 {dimension_numbers = #tpu.dot_dimension_numbers<[1], [0], [0], [1], [0, 0, 1, 1], [], []>} : vector<1x64xf32>, vector<64x32xf32>, vector<1x32xf32> -> vector<1x32xf32>
    %216 = arith.addf %211, %215 : vector<1x32xf32>
    %217 = vector.extract_strided_slice %201 {offsets = [3, 0], sizes = [1, 64], strides = [1, 1]} : vector<4x64xf32> to vector<1x64xf32>
    %c7_184 = arith.constant 7 : index
    %c0_185 = arith.constant 0 : index
    %c0_186 = arith.constant 0 : index
    %218 = vector.load %arg6[%c7_184, %c0_185, %c0_186] : memref<16x64x32xf32, #tpu.memory_space<vmem>>, vector<1x64x32xf32>
    %219 = vector.shape_cast %218 : vector<1x64x32xf32> to vector<64x32xf32>
    %cst_187 = arith.constant dense<0.000000e+00> : vector<1x32xf32>
    %220 = tpu.matmul %217, %219, %cst_187 {dimension_numbers = #tpu.dot_dimension_numbers<[1], [0], [0], [1], [0, 0, 1, 1], [], []>} : vector<1x64xf32>, vector<64x32xf32>, vector<1x32xf32> -> vector<1x32xf32>
    %221 = arith.addf %216, %220 : vector<1x32xf32>
    %222 = vector.extract_strided_slice %87 {offsets = [6, 0, 0], sizes = [1, 4, 64], strides = [1, 1, 1]} : vector<8x4x64xf32> to vector<1x4x64xf32>
    %223 = vector.shape_cast %222 : vector<1x4x64xf32> to vector<4x64xf32>
    %224 = vector.extract_strided_slice %223 {offsets = [0, 0], sizes = [1, 64], strides = [1, 1]} : vector<4x64xf32> to vector<1x64xf32>
    %c8_188 = arith.constant 8 : index
    %c0_189 = arith.constant 0 : index
    %c0_190 = arith.constant 0 : index
    %225 = vector.load %arg6[%c8_188, %c0_189, %c0_190] : memref<16x64x32xf32, #tpu.memory_space<vmem>>, vector<1x64x32xf32>
    %226 = vector.shape_cast %225 : vector<1x64x32xf32> to vector<64x32xf32>
    %cst_191 = arith.constant dense<0.000000e+00> : vector<1x32xf32>
    %227 = tpu.matmul %224, %226, %cst_191 {dimension_numbers = #tpu.dot_dimension_numbers<[1], [0], [0], [1], [0, 0, 1, 1], [], []>} : vector<1x64xf32>, vector<64x32xf32>, vector<1x32xf32> -> vector<1x32xf32>
    %228 = arith.addf %221, %227 : vector<1x32xf32>
    %229 = vector.extract_strided_slice %223 {offsets = [1, 0], sizes = [1, 64], strides = [1, 1]} : vector<4x64xf32> to vector<1x64xf32>
    %c9_192 = arith.constant 9 : index
    %c0_193 = arith.constant 0 : index
    %c0_194 = arith.constant 0 : index
    %230 = vector.load %arg6[%c9_192, %c0_193, %c0_194] : memref<16x64x32xf32, #tpu.memory_space<vmem>>, vector<1x64x32xf32>
    %231 = vector.shape_cast %230 : vector<1x64x32xf32> to vector<64x32xf32>
    %cst_195 = arith.constant dense<0.000000e+00> : vector<1x32xf32>
    %232 = tpu.matmul %229, %231, %cst_195 {dimension_numbers = #tpu.dot_dimension_numbers<[1], [0], [0], [1], [0, 0, 1, 1], [], []>} : vector<1x64xf32>, vector<64x32xf32>, vector<1x32xf32> -> vector<1x32xf32>
    %233 = arith.addf %228, %232 : vector<1x32xf32>
    %234 = vector.extract_strided_slice %223 {offsets = [2, 0], sizes = [1, 64], strides = [1, 1]} : vector<4x64xf32> to vector<1x64xf32>
    %c10_196 = arith.constant 10 : index
    %c0_197 = arith.constant 0 : index
    %c0_198 = arith.constant 0 : index
    %235 = vector.load %arg6[%c10_196, %c0_197, %c0_198] : memref<16x64x32xf32, #tpu.memory_space<vmem>>, vector<1x64x32xf32>
    %236 = vector.shape_cast %235 : vector<1x64x32xf32> to vector<64x32xf32>
    %cst_199 = arith.constant dense<0.000000e+00> : vector<1x32xf32>
    %237 = tpu.matmul %234, %236, %cst_199 {dimension_numbers = #tpu.dot_dimension_numbers<[1], [0], [0], [1], [0, 0, 1, 1], [], []>} : vector<1x64xf32>, vector<64x32xf32>, vector<1x32xf32> -> vector<1x32xf32>
    %238 = arith.addf %233, %237 : vector<1x32xf32>
    %239 = vector.extract_strided_slice %223 {offsets = [3, 0], sizes = [1, 64], strides = [1, 1]} : vector<4x64xf32> to vector<1x64xf32>
    %c11_200 = arith.constant 11 : index
    %c0_201 = arith.constant 0 : index
    %c0_202 = arith.constant 0 : index
    %240 = vector.load %arg6[%c11_200, %c0_201, %c0_202] : memref<16x64x32xf32, #tpu.memory_space<vmem>>, vector<1x64x32xf32>
    %241 = vector.shape_cast %240 : vector<1x64x32xf32> to vector<64x32xf32>
    %cst_203 = arith.constant dense<0.000000e+00> : vector<1x32xf32>
    %242 = tpu.matmul %239, %241, %cst_203 {dimension_numbers = #tpu.dot_dimension_numbers<[1], [0], [0], [1], [0, 0, 1, 1], [], []>} : vector<1x64xf32>, vector<64x32xf32>, vector<1x32xf32> -> vector<1x32xf32>
    %243 = arith.addf %238, %242 : vector<1x32xf32>
    %244 = vector.extract_strided_slice %87 {offsets = [7, 0, 0], sizes = [1, 4, 64], strides = [1, 1, 1]} : vector<8x4x64xf32> to vector<1x4x64xf32>
    %245 = vector.shape_cast %244 : vector<1x4x64xf32> to vector<4x64xf32>
    %246 = vector.extract_strided_slice %245 {offsets = [0, 0], sizes = [1, 64], strides = [1, 1]} : vector<4x64xf32> to vector<1x64xf32>
    %c12_204 = arith.constant 12 : index
    %c0_205 = arith.constant 0 : index
    %c0_206 = arith.constant 0 : index
    %247 = vector.load %arg6[%c12_204, %c0_205, %c0_206] : memref<16x64x32xf32, #tpu.memory_space<vmem>>, vector<1x64x32xf32>
    %248 = vector.shape_cast %247 : vector<1x64x32xf32> to vector<64x32xf32>
    %cst_207 = arith.constant dense<0.000000e+00> : vector<1x32xf32>
    %249 = tpu.matmul %246, %248, %cst_207 {dimension_numbers = #tpu.dot_dimension_numbers<[1], [0], [0], [1], [0, 0, 1, 1], [], []>} : vector<1x64xf32>, vector<64x32xf32>, vector<1x32xf32> -> vector<1x32xf32>
    %250 = arith.addf %243, %249 : vector<1x32xf32>
    %251 = vector.extract_strided_slice %245 {offsets = [1, 0], sizes = [1, 64], strides = [1, 1]} : vector<4x64xf32> to vector<1x64xf32>
    %c13_208 = arith.constant 13 : index
    %c0_209 = arith.constant 0 : index
    %c0_210 = arith.constant 0 : index
    %252 = vector.load %arg6[%c13_208, %c0_209, %c0_210] : memref<16x64x32xf32, #tpu.memory_space<vmem>>, vector<1x64x32xf32>
    %253 = vector.shape_cast %252 : vector<1x64x32xf32> to vector<64x32xf32>
    %cst_211 = arith.constant dense<0.000000e+00> : vector<1x32xf32>
    %254 = tpu.matmul %251, %253, %cst_211 {dimension_numbers = #tpu.dot_dimension_numbers<[1], [0], [0], [1], [0, 0, 1, 1], [], []>} : vector<1x64xf32>, vector<64x32xf32>, vector<1x32xf32> -> vector<1x32xf32>
    %255 = arith.addf %250, %254 : vector<1x32xf32>
    %256 = vector.extract_strided_slice %245 {offsets = [2, 0], sizes = [1, 64], strides = [1, 1]} : vector<4x64xf32> to vector<1x64xf32>
    %c14_212 = arith.constant 14 : index
    %c0_213 = arith.constant 0 : index
    %c0_214 = arith.constant 0 : index
    %257 = vector.load %arg6[%c14_212, %c0_213, %c0_214] : memref<16x64x32xf32, #tpu.memory_space<vmem>>, vector<1x64x32xf32>
    %258 = vector.shape_cast %257 : vector<1x64x32xf32> to vector<64x32xf32>
    %cst_215 = arith.constant dense<0.000000e+00> : vector<1x32xf32>
    %259 = tpu.matmul %256, %258, %cst_215 {dimension_numbers = #tpu.dot_dimension_numbers<[1], [0], [0], [1], [0, 0, 1, 1], [], []>} : vector<1x64xf32>, vector<64x32xf32>, vector<1x32xf32> -> vector<1x32xf32>
    %260 = arith.addf %255, %259 : vector<1x32xf32>
    %261 = vector.extract_strided_slice %245 {offsets = [3, 0], sizes = [1, 64], strides = [1, 1]} : vector<4x64xf32> to vector<1x64xf32>
    %c15_216 = arith.constant 15 : index
    %c0_217 = arith.constant 0 : index
    %c0_218 = arith.constant 0 : index
    %262 = vector.load %arg6[%c15_216, %c0_217, %c0_218] : memref<16x64x32xf32, #tpu.memory_space<vmem>>, vector<1x64x32xf32>
    %263 = vector.shape_cast %262 : vector<1x64x32xf32> to vector<64x32xf32>
    %cst_219 = arith.constant dense<0.000000e+00> : vector<1x32xf32>
    %264 = tpu.matmul %261, %263, %cst_219 {dimension_numbers = #tpu.dot_dimension_numbers<[1], [0], [0], [1], [0, 0, 1, 1], [], []>} : vector<1x64xf32>, vector<64x32xf32>, vector<1x32xf32> -> vector<1x32xf32>
    %265 = arith.addf %260, %264 : vector<1x32xf32>
    %266 = tpu.concatenate %176, %265 in 0 : vector<1x32xf32>, vector<1x32xf32> -> vector<2x32xf32>
    %c0_220 = arith.constant 0 : index
    %c0_221 = arith.constant 0 : index
    %267 = vector.load %arg9[%c0_220, %c0_221] : memref<32x32xf32, #tpu.memory_space<vmem>>, vector<32x32xf32>
    %cst_222 = arith.constant dense<0.000000e+00> : vector<2x32xf32>
    %268 = tpu.matmul %266, %267, %cst_222 {dimension_numbers = #tpu.dot_dimension_numbers<[1], [0], [0], [1], [0, 0, 1, 1], [], []>} : vector<2x32xf32>, vector<32x32xf32>, vector<2x32xf32> -> vector<2x32xf32>
    %c0_223 = arith.constant 0 : index
    %c0_224 = arith.constant 0 : index
    %269 = vector.load %arg1[%c0_223, %c0_224] : memref<2x1xf32, #tpu.memory_space<vmem>>, vector<2x1xf32>
    %c0_225 = arith.constant 0 : index
    %c0_226 = arith.constant 0 : index
    %270 = vector.load %arg8[%c0_225, %c0_226] : memref<1x32xf32, #tpu.memory_space<vmem>>, vector<1x32xf32>
    %271 = vector.broadcast %269 : vector<2x1xf32> to vector<2x32xf32>
    %272 = vector.broadcast %270 : vector<1x32xf32> to vector<2x32xf32>
    %273 = arith.mulf %271, %272 : vector<2x32xf32>
    %274 = arith.addf %268, %273 : vector<2x32xf32>
    %c0_227 = arith.constant 0 : index
    %c0_228 = arith.constant 0 : index
    %275 = vector.load %arg10[%c0_227, %c0_228] : memref<1x32xf32, #tpu.memory_space<vmem>>, vector<1x32xf32>
    %276 = vector.broadcast %275 : vector<1x32xf32> to vector<2x32xf32>
    %277 = arith.addf %274, %276 : vector<2x32xf32>
    %c0_229 = arith.constant 0 : index
    %c0_230 = arith.constant 0 : index
    %278 = vector.load %arg11[%c0_229, %c0_230] : memref<1x32xf32, #tpu.memory_space<vmem>>, vector<1x32xf32>
    %279 = vector.broadcast %278 : vector<1x32xf32> to vector<2x32xf32>
    %280 = arith.mulf %277, %279 : vector<2x32xf32>
    %cst_231 = arith.constant dense<0.000000e+00> : vector<2xf32>
    %281 = vector.multi_reduction <add>, %280, %cst_231 [1] : vector<2x32xf32> to vector<2xf32>
    %282 = vector.shape_cast %281 : vector<2xf32> to vector<2x1xf32>
    %c0_232 = arith.constant 0 : index
    %c0_233 = arith.constant 0 : index
    %283 = vector.load %arg12[%c0_232, %c0_233] : memref<1x1xf32, #tpu.memory_space<vmem>>, vector<1x1xf32>
    %284 = vector.broadcast %283 : vector<1x1xf32> to vector<2x1xf32>
    %285 = arith.addf %282, %284 : vector<2x1xf32>
    %286 = vector.broadcast %285 : vector<2x1xf32> to vector<2x32xf32>
    %287 = arith.mulf %266, %286 : vector<2x32xf32>
    %c0_234 = arith.constant 0 : index
    %c0_235 = arith.constant 0 : index
    %288 = vector.load %arg13[%c0_234, %c0_235] : memref<32x17xf32, #tpu.memory_space<vmem>>, vector<32x17xf32>
    %cst_236 = arith.constant dense<0.000000e+00> : vector<2x17xf32>
    %289 = tpu.matmul %287, %288, %cst_236 {dimension_numbers = #tpu.dot_dimension_numbers<[1], [0], [0], [1], [0, 0, 1, 1], [], []>} : vector<2x32xf32>, vector<32x17xf32>, vector<2x17xf32> -> vector<2x17xf32>
    %c0_237 = arith.constant 0 : index
    %c0_238 = arith.constant 0 : index
    %290 = vector.load %arg14[%c0_237, %c0_238] : memref<1x17xf32, #tpu.memory_space<vmem>>, vector<1x17xf32>
    %291 = vector.broadcast %290 : vector<1x17xf32> to vector<2x17xf32>
    %292 = arith.addf %289, %291 : vector<2x17xf32>
    %c0_239 = arith.constant 0 : index
    %c0_240 = arith.constant 0 : index
    %293 = vector.load %arg15[%c0_239, %c0_240] : memref<2x17xf32, #tpu.memory_space<vmem>>, vector<2x17xf32>
    tpu.vector_store %arg15[%c0_239, %c0_240], %292 {strides = array<i32>} : memref<2x17xf32, #tpu.memory_space<vmem>>, vector<2x17xf32>,
    return
  }
}

</mosaic_0001>

<bundles_post_ra>
// kernel: note_prediction_forward.1
= control target key start
LH: loop header
LB: loop body
LE: loop exit
PB: predicated region body
PF: predicated region fallthrough
CT: control target
= control target key end

     0   :  { %s10713_s0 = inlined_call_operand.vmem [shape: f32[512,9], index: 0, kind: input, shape index: {}]   ;;  %s10714_s1 = inlined_call_operand.vmem [shape: f32[2,1], index: 1, kind: input, shape index: {}]   ;;  %s10715_s2 = inlined_call_operand.vmem [shape: f32[9,32], index: 2, kind: input, shape index: {}]   ;;  %s10716_s3 = inlined_call_operand.vmem [shape: f32[1,32], index: 3, kind: input, shape index: {}]   ;;  %s10717_s4 = inlined_call_operand.vmem [shape: f32[9,32,64], index: 4, kind: input, shape index: {}]   ;;  %s10718_s5 = inlined_call_operand.vmem [shape: f32[1,64], index: 5, kind: input, shape index: {}]   ;;  %s10719_s6 = inlined_call_operand.vmem [shape: f32[16,64,32], index: 6, kind: input, shape index: {}]   ;;  %s10720_s7 = inlined_call_operand.vmem [shape: f32[1,32], index: 7, kind: input, shape index: {}]   ;;  %s10721_s8 = inlined_call_operand.vmem [shape: f32[1,32], index: 8, kind: input, shape index: {}]   ;;  %s10722_s9 = inlined_call_operand.vmem [shape: f32[32,32], index: 9, kind: input, shape index: {}]   ;;  %s10723_s10 = inlined_call_operand.vmem [shape: f32[1,32], index: 10, kind: input, shape index: {}]   ;;  %s10724_s11 = inlined_call_operand.vmem [shape: f32[1,32], index: 11, kind: input, shape index: {}]   ;;  %s10725_s12 = inlined_call_operand.<no memory space> [shape: f32[1,1], index: 12, kind: input, shape index: {}]   ;;  %s10726_s13 = inlined_call_operand.vmem [shape: f32[32,17], index: 13, kind: input, shape index: {}]   ;;  %s10727_s14 = inlined_call_operand.vmem [shape: f32[1,17], index: 14, kind: input, shape index: {}]   ;;  %s10728_s15 = inlined_call_operand.hbm [shape: f32[2,17], index: 15, kind: output, shape index: {}]  }
   0x1   :  { %v20_v0 = vstv %s10725_s12 }
   0x2   :  { %21 = vst [vmem:[#allocation5] sm:$0x1] %v20_v0 }
   0x3   :  { %v118_v1 = vld [vmem:[%s10715_s2 + $0x8] sm:$0x1]  ;;  %vm319_vm0 = vcmask 1040384   ;;  %v117_v2 = vld [vmem:[%s10715_s2] sm:$0xff]  ;;  %vm126_vm1 = vcmask 72704   ;;  %v55_v5 = vld [vmem:[%s10713_s0 + $0x10] sm:$0xff] }
   0x4   :  { %v53_v3 = vld [vmem:[%s10713_s0] sm:$0xff]  ;;  %6924 = vmatprep.subr.msk.mxu0 %vm319_vm0, %v118_v1  ;;  %v54_v4 = vld [vmem:[%s10713_s0 + $0x8] sm:$0xff]  ;;  %v56_v6 = vld [vmem:[%s10713_s0 + $0x18] sm:$0xff] }
   0x5   :  { %6928 = vmatprep.mubr.msk.f32.mxu0 %vm126_vm1, %v53_v3  ;;  %6925 = vmatpush3.msk.msra.mxu0 %vm319_vm0, %v118_v1  ;;  %v57_v7 = vld [vmem:[%s10713_s0 + $0x20] sm:$0xff]  ;;  %v58_v8 = vld [vmem:[%s10713_s0 + $0x28] sm:$0xff]  ;;  %v59_v9 = vld [vmem:[%s10713_s0 + $0x30] sm:$0xff] }
   0x6   :  { %6926 = vmatprep.subr.mxu0 %v117_v2  ;;  %v60_v10 = vld [vmem:[%s10713_s0 + $0x38] sm:$0xff]  ;;  %v61_v11 = vld [vmem:[%s10713_s0 + $0x40] sm:$0xff]  ;;  %v62_v12 = vld [vmem:[%s10713_s0 + $0x48] sm:$0xff] }
   0x7   :  { %6927 = vmatpush3.msra.mxu0 %v117_v2  ;;  %v63_v13 = vld [vmem:[%s10713_s0 + $0x50] sm:$0xff]  ;;  %v64_v14 = vld [vmem:[%s10713_s0 + $0x58] sm:$0xff] }
   0x8   :  { %6929 = vmatmul.mubr.msk.f32.vlgmr.msra.gmra.mxu0 %vm126_vm1, %v54_v4 }
   0x9   :  { %6931 = vmatprep.mubr.msk.f32.mxu0 %vm126_vm1, %v55_v5 }
   0xc   :  { %6932 = vmatmul.mubr.msk.f32.gmra.mxu0 %vm126_vm1, %v56_v6 }
   0xd   :  { %6934 = vmatprep.mubr.msk.f32.mxu0 %vm126_vm1, %v57_v7 }
  0x10   :  { %6935 = vmatmul.mubr.msk.f32.gmra.mxu0 %vm126_vm1, %v58_v8 }
  0x11   :  { %6937 = vmatprep.mubr.msk.f32.mxu0 %vm126_vm1, %v59_v9 }
  0x14   :  { %6938 = vmatmul.mubr.msk.f32.gmra.mxu0 %vm126_vm1, %v60_v10 }
  0x15   :  { %6940 = vmatprep.mubr.msk.f32.mxu0 %vm126_vm1, %v61_v11 }
  0x18   :  { %6941 = vmatmul.mubr.msk.f32.gmra.mxu0 %vm126_vm1, %v62_v12 }
  0x19   :  { %6943 = vmatprep.mubr.msk.f32.mxu0 %vm126_vm1, %v63_v13 }
  0x1a   :  { %22 = vsyncpa [#allocation7], 0  ;;  %v65_v15 = vld [vmem:[%s10713_s0 + $0x60] sm:$0xff]  ;;  %v66_v16 = vld [vmem:[%s10713_s0 + $0x68] sm:$0xff]  ;;  %vm772_vm2 = vcmask 261120   ;;  %vm1013_vm3 = vcmask 254976  }
  0x1b   :  { %v67_v17 = vld [vmem:[%s10713_s0 + $0x70] sm:$0xff]  ;;  %v68_v18 = vld [vmem:[%s10713_s0 + $0x78] sm:$0xff]  ;;  %v69_v19 = vld [vmem:[%s10713_s0 + $0x80] sm:$0xff]  ;;  %v10729_v51 = vmov 0.0   ;;  %vm7987_vm4 = vmmov 0   ;;  %vm3147_vm5 = vcmask 523264  }
  0x1c   :  { %6944 = vmatmul.mubr.msk.f32.gmra.mxu0 %vm126_vm1, %v64_v14  ;;  %v70_v20 = vld [vmem:[%s10713_s0 + $0x88] sm:$0xff]  ;;  %v71_v21 = vld [vmem:[%s10713_s0 + $0x90] sm:$0xff]  ;;  %v72_v22 = vld [vmem:[%s10713_s0 + $0x98] sm:$0xff]  ;;  %1012 = vst.msk [vmem:[#allocation3] sm:$0xff] %vm772_vm2, %v10729_v51  ;;  %vm5962_vm6 = vcmask 132096  }
  0x1d   :  { %6946 = vmatprep.mubr.msk.f32.mxu0 %vm126_vm1, %v65_v15  ;;  %v73_v23 = vld [vmem:[%s10713_s0 + $0xa0] sm:$0xff]  ;;  %v74_v24 = vld [vmem:[%s10713_s0 + $0xa8] sm:$0xff]  ;;  %v75_v25 = vld [vmem:[%s10713_s0 + $0xb0] sm:$0xff]  ;;  %1014 = vst.msk [vmem:[#allocation3 + $0x8] sm:$0x3] %vm1013_vm3, %v10729_v51 }
  0x1e   :  { %v76_v26 = vld [vmem:[%s10713_s0 + $0xb8] sm:$0xff]  ;;  %v77_v27 = vld [vmem:[%s10713_s0 + $0xc0] sm:$0xff]  ;;  %v78_v28 = vld [vmem:[%s10713_s0 + $0xc8] sm:$0xff]  ;;  %1015 = vst.msk [vmem:[#allocation3 + $0x10] sm:$0xff] %vm772_vm2, %v10729_v51 }
  0x1f   :  { %v79_v29 = vld [vmem:[%s10713_s0 + $0xd0] sm:$0xff]  ;;  %v80_v30 = vld [vmem:[%s10713_s0 + $0xd8] sm:$0xff]  ;;  %v81_v31 = vld [vmem:[%s10713_s0 + $0xe0] sm:$0xff]  ;;  %1016 = vst.msk [vmem:[#allocation3 + $0x18] sm:$0x3] %vm1013_vm3, %v10729_v51 }
  0x20   :  { %6947 = vmatmul.mubr.msk.f32.gmra.mxu0 %vm126_vm1, %v66_v16  ;;  %v82_v32 = vld [vmem:[%s10713_s0 + $0xe8] sm:$0xff]  ;;  %v83_v33 = vld [vmem:[%s10713_s0 + $0xf0] sm:$0xff]  ;;  %v84_v34 = vld [vmem:[%s10713_s0 + $0xf8] sm:$0xff]  ;;  %1017 = vst.msk [vmem:[#allocation3 + $0x20] sm:$0xff] %vm772_vm2, %v10729_v51 }
  0x21   :  { %6949 = vmatprep.mubr.msk.f32.mxu0 %vm126_vm1, %v67_v17  ;;  %v85_v35 = vld [vmem:[%s10713_s0 + $0x100] sm:$0xff]  ;;  %v86_v36 = vld [vmem:[%s10713_s0 + $0x108] sm:$0xff]  ;;  %v87_v37 = vld [vmem:[%s10713_s0 + $0x110] sm:$0xff]  ;;  %1018 = vst.msk [vmem:[#allocation3 + $0x28] sm:$0x3] %vm1013_vm3, %v10729_v51 }
  0x22   :  { %v88_v38 = vld [vmem:[%s10713_s0 + $0x118] sm:$0xff]  ;;  %v89_v39 = vld [vmem:[%s10713_s0 + $0x120] sm:$0xff]  ;;  %v90_v40 = vld [vmem:[%s10713_s0 + $0x128] sm:$0xff]  ;;  %1019 = vst.msk [vmem:[#allocation3 + $0x30] sm:$0xff] %vm772_vm2, %v10729_v51 }
  0x23   :  { %v91_v41 = vld [vmem:[%s10713_s0 + $0x130] sm:$0xff]  ;;  %v92_v42 = vld [vmem:[%s10713_s0 + $0x138] sm:$0xff]  ;;  %v93_v43 = vld [vmem:[%s10713_s0 + $0x140] sm:$0xff]  ;;  %1020 = vst.msk [vmem:[#allocation3 + $0x38] sm:$0x3] %vm1013_vm3, %v10729_v51 }
  0x24   :  { %6950 = vmatmul.mubr.msk.f32.gmra.mxu0 %vm126_vm1, %v68_v18  ;;  %v94_v44 = vld [vmem:[%s10713_s0 + $0x148] sm:$0xff]  ;;  %v95_v45 = vld [vmem:[%s10713_s0 + $0x150] sm:$0xff]  ;;  %v96_v46 = vld [vmem:[%s10713_s0 + $0x158] sm:$0xff]  ;;  %1021 = vst.msk [vmem:[#allocation3 + $0x40] sm:$0xff] %vm772_vm2, %v10729_v51 }
  0x25   :  { %6952 = vmatprep.mubr.msk.f32.mxu0 %vm126_vm1, %v69_v19  ;;  %v97_v47 = vld [vmem:[%s10713_s0 + $0x160] sm:$0xff]  ;;  %v98_v48 = vld [vmem:[%s10713_s0 + $0x168] sm:$0xff]  ;;  %v99_v49 = vld [vmem:[%s10713_s0 + $0x170] sm:$0xff]  ;;  %1022 = vst.msk [vmem:[#allocation3 + $0x48] sm:$0x3] %vm1013_vm3, %v10729_v51 }
  0x26   :  { %v6047_v50 = vld [vmem:[%s10717_s4 + $0x38] sm:$0xff]  ;;  %1023 = vst.msk [vmem:[#allocation3 + $0x50] sm:$0xff] %vm772_vm2, %v10729_v51  ;;  %1025 = vst.msk [vmem:[#allocation3 + $0x60] sm:$0xff] %vm772_vm2, %v10729_v51  ;;  %v6046_v52 = vld [vmem:[%s10717_s4 + $0x30] sm:$0xff] }
  0x27   :  { %1024 = vst.msk [vmem:[#allocation3 + $0x58] sm:$0x3] %vm1013_vm3, %v10729_v51  ;;  %1026 = vst.msk [vmem:[#allocation3 + $0x68] sm:$0x3] %vm1013_vm3, %v10729_v51  ;;  %7024 = vmatprep.subr.mxu1 %v6047_v50  ;;  %v100_v53 = vld [vmem:[%s10713_s0 + $0x178] sm:$0xff]  ;;  %v101_v54 = vld [vmem:[%s10713_s0 + $0x180] sm:$0xff] }
  0x28   :  { %6953 = vmatmul.mubr.msk.f32.gmra.mxu0 %vm126_vm1, %v70_v20  ;;  %1027 = vst.msk [vmem:[#allocation3 + $0x70] sm:$0xff] %vm772_vm2, %v10729_v51  ;;  %1029 = vst.msk [vmem:[#allocation3 + $0x80] sm:$0xff] %vm772_vm2, %v10729_v51  ;;  %7025 = vmatpush3.msra.mxu1 %v6047_v50  ;;  %v6045_v55 = vld [vmem:[%s10717_s4 + $0x28] sm:$0xff]  ;;  %v6044_v56 = vld [vmem:[%s10717_s4 + $0x20] sm:$0xff] }
  0x29   :  { %6955 = vmatprep.mubr.msk.f32.mxu0 %vm126_vm1, %v71_v21  ;;  %1028 = vst.msk [vmem:[#allocation3 + $0x78] sm:$0x3] %vm1013_vm3, %v10729_v51  ;;  %1030 = vst.msk [vmem:[#allocation3 + $0x88] sm:$0x3] %vm1013_vm3, %v10729_v51  ;;  %7026 = vmatprep.subr.mxu1 %v6046_v52  ;;  %v102_v57 = vld [vmem:[%s10713_s0 + $0x188] sm:$0xff]  ;;  %v103_v59 = vld [vmem:[%s10713_s0 + $0x190] sm:$0xff] }
  0x2a   :  { %1031 = vst.msk [vmem:[#allocation3 + $0x90] sm:$0xff] %vm772_vm2, %v10729_v51  ;;  %1033 = vst.msk [vmem:[#allocation3 + $0xa0] sm:$0xff] %vm772_vm2, %v10729_v51  ;;  %7027 = vmatpush3.msra.mxu1 %v6046_v52  ;;  %v1090_v58 = vld [vmem:[#allocation3 + $0x1] sm:$0xff]  ;;  %v6123_v60 = vld [vmem:[%s10717_s4 + $0x98] sm:$0xff] }
  0x2b   :  { %1032 = vst.msk [vmem:[#allocation3 + $0x98] sm:$0x3] %vm1013_vm3, %v10729_v51  ;;  %1034 = vst.msk [vmem:[#allocation3 + $0xa8] sm:$0x3] %vm1013_vm3, %v10729_v51  ;;  %7028 = vmatprep.subr.mxu1 %v6045_v55  ;;  %7032 = vmatprep.mubr.msk.f32.mxu1 %vm772_vm2, %v1090_v58  ;;  %v6122_v61 = vld [vmem:[%s10717_s4 + $0x90] sm:$0xff]  ;;  %v104_v62 = vld [vmem:[%s10713_s0 + $0x198] sm:$0xff] }
  0x2c   :  { %6956 = vmatmul.mubr.msk.f32.gmra.mxu0 %vm126_vm1, %v72_v22  ;;  %1035 = vst.msk [vmem:[#allocation3 + $0xb0] sm:$0xff] %vm772_vm2, %v10729_v51  ;;  %1037 = vst.msk [vmem:[#allocation3 + $0xc0] sm:$0xff] %vm772_vm2, %v10729_v51  ;;  %7029 = vmatpush3.msra.mxu1 %v6045_v55  ;;  %v105_v63 = vld [vmem:[%s10713_s0 + $0x1a0] sm:$0xff]  ;;  %v6121_v0 = vld [vmem:[%s10717_s4 + $0x88] sm:$0xff] }
  0x2d   :  { %6958 = vmatprep.mubr.msk.f32.mxu0 %vm126_vm1, %v73_v23  ;;  %1036 = vst.msk [vmem:[#allocation3 + $0xb8] sm:$0x3] %vm1013_vm3, %v10729_v51  ;;  %1038 = vst.msk [vmem:[#allocation3 + $0xc8] sm:$0x3] %vm1013_vm3, %v10729_v51  ;;  %7030 = vmatprep.subr.mxu1 %v6044_v56  ;;  %v6120_v1 = vld [vmem:[%s10717_s4 + $0x80] sm:$0xff]  ;;  %v106_v2 = vld [vmem:[%s10713_s0 + $0x1a8] sm:$0xff] }
  0x2e   :  { %1039 = vst.msk [vmem:[#allocation3 + $0xd0] sm:$0xff] %vm772_vm2, %v10729_v51  ;;  %1041 = vst.msk [vmem:[#allocation3 + $0xe0] sm:$0xff] %vm772_vm2, %v10729_v51  ;;  %7031 = vmatpush3.msra.mxu1 %v6044_v56  ;;  %7152 = vmatprep.subr.mxu0 %v6123_v60  ;;  %v107_v3 = vld [vmem:[%s10713_s0 + $0x1b0] sm:$0xff]  ;;  %v108_v4 = vld [vmem:[%s10713_s0 + $0x1b8] sm:$0xff] }
  0x2f   :  { %1040 = vst.msk [vmem:[#allocation3 + $0xd8] sm:$0x3] %vm1013_vm3, %v10729_v51  ;;  %1042 = vst.msk [vmem:[#allocation3 + $0xe8] sm:$0x3] %vm1013_vm3, %v10729_v51  ;;  %7153 = vmatpush3.msra.mxu0 %v6123_v60  ;;  %v109_v5 = vld [vmem:[%s10713_s0 + $0x1c0] sm:$0xff]  ;;  %v110_v6 = vld [vmem:[%s10713_s0 + $0x1c8] sm:$0xff] }
  0x30   :  { %6959 = vmatmul.mubr.msk.f32.gmra.mxu0 %vm126_vm1, %v74_v24  ;;  %1043 = vst.msk [vmem:[#allocation3 + $0xf0] sm:$0xff] %vm772_vm2, %v10729_v51  ;;  %1045 = vst.msk [vmem:[#allocation3 + $0x100] sm:$0xff] %vm772_vm2, %v10729_v51  ;;  %7154 = vmatprep.subr.mxu0 %v6122_v61  ;;  %v111_v7 = vld [vmem:[%s10713_s0 + $0x1d0] sm:$0xff]  ;;  %v112_v8 = vld [vmem:[%s10713_s0 + $0x1d8] sm:$0xff] }
  0x31   :  { %6961 = vmatprep.mubr.msk.f32.mxu0 %vm126_vm1, %v75_v25  ;;  %1044 = vst.msk [vmem:[#allocation3 + $0xf8] sm:$0x3] %vm1013_vm3, %v10729_v51  ;;  %1046 = vst.msk [vmem:[#allocation3 + $0x108] sm:$0x3] %vm1013_vm3, %v10729_v51  ;;  %7155 = vmatpush3.msra.mxu0 %v6122_v61  ;;  %v113_v9 = vld [vmem:[%s10713_s0 + $0x1e0] sm:$0xff]  ;;  %v114_v10 = vld [vmem:[%s10713_s0 + $0x1e8] sm:$0xff] }
  0x32   :  { %1047 = vst.msk [vmem:[#allocation3 + $0x110] sm:$0xff] %vm772_vm2, %v10729_v51  ;;  %1049 = vst.msk [vmem:[#allocation3 + $0x120] sm:$0xff] %vm772_vm2, %v10729_v51  ;;  %7156 = vmatprep.subr.mxu0 %v6121_v0  ;;  %v115_v11 = vld [vmem:[%s10713_s0 + $0x1f0] sm:$0xff]  ;;  %v116_v12 = vld [vmem:[%s10713_s0 + $0x1f8] sm:$0xff] }
  0x33   :  { %1048 = vst.msk [vmem:[#allocation3 + $0x118] sm:$0x3] %vm1013_vm3, %v10729_v51  ;;  %1050 = vst.msk [vmem:[#allocation3 + $0x128] sm:$0x3] %vm1013_vm3, %v10729_v51  ;;  %7157 = vmatpush3.msra.mxu0 %v6121_v0  ;;  %v8445_v13 = vld [vmem:[%s10716_s3] ss:$0 sm:$0xff] }
  0x34   :  { %6962 = vmatmul.mubr.msk.f32.gmra.mxu0 %vm126_vm1, %v76_v26  ;;  %1051 = vst.msk [vmem:[#allocation3 + $0x130] sm:$0xff] %vm772_vm2, %v10729_v51  ;;  %7158 = vmatprep.subr.mxu0 %v6120_v1  ;;  %v8450_v14 = vld [vmem:[%s10717_s4 + $0x18] sm:$0xff] }
  0x35   :  { %6964 = vmatprep.mubr.msk.f32.mxu0 %vm126_vm1, %v77_v27  ;;  %1052 = vst.msk [vmem:[#allocation3 + $0x138] sm:$0x3] %vm1013_vm3, %v10729_v51  ;;  %7159 = vmatpush3.msra.mxu0 %v6120_v1  ;;  %v8474_v50 = vld [vmem:[%s10717_s4 + $0xd8] sm:$0xff] }
  0x36   :  { %7056 = vmatprep.subr.mxu1 %v8450_v14  ;;  %7216 = vmatprep.subr.mxu0 %v8474_v50 }
  0x38   :  { %6965 = vmatmul.mubr.msk.f32.gmra.mxu0 %vm126_vm1, %v78_v28 }
  0x39   :  { %6967 = vmatprep.mubr.msk.f32.mxu0 %vm126_vm1, %v79_v29 }
  0x3c   :  { %6968 = vmatmul.mubr.msk.f32.gmra.mxu0 %vm126_vm1, %v80_v30 }
  0x3d   :  { %6970 = vmatprep.mubr.msk.f32.mxu0 %vm126_vm1, %v81_v31 }
  0x40   :  { %6971 = vmatmul.mubr.msk.f32.gmra.mxu0 %vm126_vm1, %v82_v32 }
  0x41   :  { %6973 = vmatprep.mubr.msk.f32.mxu0 %vm126_vm1, %v83_v33 }
  0x44   :  { %6974 = vmatmul.mubr.msk.f32.gmra.mxu0 %vm126_vm1, %v84_v34 }
  0x45   :  { %6976 = vmatprep.mubr.msk.f32.mxu0 %vm126_vm1, %v85_v35 }
  0x48   :  { %6977 = vmatmul.mubr.msk.f32.gmra.mxu0 %vm126_vm1, %v86_v36 }
  0x49   :  { %6979 = vmatprep.mubr.msk.f32.mxu0 %vm126_vm1, %v87_v37 }
  0x4c   :  { %6980 = vmatmul.mubr.msk.f32.gmra.mxu0 %vm126_vm1, %v88_v38 }
  0x4d   :  { %6982 = vmatprep.mubr.msk.f32.mxu0 %vm126_vm1, %v89_v39 }
  0x50   :  { %6983 = vmatmul.mubr.msk.f32.gmra.mxu0 %vm126_vm1, %v90_v40 }
  0x51   :  { %6985 = vmatprep.mubr.msk.f32.mxu0 %vm126_vm1, %v91_v41 }
  0x54   :  { %6986 = vmatmul.mubr.msk.f32.gmra.mxu0 %vm126_vm1, %v92_v42 }
  0x55   :  { %6988 = vmatprep.mubr.msk.f32.mxu0 %vm126_vm1, %v93_v43 }
  0x58   :  { %6989 = vmatmul.mubr.msk.f32.gmra.mxu0 %vm126_vm1, %v94_v44 }
  0x59   :  { %6991 = vmatprep.mubr.msk.f32.mxu0 %vm126_vm1, %v95_v45 }
  0x5c   :  { %6992 = vmatmul.mubr.msk.f32.gmra.mxu0 %vm126_vm1, %v96_v46 }
  0x5d   :  { %6994 = vmatprep.mubr.msk.f32.mxu0 %vm126_vm1, %v97_v47 }
  0x60   :  { %6995 = vmatmul.mubr.msk.f32.gmra.mxu0 %vm126_vm1, %v98_v48 }
  0x61   :  { %6997 = vmatprep.mubr.msk.f32.mxu0 %vm126_vm1, %v99_v49 }
  0x64   :  { %6998 = vmatmul.mubr.msk.f32.gmra.mxu0 %vm126_vm1, %v100_v53 }
  0x65   :  { %7000 = vmatprep.mubr.msk.f32.mxu0 %vm126_vm1, %v101_v54 }
  0x68   :  { %7001 = vmatmul.mubr.msk.f32.gmra.mxu0 %vm126_vm1, %v102_v57 }
  0x69   :  { %7003 = vmatprep.mubr.msk.f32.mxu0 %vm126_vm1, %v103_v59 }
  0x6c   :  { %7004 = vmatmul.mubr.msk.f32.gmra.mxu0 %vm126_vm1, %v104_v62 }
  0x6d   :  { %7006 = vmatprep.mubr.msk.f32.mxu0 %vm126_vm1, %v105_v63 }
  0x70   :  { %7007 = vmatmul.mubr.msk.f32.gmra.mxu0 %vm126_vm1, %v106_v2 }
  0x71   :  { %7009 = vmatprep.mubr.msk.f32.mxu0 %vm126_vm1, %v107_v3 }
  0x74   :  { %7010 = vmatmul.mubr.msk.f32.gmra.mxu0 %vm126_vm1, %v108_v4 }
  0x75   :  { %7012 = vmatprep.mubr.msk.f32.mxu0 %vm126_vm1, %v109_v5 }
  0x78   :  { %7013 = vmatmul.mubr.msk.f32.gmra.mxu0 %vm126_vm1, %v110_v6 }
  0x79   :  { %7015 = vmatprep.mubr.msk.f32.mxu0 %vm126_vm1, %v111_v7 }
  0x7c   :  { %7016 = vmatmul.mubr.msk.f32.gmra.mxu0 %vm126_vm1, %v112_v8 }
  0x7d   :  { %7018 = vmatprep.mubr.msk.f32.mxu0 %vm126_vm1, %v113_v9 }
  0x80   :  { %7019 = vmatmul.mubr.msk.f32.gmra.mxu0 %vm126_vm1, %v114_v10 }
  0x81   :  { %7021 = vmatprep.mubr.msk.f32.mxu0 %vm126_vm1, %v115_v11 }
  0x84   :  { %7022 = vmatmul.mubr.msk.f32.gmra.mxu0 %vm126_vm1, %v116_v12 }
  0xc8   :  { %v6930_v15 = vpop.f32.mrf.mxu0 }
  0xc9   :  { %v395_v16 = vadd.f32 %v6930_v15, %v8445_v13  ;;  %v1088_v15 = vld [vmem:[%s10717_s4 + $0x10] sm:$0xff] }
  0xca   :  { %v389_v17 = vpop.f32.mrf.mxu0 }
  0xcb   :  { %v709_v18 = vmax.f32 %v395_v16, 0.0  ;;  %v390_v19 = vadd.f32 %v8445_v13, %v389_v17 }
  0xcc   :  { %v6933_v20 = vpop.f32.mrf.mxu0 }
  0xcd   :  { %774 = vst.msk [vmem:[#allocation2 + $0x8] sm:$0xff] %vm772_vm2, %v709_v18  ;;  %v708_v21 = vmax.f32 %v390_v19, 0.0  ;;  %v405_v22 = vadd.f32 %v6933_v20, %v8445_v13 }
  0xce   :  { %v399_v23 = vpop.f32.mrf.mxu0 }
  0xcf   :  { %773 = vst.msk [vmem:[#allocation2] sm:$0xff] %vm772_vm2, %v708_v21  ;;  %v711_v24 = vmax.f32 %v405_v22, 0.0  ;;  %v400_v25 = vadd.f32 %v8445_v13, %v399_v23  ;;  %v1087_v21 = vld [vmem:[%s10717_s4 + $0x8] sm:$0xff] }
  0xd0   :  { %v6936_v26 = vpop.f32.mrf.mxu0 }
  0xd1   :  { %776 = vst.msk [vmem:[#allocation2 + $0x18] sm:$0xff] %vm772_vm2, %v711_v24  ;;  %v710_v27 = vmax.f32 %v400_v25, 0.0  ;;  %v415_v28 = vadd.f32 %v6936_v26, %v8445_v13 }
  0xd2   :  { %v409_v29 = vpop.f32.mrf.mxu0 }
  0xd3   :  { %775 = vst.msk [vmem:[#allocation2 + $0x10] sm:$0xff] %vm772_vm2, %v710_v27  ;;  %v713_v30 = vmax.f32 %v415_v28, 0.0  ;;  %v410_v31 = vadd.f32 %v8445_v13, %v409_v29  ;;  %v1086_v27 = vld [vmem:[%s10717_s4] sm:$0xff] }
  0xd4   :  { %v6939_v32 = vpop.f32.mrf.mxu0 }
  0xd5   :  { %778 = vst.msk [vmem:[#allocation2 + $0x28] sm:$0xff] %vm772_vm2, %v713_v30  ;;  %v712_v33 = vmax.f32 %v410_v31, 0.0  ;;  %v425_v34 = vadd.f32 %v6939_v32, %v8445_v13 }
  0xd6   :  { %v419_v35 = vpop.f32.mrf.mxu0  ;;  %v837_v38 = vld [vmem:[#allocation2] ss:$2 sm:$0xff]  ;;  %v901_v39 = vld [vmem:[#allocation2 + $0x1] ss:$2 sm:$0xff] }
  0xd7   :  { %777 = vst.msk [vmem:[#allocation2 + $0x20] sm:$0xff] %vm772_vm2, %v712_v33  ;;  %v715_v36 = vmax.f32 %v425_v34, 0.0  ;;  %v420_v37 = vadd.f32 %v8445_v13, %v419_v35  ;;  %v964_v46 = vmax.f32 %v837_v38, %v901_v39  ;;  %v8512_v35 = vld [vmem:[%s10717_s4 + $0x58] sm:$0xff]  ;;  %v6162_v38 = vld [vmem:[%s10717_s4 + $0xd0] sm:$0xff] }
  0xd8   :  { %v6942_v40 = vpop.f32.mrf.mxu0 }
  0xd9   :  { %780 = vst.msk [vmem:[#allocation2 + $0x38] sm:$0xff] %vm772_vm2, %v715_v36  ;;  %v714_v41 = vmax.f32 %v420_v37, 0.0  ;;  %v435_v42 = vadd.f32 %v6942_v40, %v8445_v13 }
  0xda   :  { %v839_v43 = vld [vmem:[#allocation2 + $0x10] ss:$2 sm:$0xff]  ;;  %v903_v44 = vld [vmem:[#allocation2 + $0x11] ss:$2 sm:$0xff]  ;;  %v429_v45 = vpop.f32.mrf.mxu0 }
  0xdb   :  { %v965_v47 = vmax.f32 %v839_v43, %v903_v44  ;;  %779 = vst.msk [vmem:[#allocation2 + $0x30] sm:$0xff] %vm772_vm2, %v714_v41  ;;  %v717_v48 = vmax.f32 %v435_v42, 0.0  ;;  %v430_v49 = vadd.f32 %v8445_v13, %v429_v45  ;;  %v6161_v44 = vld [vmem:[%s10717_s4 + $0xc8] sm:$0xff] }
  0xdc   :  { %v6945_v52 = vpop.f32.mrf.mxu0 }
  0xdd   :  { %v996_v53 = vmax.f32 %v964_v46, %v965_v47  ;;  %782 = vst.msk [vmem:[#allocation2 + $0x48] sm:$0xff] %vm772_vm2, %v717_v48  ;;  %v716_v54 = vmax.f32 %v430_v49, 0.0  ;;  %v445_v55 = vadd.f32 %v6945_v52, %v8445_v13  ;;  %v6160_v52 = vld [vmem:[%s10717_s4 + $0xc0] sm:$0xff] }
  0xde   :  { %v439_v56 = vpop.f32.mrf.mxu0  ;;  %v841_v59 = vld [vmem:[#allocation2 + $0x20] ss:$2 sm:$0xff]  ;;  %v905_v60 = vld [vmem:[#allocation2 + $0x21] ss:$2 sm:$0xff] }
  0xdf   :  { %781 = vst.msk [vmem:[#allocation2 + $0x40] sm:$0xff] %vm772_vm2, %v716_v54  ;;  %v719_v57 = vmax.f32 %v445_v55, 0.0  ;;  %v440_v58 = vadd.f32 %v8445_v13, %v439_v56  ;;  %1054 = vst.msk [vmem:[#allocation3 + $0x11] sm:$0xff] %vm772_vm2, %v996_v53  ;;  %v966_v3 = vmax.f32 %v841_v59, %v905_v60 }
  0xe0   :  { %v6948_v61 = vpop.f32.mrf.mxu0 }
  0xe1   :  { %784 = vst.msk [vmem:[#allocation2 + $0x58] sm:$0xff] %vm772_vm2, %v719_v57  ;;  %v718_v62 = vmax.f32 %v440_v58, 0.0  ;;  %v455_v63 = vadd.f32 %v6948_v61, %v8445_v13 }
  0xe2   :  { %v843_v0 = vld [vmem:[#allocation2 + $0x30] ss:$2 sm:$0xff]  ;;  %v907_v1 = vld [vmem:[#allocation2 + $0x31] ss:$2 sm:$0xff]  ;;  %v449_v2 = vpop.f32.mrf.mxu0 }
  0xe3   :  { %v967_v4 = vmax.f32 %v843_v0, %v907_v1  ;;  %783 = vst.msk [vmem:[#allocation2 + $0x50] sm:$0xff] %vm772_vm2, %v718_v62  ;;  %v721_v5 = vmax.f32 %v455_v63, 0.0  ;;  %v450_v6 = vadd.f32 %v8445_v13, %v449_v2 }
  0xe4   :  { %v6951_v7 = vpop.f32.mrf.mxu0 }
  0xe5   :  { %v997_v8 = vmax.f32 %v966_v3, %v967_v4  ;;  %786 = vst.msk [vmem:[#allocation2 + $0x68] sm:$0xff] %vm772_vm2, %v721_v5  ;;  %v720_v9 = vmax.f32 %v450_v6, 0.0  ;;  %v465_v10 = vadd.f32 %v6951_v7, %v8445_v13 }
  0xe6   :  { %v459_v11 = vpop.f32.mrf.mxu0  ;;  %v1091_v12 = vld [vmem:[#allocation3 + $0x11] sm:$0xff]  ;;  %v845_v18 = vld [vmem:[#allocation2 + $0x40] ss:$2 sm:$0xff]  ;;  %v909_v19 = vld [vmem:[#allocation2 + $0x41] ss:$2 sm:$0xff] }
  0xe7   :  { %785 = vst.msk [vmem:[#allocation2 + $0x60] sm:$0xff] %vm772_vm2, %v720_v9  ;;  %v723_v16 = vmax.f32 %v465_v10, 0.0  ;;  %v460_v17 = vadd.f32 %v8445_v13, %v459_v11  ;;  %7033 = vmatmul.mubr.msk.f32.vlgmr.msra.gmra.mxu1 %vm772_vm2, %v1091_v12  ;;  %1055 = vst.msk [vmem:[#allocation3 + $0x21] sm:$0xff] %vm772_vm2, %v997_v8  ;;  %7160 = vmatprep.mubr.msk.f32.mxu0 %vm772_vm2, %v1091_v12  ;;  %v968_v28 = vmax.f32 %v845_v18, %v909_v19  ;;  %v8548_v12 = vld [vmem:[%s10717_s4 + $0x118] sm:$0xff] }
  0xe8   :  { %v6954_v20 = vpop.f32.mrf.mxu0  ;;  %7057 = vmatpush3.msra.mxu1 %v8450_v14 }
  0xe9   :  { %788 = vst.msk [vmem:[#allocation2 + $0x78] sm:$0xff] %vm772_vm2, %v723_v16  ;;  %v722_v22 = vmax.f32 %v460_v17, 0.0  ;;  %v475_v23 = vadd.f32 %v6954_v20, %v8445_v13  ;;  %7058 = vmatprep.subr.mxu1 %v1088_v15 }
  0xea   :  { %v847_v24 = vld [vmem:[#allocation2 + $0x50] ss:$2 sm:$0xff]  ;;  %v911_v25 = vld [vmem:[#allocation2 + $0x51] ss:$2 sm:$0xff]  ;;  %v469_v26 = vpop.f32.mrf.mxu0  ;;  %7059 = vmatpush3.msra.mxu1 %v1088_v15 }
  0xeb   :  { %v969_v14 = vmax.f32 %v847_v24, %v911_v25  ;;  %787 = vst.msk [vmem:[#allocation2 + $0x70] sm:$0xff] %vm772_vm2, %v722_v22  ;;  %v725_v29 = vmax.f32 %v475_v23, 0.0  ;;  %v470_v30 = vadd.f32 %v8445_v13, %v469_v26  ;;  %7060 = vmatprep.subr.mxu1 %v1087_v21 }
  0xec   :  { %v6957_v31 = vpop.f32.mrf.mxu0  ;;  %7061 = vmatpush3.msra.mxu1 %v1087_v21 }
  0xed   :  { %v998_v32 = vmax.f32 %v968_v28, %v969_v14  ;;  %790 = vst.msk [vmem:[#allocation2 + $0x88] sm:$0xff] %vm772_vm2, %v725_v29  ;;  %v724_v33 = vmax.f32 %v470_v30, 0.0  ;;  %v485_v34 = vadd.f32 %v6957_v31, %v8445_v13  ;;  %7062 = vmatprep.subr.mxu1 %v1086_v27 }
  0xee   :  { %v479_v36 = vpop.f32.mrf.mxu0  ;;  %v1092_v37 = vld [vmem:[#allocation3 + $0x21] sm:$0xff]  ;;  %7063 = vmatpush3.msra.mxu1 %v1086_v27 }
  0xef   :  { %1056 = vst.msk [vmem:[#allocation3 + $0x31] sm:$0xff] %vm772_vm2, %v998_v32  ;;  %789 = vst.msk [vmem:[#allocation2 + $0x80] sm:$0xff] %vm772_vm2, %v724_v33  ;;  %v727_v39 = vmax.f32 %v485_v34, 0.0  ;;  %v480_v40 = vadd.f32 %v8445_v13, %v479_v36  ;;  %7035 = vmatprep.mubr.msk.f32.mxu1 %vm772_vm2, %v1092_v37  ;;  %7161 = vmatmul.mubr.msk.f32.vlgmr.msra.gmra.mxu0 %vm772_vm2, %v1092_v37  ;;  %v849_v41 = vld [vmem:[#allocation2 + $0x60] ss:$2 sm:$0xff] }
  0xf0   :  { %v913_v42 = vld [vmem:[#allocation2 + $0x61] ss:$2 sm:$0xff]  ;;  %v6960_v43 = vpop.f32.mrf.mxu0  ;;  %7088 = vmatprep.subr.mxu1 %v8512_v35  ;;  %7217 = vmatpush3.msra.mxu0 %v8474_v50 }
  0xf1   :  { %792 = vst.msk [vmem:[#allocation2 + $0x98] sm:$0xff] %vm772_vm2, %v727_v39  ;;  %v726_v45 = vmax.f32 %v480_v40, 0.0  ;;  %v495_v46 = vadd.f32 %v6960_v43, %v8445_v13  ;;  %7218 = vmatprep.subr.mxu0 %v6162_v38  ;;  %v970_v53 = vmax.f32 %v849_v41, %v913_v42 }
  0xf2   :  { %v851_v47 = vld [vmem:[#allocation2 + $0x70] ss:$2 sm:$0xff]  ;;  %v915_v48 = vld [vmem:[#allocation2 + $0x71] ss:$2 sm:$0xff]  ;;  %v489_v49 = vpop.f32.mrf.mxu0  ;;  %7219 = vmatpush3.msra.mxu0 %v6162_v38 }
  0xf3   :  { %v971_v50 = vmax.f32 %v851_v47, %v915_v48  ;;  %791 = vst.msk [vmem:[#allocation2 + $0x90] sm:$0xff] %vm772_vm2, %v726_v45  ;;  %v729_v54 = vmax.f32 %v495_v46, 0.0  ;;  %v490_v55 = vadd.f32 %v8445_v13, %v489_v49  ;;  %7220 = vmatprep.subr.mxu0 %v6161_v44 }
  0xf4   :  { %v6963_v56 = vpop.f32.mrf.mxu0  ;;  %7221 = vmatpush3.msra.mxu0 %v6161_v44 }
  0xf5   :  { %v999_v57 = vmax.f32 %v970_v53, %v971_v50  ;;  %794 = vst.msk [vmem:[#allocation2 + $0xa8] sm:$0xff] %vm772_vm2, %v729_v54  ;;  %v728_v58 = vmax.f32 %v490_v55, 0.0  ;;  %v505_v59 = vadd.f32 %v6963_v56, %v8445_v13  ;;  %7222 = vmatprep.subr.mxu0 %v6160_v52 }
  0xf6   :  { %v499_v60 = vpop.f32.mrf.mxu0  ;;  %v1093_v61 = vld [vmem:[#allocation3 + $0x31] sm:$0xff]  ;;  %7223 = vmatpush3.msra.mxu0 %v6160_v52  ;;  %v853_v0 = vld [vmem:[#allocation2 + $0x80] ss:$2 sm:$0xff]  ;;  %v917_v1 = vld [vmem:[#allocation2 + $0x81] ss:$2 sm:$0xff] }
  0xf7   :  { %1057 = vst.msk [vmem:[#allocation3 + $0x41] sm:$0xff] %vm772_vm2, %v999_v57  ;;  %793 = vst.msk [vmem:[#allocation2 + $0xa0] sm:$0xff] %vm772_vm2, %v728_v58  ;;  %v731_v62 = vmax.f32 %v505_v59, 0.0  ;;  %v500_v63 = vadd.f32 %v8445_v13, %v499_v60  ;;  %7036 = vmatmul.mubr.msk.f32.gmra.mxu1 %vm772_vm2, %v1093_v61  ;;  %7163 = vmatprep.mubr.msk.f32.mxu0 %vm772_vm2, %v1093_v61  ;;  %v972_v8 = vmax.f32 %v853_v0, %v917_v1 }
  0xf8   :  { %v6966_v2 = vpop.f32.mrf.mxu0  ;;  %7280 = vmatprep.subr.mxu0 %v8548_v12 }
  0xf9   :  { %796 = vst.msk [vmem:[#allocation2 + $0xb8] sm:$0xff] %vm772_vm2, %v731_v62  ;;  %v730_v3 = vmax.f32 %v500_v63, 0.0  ;;  %v515_v4 = vadd.f32 %v6966_v2, %v8445_v13 }
  0xfa   :  { %v855_v5 = vld [vmem:[#allocation2 + $0x90] ss:$2 sm:$0xff]  ;;  %v919_v6 = vld [vmem:[#allocation2 + $0x91] ss:$2 sm:$0xff]  ;;  %v509_v7 = vpop.f32.mrf.mxu0 }
  0xfb   :  { %v973_v9 = vmax.f32 %v855_v5, %v919_v6  ;;  %795 = vst.msk [vmem:[#allocation2 + $0xb0] sm:$0xff] %vm772_vm2, %v730_v3  ;;  %v733_v10 = vmax.f32 %v515_v4, 0.0  ;;  %v510_v11 = vadd.f32 %v8445_v13, %v509_v7 }
  0xfc   :  { %v6969_v15 = vpop.f32.mrf.mxu0 }
  0xfd   :  { %v1000_v16 = vmax.f32 %v972_v8, %v973_v9  ;;  %798 = vst.msk [vmem:[#allocation2 + $0xc8] sm:$0xff] %vm772_vm2, %v733_v10  ;;  %v732_v17 = vmax.f32 %v510_v11, 0.0  ;;  %v525_v18 = vadd.f32 %v6969_v15, %v8445_v13 }
  0xfe   :  { %v519_v19 = vpop.f32.mrf.mxu0  ;;  %v1094_v20 = vld [vmem:[#allocation3 + $0x41] sm:$0xff] }
  0xff   :  { %1058 = vst.msk [vmem:[#allocation3 + $0x51] sm:$0xff] %vm772_vm2, %v1000_v16  ;;  %797 = vst.msk [vmem:[#allocation2 + $0xc0] sm:$0xff] %vm772_vm2, %v732_v17  ;;  %v735_v21 = vmax.f32 %v525_v18, 0.0  ;;  %v520_v22 = vadd.f32 %v8445_v13, %v519_v19  ;;  %7038 = vmatprep.mubr.msk.f32.mxu1 %vm772_vm2, %v1094_v20  ;;  %7164 = vmatmul.mubr.msk.f32.gmra.mxu0 %vm772_vm2, %v1094_v20  ;;  %v857_v23 = vld [vmem:[#allocation2 + $0xa0] ss:$2 sm:$0xff] }
 0x100   :  { %v921_v24 = vld [vmem:[#allocation2 + $0xa1] ss:$2 sm:$0xff]  ;;  %v6972_v25 = vpop.f32.mrf.mxu0 }
 0x101   :  { %800 = vst.msk [vmem:[#allocation2 + $0xd8] sm:$0xff] %vm772_vm2, %v735_v21  ;;  %v734_v26 = vmax.f32 %v520_v22, 0.0  ;;  %v535_v27 = vadd.f32 %v6972_v25, %v8445_v13  ;;  %v974_v30 = vmax.f32 %v857_v23, %v921_v24  ;;  %v1098_v19 = vld [vmem:[#allocation3 + $0xa1] sm:$0xff] }
 0x102   :  { %v859_v28 = vld [vmem:[#allocation2 + $0xb0] ss:$2 sm:$0xff]  ;;  %v923_v14 = vld [vmem:[#allocation2 + $0xb1] ss:$2 sm:$0xff]  ;;  %v529_v29 = vpop.f32.mrf.mxu0 }
 0x103   :  { %v975_v31 = vmax.f32 %v859_v28, %v923_v14  ;;  %799 = vst.msk [vmem:[#allocation2 + $0xd0] sm:$0xff] %vm772_vm2, %v734_v26  ;;  %v737_v32 = vmax.f32 %v535_v27, 0.0  ;;  %v530_v33 = vadd.f32 %v8445_v13, %v529_v29 }
 0x104   :  { %v6975_v34 = vpop.f32.mrf.mxu0 }
 0x105   :  { %v1001_v36 = vmax.f32 %v974_v30, %v975_v31  ;;  %802 = vst.msk [vmem:[#allocation2 + $0xe8] sm:$0xff] %vm772_vm2, %v737_v32  ;;  %v736_v37 = vmax.f32 %v530_v33, 0.0  ;;  %v545_v38 = vadd.f32 %v6975_v34, %v8445_v13 }
 0x106   :  { %v539_v39 = vpop.f32.mrf.mxu0  ;;  %v1095_v40 = vld [vmem:[#allocation3 + $0x51] sm:$0xff]  ;;  %v861_v43 = vld [vmem:[#allocation2 + $0xc0] ss:$2 sm:$0xff]  ;;  %v925_v44 = vld [vmem:[#allocation2 + $0xc1] ss:$2 sm:$0xff] }
 0x107   :  { %1059 = vst.msk [vmem:[#allocation3 + $0x61] sm:$0xff] %vm772_vm2, %v1001_v36  ;;  %801 = vst.msk [vmem:[#allocation2 + $0xe0] sm:$0xff] %vm772_vm2, %v736_v37  ;;  %v739_v41 = vmax.f32 %v545_v38, 0.0  ;;  %v540_v42 = vadd.f32 %v8445_v13, %v539_v39  ;;  %7039 = vmatmul.mubr.msk.f32.gmra.mxu1 %vm772_vm2, %v1095_v40  ;;  %7166 = vmatprep.mubr.msk.f32.mxu0 %vm772_vm2, %v1095_v40  ;;  %v976_v53 = vmax.f32 %v861_v43, %v925_v44 }
 0x108   :  { %v6978_v45 = vpop.f32.mrf.mxu0 }
 0x109   :  { %804 = vst.msk [vmem:[#allocation2 + $0xf8] sm:$0xff] %vm772_vm2, %v739_v41  ;;  %v738_v46 = vmax.f32 %v540_v42, 0.0  ;;  %v555_v47 = vadd.f32 %v6978_v45, %v8445_v13 }
 0x10a   :  { %v863_v48 = vld [vmem:[#allocation2 + $0xd0] ss:$2 sm:$0xff]  ;;  %v927_v49 = vld [vmem:[#allocation2 + $0xd1] ss:$2 sm:$0xff]  ;;  %v549_v52 = vpop.f32.mrf.mxu0 }
 0x10b   :  { %v977_v50 = vmax.f32 %v863_v48, %v927_v49  ;;  %803 = vst.msk [vmem:[#allocation2 + $0xf0] sm:$0xff] %vm772_vm2, %v738_v46  ;;  %v741_v54 = vmax.f32 %v555_v47, 0.0  ;;  %v550_v55 = vadd.f32 %v8445_v13, %v549_v52 }
 0x10c   :  { %v6981_v56 = vpop.f32.mrf.mxu0 }
 0x10d   :  { %v1002_v57 = vmax.f32 %v976_v53, %v977_v50  ;;  %806 = vst.msk [vmem:[#allocation2 + $0x108] sm:$0xff] %vm772_vm2, %v741_v54  ;;  %v740_v58 = vmax.f32 %v550_v55, 0.0  ;;  %v565_v59 = vadd.f32 %v6981_v56, %v8445_v13 }
 0x10e   :  { %v559_v60 = vpop.f32.mrf.mxu0  ;;  %v8575_v61 = vld [vmem:[#allocation3 + $0x61] sm:$0xff] }
 0x10f   :  { %1060 = vst.msk [vmem:[#allocation3 + $0x71] sm:$0xff] %vm772_vm2, %v1002_v57  ;;  %805 = vst.msk [vmem:[#allocation2 + $0x100] sm:$0xff] %vm772_vm2, %v740_v58  ;;  %v743_v62 = vmax.f32 %v565_v59, 0.0  ;;  %v560_v63 = vadd.f32 %v8445_v13, %v559_v60  ;;  %7041 = vmatprep.mubr.msk.f32.mxu1 %vm772_vm2, %v8575_v61  ;;  %7167 = vmatmul.mubr.msk.f32.gmra.mxu0 %vm772_vm2, %v8575_v61  ;;  %v865_v0 = vld [vmem:[#allocation2 + $0xe0] ss:$2 sm:$0xff] }
 0x110   :  { %v929_v1 = vld [vmem:[#allocation2 + $0xe1] ss:$2 sm:$0xff]  ;;  %v6984_v2 = vpop.f32.mrf.mxu0 }
 0x111   :  { %808 = vst.msk [vmem:[#allocation2 + $0x118] sm:$0xff] %vm772_vm2, %v743_v62  ;;  %v742_v3 = vmax.f32 %v560_v63, 0.0  ;;  %v575_v4 = vadd.f32 %v6984_v2, %v8445_v13  ;;  %v978_v8 = vmax.f32 %v865_v0, %v929_v1 }
 0x112   :  { %v867_v5 = vld [vmem:[#allocation2 + $0xf0] ss:$2 sm:$0xff]  ;;  %v931_v6 = vld [vmem:[#allocation2 + $0xf1] ss:$2 sm:$0xff]  ;;  %v569_v7 = vpop.f32.mrf.mxu0 }
 0x113   :  { %v979_v9 = vmax.f32 %v867_v5, %v931_v6  ;;  %807 = vst.msk [vmem:[#allocation2 + $0x110] sm:$0xff] %vm772_vm2, %v742_v3  ;;  %v745_v10 = vmax.f32 %v575_v4, 0.0  ;;  %v570_v11 = vadd.f32 %v8445_v13, %v569_v7 }
 0x114   :  { %v6987_v15 = vpop.f32.mrf.mxu0 }
 0x115   :  { %v1003_v16 = vmax.f32 %v978_v8, %v979_v9  ;;  %810 = vst.msk [vmem:[#allocation2 + $0x128] sm:$0xff] %vm772_vm2, %v745_v10  ;;  %v744_v17 = vmax.f32 %v570_v11, 0.0  ;;  %v585_v18 = vadd.f32 %v6987_v15, %v8445_v13 }
 0x116   :  { %v579_v20 = vpop.f32.mrf.mxu0  ;;  %v8590_v21 = vld [vmem:[#allocation3 + $0x71] sm:$0xff]  ;;  %v869_v24 = vld [vmem:[#allocation2 + $0x100] ss:$2 sm:$0xff]  ;;  %v933_v25 = vld [vmem:[#allocation2 + $0x101] ss:$2 sm:$0xff] }
 0x117   :  { %1061 = vst.msk [vmem:[#allocation3 + $0x81] sm:$0xff] %vm772_vm2, %v1003_v16  ;;  %809 = vst.msk [vmem:[#allocation2 + $0x120] sm:$0xff] %vm772_vm2, %v744_v17  ;;  %v747_v22 = vmax.f32 %v585_v18, 0.0  ;;  %v580_v23 = vadd.f32 %v8445_v13, %v579_v20  ;;  %7042 = vmatmul.mubr.msk.f32.gmra.mxu1 %vm772_vm2, %v8590_v21  ;;  %7169 = vmatprep.mubr.msk.f32.mxu0 %vm772_vm2, %v8590_v21  ;;  %v980_v31 = vmax.f32 %v869_v24, %v933_v25 }
 0x118   :  { %v6990_v26 = vpop.f32.mrf.mxu0  ;;  %7044 = vmatprep.mubr.msk.f32.mxu1 %vm772_vm2, %v1098_v19 }
 0x119   :  { %812 = vst.msk [vmem:[#allocation2 + $0x138] sm:$0xff] %vm772_vm2, %v747_v22  ;;  %v746_v27 = vmax.f32 %v580_v23, 0.0  ;;  %v595_v28 = vadd.f32 %v6990_v26, %v8445_v13 }
 0x11a   :  { %v871_v14 = vld [vmem:[#allocation2 + $0x110] ss:$2 sm:$0xff]  ;;  %v935_v29 = vld [vmem:[#allocation2 + $0x111] ss:$2 sm:$0xff]  ;;  %v589_v30 = vpop.f32.mrf.mxu0 }
 0x11b   :  { %v981_v32 = vmax.f32 %v871_v14, %v935_v29  ;;  %811 = vst.msk [vmem:[#allocation2 + $0x130] sm:$0xff] %vm772_vm2, %v746_v27  ;;  %v749_v33 = vmax.f32 %v595_v28, 0.0  ;;  %v590_v34 = vadd.f32 %v8445_v13, %v589_v30 }
 0x11c   :  { %v6993_v36 = vpop.f32.mrf.mxu0 }
 0x11d   :  { %v1004_v37 = vmax.f32 %v980_v31, %v981_v32  ;;  %814 = vst.msk [vmem:[#allocation2 + $0x148] sm:$0xff] %vm772_vm2, %v749_v33  ;;  %v748_v38 = vmax.f32 %v590_v34, 0.0  ;;  %v605_v39 = vadd.f32 %v6993_v36, %v8445_v13 }
 0x11e   :  { %v599_v40 = vpop.f32.mrf.mxu0  ;;  %v8606_v41 = vld [vmem:[#allocation3 + $0x81] sm:$0xff] }
 0x11f   :  { %1062 = vst.msk [vmem:[#allocation3 + $0xb1] sm:$0xff] %vm772_vm2, %v1004_v37  ;;  %813 = vst.msk [vmem:[#allocation2 + $0x140] sm:$0xff] %vm772_vm2, %v748_v38  ;;  %v751_v42 = vmax.f32 %v605_v39, 0.0  ;;  %v600_v43 = vadd.f32 %v8445_v13, %v599_v40  ;;  %7170 = vmatmul.mubr.msk.f32.gmra.mxu0 %vm772_vm2, %v8606_v41  ;;  %v873_v44 = vld [vmem:[#allocation2 + $0x120] ss:$2 sm:$0xff] }
 0x120   :  { %v937_v45 = vld [vmem:[#allocation2 + $0x121] ss:$2 sm:$0xff]  ;;  %v6996_v46 = vpop.f32.mrf.mxu0 }
 0x121   :  { %816 = vst.msk [vmem:[#allocation2 + $0x158] sm:$0xff] %vm772_vm2, %v751_v42  ;;  %v750_v47 = vmax.f32 %v600_v43, 0.0  ;;  %v615_v48 = vadd.f32 %v6996_v46, %v8445_v13  ;;  %v982_v50 = vmax.f32 %v873_v44, %v937_v45 }
 0x122   :  { %v875_v49 = vld [vmem:[#allocation2 + $0x130] ss:$2 sm:$0xff]  ;;  %v939_v52 = vld [vmem:[#allocation2 + $0x131] ss:$2 sm:$0xff]  ;;  %v609_v53 = vpop.f32.mrf.mxu0 }
 0x123   :  { %v983_v54 = vmax.f32 %v875_v49, %v939_v52  ;;  %815 = vst.msk [vmem:[#allocation2 + $0x150] sm:$0xff] %vm772_vm2, %v750_v47  ;;  %v753_v55 = vmax.f32 %v615_v48, 0.0  ;;  %v610_v56 = vadd.f32 %v8445_v13, %v609_v53 }
 0x124   :  { %v6999_v57 = vpop.f32.mrf.mxu0 }
 0x125   :  { %v1005_v58 = vmax.f32 %v982_v50, %v983_v54  ;;  %818 = vst.msk [vmem:[#allocation2 + $0x168] sm:$0xff] %vm772_vm2, %v753_v55  ;;  %v752_v59 = vmax.f32 %v610_v56, 0.0  ;;  %v625_v60 = vadd.f32 %v6999_v57, %v8445_v13 }
 0x126   :  { %v619_v62 = vpop.f32.mrf.mxu0  ;;  %v1099_v63 = vld [vmem:[#allocation3 + $0xb1] sm:$0xff]  ;;  %v877_v2 = vld [vmem:[#allocation2 + $0x140] ss:$2 sm:$0xff]  ;;  %v941_v3 = vld [vmem:[#allocation2 + $0x141] ss:$2 sm:$0xff] }
 0x127   :  { %1063 = vst.msk [vmem:[#allocation3 + $0xc1] sm:$0xff] %vm772_vm2, %v1005_v58  ;;  %817 = vst.msk [vmem:[#allocation2 + $0x160] sm:$0xff] %vm772_vm2, %v752_v59  ;;  %v755_v0 = vmax.f32 %v625_v60, 0.0  ;;  %v620_v1 = vadd.f32 %v8445_v13, %v619_v62  ;;  %7045 = vmatmul.mubr.msk.f32.gmra.mxu1 %vm772_vm2, %v1099_v63  ;;  %7172 = vmatprep.mubr.msk.f32.mxu0 %vm772_vm2, %v1099_v63  ;;  %v984_v10 = vmax.f32 %v877_v2, %v941_v3 }
 0x128   :  { %v7002_v4 = vpop.f32.mrf.mxu0 }
 0x129   :  { %820 = vst.msk [vmem:[#allocation2 + $0x178] sm:$0xff] %vm772_vm2, %v755_v0  ;;  %v754_v5 = vmax.f32 %v620_v1, 0.0  ;;  %v635_v6 = vadd.f32 %v7002_v4, %v8445_v13 }
 0x12a   :  { %v879_v7 = vld [vmem:[#allocation2 + $0x150] ss:$2 sm:$0xff]  ;;  %v943_v8 = vld [vmem:[#allocation2 + $0x151] ss:$2 sm:$0xff]  ;;  %v629_v9 = vpop.f32.mrf.mxu0 }
 0x12b   :  { %v985_v11 = vmax.f32 %v879_v7, %v943_v8  ;;  %819 = vst.msk [vmem:[#allocation2 + $0x170] sm:$0xff] %vm772_vm2, %v754_v5  ;;  %v757_v15 = vmax.f32 %v635_v6, 0.0  ;;  %v630_v16 = vadd.f32 %v8445_v13, %v629_v9 }
 0x12c   :  { %v7005_v17 = vpop.f32.mrf.mxu0 }
 0x12d   :  { %v1006_v18 = vmax.f32 %v984_v10, %v985_v11  ;;  %822 = vst.msk [vmem:[#allocation2 + $0x188] sm:$0xff] %vm772_vm2, %v757_v15  ;;  %v756_v19 = vmax.f32 %v630_v16, 0.0  ;;  %v645_v20 = vadd.f32 %v7005_v17, %v8445_v13 }
 0x12e   :  { %v639_v22 = vpop.f32.mrf.mxu0  ;;  %v8630_v23 = vld [vmem:[#allocation3 + $0xc1] sm:$0xff] }
 0x12f   :  { %1064 = vst.msk [vmem:[#allocation3 + $0xd1] sm:$0xff] %vm772_vm2, %v1006_v18  ;;  %821 = vst.msk [vmem:[#allocation2 + $0x180] sm:$0xff] %vm772_vm2, %v756_v19  ;;  %v759_v24 = vmax.f32 %v645_v20, 0.0  ;;  %v640_v25 = vadd.f32 %v8445_v13, %v639_v22  ;;  %7047 = vmatprep.mubr.msk.f32.mxu1 %vm772_vm2, %v8630_v23  ;;  %7173 = vmatmul.mubr.msk.f32.gmra.mxu0 %vm772_vm2, %v8630_v23  ;;  %v881_v26 = vld [vmem:[#allocation2 + $0x160] ss:$2 sm:$0xff] }
 0x130   :  { %v945_v27 = vld [vmem:[#allocation2 + $0x161] ss:$2 sm:$0xff]  ;;  %v7008_v28 = vpop.f32.mrf.mxu0 }
 0x131   :  { %824 = vst.msk [vmem:[#allocation2 + $0x198] sm:$0xff] %vm772_vm2, %v759_v24  ;;  %v758_v14 = vmax.f32 %v640_v25, 0.0  ;;  %v655_v29 = vadd.f32 %v7008_v28, %v8445_v13  ;;  %v986_v33 = vmax.f32 %v881_v26, %v945_v27 }
 0x132   :  { %v883_v30 = vld [vmem:[#allocation2 + $0x170] ss:$2 sm:$0xff]  ;;  %v947_v31 = vld [vmem:[#allocation2 + $0x171] ss:$2 sm:$0xff]  ;;  %v649_v32 = vpop.f32.mrf.mxu0 }
 0x133   :  { %v987_v34 = vmax.f32 %v883_v30, %v947_v31  ;;  %823 = vst.msk [vmem:[#allocation2 + $0x190] sm:$0xff] %vm772_vm2, %v758_v14  ;;  %v761_v36 = vmax.f32 %v655_v29, 0.0  ;;  %v650_v37 = vadd.f32 %v8445_v13, %v649_v32 }
 0x134   :  { %v7011_v38 = vpop.f32.mrf.mxu0 }
 0x135   :  { %v1007_v39 = vmax.f32 %v986_v33, %v987_v34  ;;  %826 = vst.msk [vmem:[#allocation2 + $0x1a8] sm:$0xff] %vm772_vm2, %v761_v36  ;;  %v760_v40 = vmax.f32 %v650_v37, 0.0  ;;  %v665_v42 = vadd.f32 %v7011_v38, %v8445_v13 }
 0x136   :  { %v659_v43 = vpop.f32.mrf.mxu0  ;;  %v8645_v44 = vld [vmem:[#allocation3 + $0xd1] sm:$0xff]  ;;  %v885_v47 = vld [vmem:[#allocation2 + $0x180] ss:$2 sm:$0xff]  ;;  %v949_v48 = vld [vmem:[#allocation2 + $0x181] ss:$2 sm:$0xff] }
 0x137   :  { %1065 = vst.msk [vmem:[#allocation3 + $0xe1] sm:$0xff] %vm772_vm2, %v1007_v39  ;;  %825 = vst.msk [vmem:[#allocation2 + $0x1a0] sm:$0xff] %vm772_vm2, %v760_v40  ;;  %v763_v45 = vmax.f32 %v665_v42, 0.0  ;;  %v660_v46 = vadd.f32 %v8445_v13, %v659_v43  ;;  %7048 = vmatmul.mubr.msk.f32.gmra.mxu1 %vm772_vm2, %v8645_v44  ;;  %7175 = vmatprep.mubr.msk.f32.mxu0 %vm772_vm2, %v8645_v44  ;;  %v988_v56 = vmax.f32 %v885_v47, %v949_v48  ;;  %v1070_v47 = vld [vmem:[#allocation3] sm:$0xff] }
 0x138   :  { %v7014_v49 = vpop.f32.mrf.mxu0 }
 0x139   :  { %828 = vst.msk [vmem:[#allocation2 + $0x1b8] sm:$0xff] %vm772_vm2, %v763_v45  ;;  %v762_v52 = vmax.f32 %v660_v46, 0.0  ;;  %v675_v53 = vadd.f32 %v7014_v49, %v8445_v13  ;;  %v8701_v49 = vld [vmem:[#allocation3 + $0x10] sm:$0xff] }
 0x13a   :  { %v887_v50 = vld [vmem:[#allocation2 + $0x190] ss:$2 sm:$0xff]  ;;  %v951_v54 = vld [vmem:[#allocation2 + $0x191] ss:$2 sm:$0xff]  ;;  %v669_v55 = vpop.f32.mrf.mxu0 }
 0x13b   :  { %v989_v57 = vmax.f32 %v887_v50, %v951_v54  ;;  %827 = vst.msk [vmem:[#allocation2 + $0x1b0] sm:$0xff] %vm772_vm2, %v762_v52  ;;  %v765_v58 = vmax.f32 %v675_v53, 0.0  ;;  %v670_v59 = vadd.f32 %v8445_v13, %v669_v55  ;;  %v6082_v52 = vld [vmem:[%s10717_s4 + $0x50] sm:$0xff]  ;;  %v8708_v53 = vld [vmem:[#allocation3 + $0x20] sm:$0xff]  ;;  %v6081_v55 = vld [vmem:[%s10717_s4 + $0x48] sm:$0xff] }
 0x13c   :  { %v7017_v60 = vpop.f32.mrf.mxu0  ;;  %v8713_v50 = vld [vmem:[#allocation3 + $0x30] sm:$0xff] }
 0x13d   :  { %v1008_v62 = vmax.f32 %v988_v56, %v989_v57  ;;  %830 = vst.msk [vmem:[#allocation2 + $0x1c8] sm:$0xff] %vm772_vm2, %v765_v58  ;;  %v764_v63 = vmax.f32 %v670_v59, 0.0  ;;  %v685_v0 = vadd.f32 %v7017_v60, %v8445_v13  ;;  %v8730_v56 = vld [vmem:[#allocation3 + $0x50] sm:$0xff]  ;;  %v6080_v57 = vld [vmem:[%s10717_s4 + $0x40] sm:$0xff] }
 0x13e   :  { %v679_v1 = vpop.f32.mrf.mxu0  ;;  %v8660_v2 = vld [vmem:[#allocation3 + $0xe1] sm:$0xff]  ;;  %v6202_v59 = vld [vmem:[%s10717_s4 + $0x110] sm:$0xff] }
 0x13f   :  { %1066 = vst.msk [vmem:[#allocation3 + $0xf1] sm:$0xff] %vm772_vm2, %v1008_v62  ;;  %829 = vst.msk [vmem:[#allocation2 + $0x1c0] sm:$0xff] %vm772_vm2, %v764_v63  ;;  %v767_v3 = vmax.f32 %v685_v0, 0.0  ;;  %v680_v4 = vadd.f32 %v8445_v13, %v679_v1  ;;  %7050 = vmatprep.mubr.msk.f32.mxu1 %vm772_vm2, %v8660_v2  ;;  %7176 = vmatmul.mubr.msk.f32.gmra.mxu0 %vm772_vm2, %v8660_v2  ;;  %v889_v5 = vld [vmem:[#allocation2 + $0x1a0] ss:$2 sm:$0xff]  ;;  %v8749_v62 = vld [vmem:[#allocation3 + $0x70] sm:$0xff] }
 0x140   :  { %v953_v6 = vld [vmem:[#allocation2 + $0x1a1] ss:$2 sm:$0xff]  ;;  %v7020_v7 = vpop.f32.mrf.mxu0  ;;  %v6103_v63 = vld [vmem:[%s10717_s4 + $0x78] sm:$0xff] }
 0x141   :  { %832 = vst.msk [vmem:[#allocation2 + $0x1d8] sm:$0xff] %vm772_vm2, %v767_v3  ;;  %v766_v8 = vmax.f32 %v680_v4, 0.0  ;;  %v695_v9 = vadd.f32 %v7020_v7, %v8445_v13  ;;  %v990_v16 = vmax.f32 %v889_v5, %v953_v6  ;;  %v8739_v58 = vld [vmem:[#allocation3 + $0x60] sm:$0xff]  ;;  %v6201_v0 = vld [vmem:[%s10717_s4 + $0x108] sm:$0xff]  ;;  %v2425_v5 = vld [vmem:[#allocation3 + $0x90] sm:$0xff] }
 0x142   :  { %v891_v10 = vld [vmem:[#allocation2 + $0x1b0] ss:$2 sm:$0xff]  ;;  %v955_v11 = vld [vmem:[#allocation2 + $0x1b1] ss:$2 sm:$0xff]  ;;  %v689_v15 = vpop.f32.mrf.mxu0  ;;  %v1078_v60 = vld [vmem:[#allocation3 + $0xa0] sm:$0xff] }
 0x143   :  { %v991_v17 = vmax.f32 %v891_v10, %v955_v11  ;;  %831 = vst.msk [vmem:[#allocation2 + $0x1d0] sm:$0xff] %vm772_vm2, %v766_v8  ;;  %v769_v18 = vmax.f32 %v695_v9, 0.0  ;;  %v690_v19 = vadd.f32 %v8445_v13, %v689_v15  ;;  %v8770_v1 = vld [vmem:[#allocation3 + $0xc0] sm:$0xff]  ;;  %v8781_v6 = vld [vmem:[#allocation3 + $0xd0] sm:$0xff] }
 0x144   :  { %v7023_v20 = vpop.f32.mrf.mxu0  ;;  %v8772_v3 = vld [vmem:[#allocation3 + $0x80] sm:$0xff]  ;;  %v8814_v15 = vld [vmem:[#allocation3 + $0x12] sm:$0xff] }
 0x145   :  { %v1009_v22 = vmax.f32 %v990_v16, %v991_v17  ;;  %834 = vst.msk [vmem:[#allocation2 + $0x1e8] sm:$0xff] %vm772_vm2, %v769_v18  ;;  %v768_v24 = vmax.f32 %v690_v19, 0.0  ;;  %v705_v25 = vadd.f32 %v7023_v20, %v8445_v13  ;;  %v6200_v4 = vld [vmem:[%s10717_s4 + $0x100] sm:$0xff]  ;;  %v6102_v17 = vld [vmem:[%s10717_s4 + $0x70] sm:$0xff] }
 0x146   :  { %v699_v26 = vpop.f32.mrf.mxu0  ;;  %v8675_v27 = vld [vmem:[#allocation3 + $0xf1] sm:$0xff]  ;;  %v893_v29 = vld [vmem:[#allocation2 + $0x1c0] ss:$2 sm:$0xff]  ;;  %v957_v30 = vld [vmem:[#allocation2 + $0x1c1] ss:$2 sm:$0xff] }
 0x147   :  { %1067 = vst.msk [vmem:[#allocation3 + $0x101] sm:$0xff] %vm772_vm2, %v1009_v22  ;;  %833 = vst.msk [vmem:[#allocation2 + $0x1e0] sm:$0xff] %vm772_vm2, %v768_v24  ;;  %v771_v28 = vmax.f32 %v705_v25, 0.0  ;;  %v700_v14 = vadd.f32 %v8445_v13, %v699_v26  ;;  %7051 = vmatmul.mubr.msk.f32.gmra.mxu1 %vm772_vm2, %v8675_v27  ;;  %7178 = vmatprep.mubr.msk.f32.mxu0 %vm772_vm2, %v8675_v27  ;;  %v992_v34 = vmax.f32 %v893_v29, %v957_v30  ;;  %v8786_v7 = vld [vmem:[#allocation3 + $0xe0] sm:$0xff]  ;;  %v8792_v8 = vld [vmem:[#allocation3 + $0xf0] sm:$0xff] }
 0x148   :  { %v1497_v10 = vld [vmem:[#allocation3 + $0x2] sm:$0xff]  ;;  %v2433_v19 = vld [vmem:[#allocation3 + $0x130] sm:$0xff]  ;;  %v6143_v30 = vld [vmem:[%s10717_s4 + $0xb8] sm:$0xff] }
 0x149   :  { %836 = vst.msk [vmem:[#allocation2 + $0x1f8] sm:$0xff] %vm772_vm2, %v771_v28  ;;  %v770_v31 = vmax.f32 %v700_v14, 0.0  ;;  %v8825_v18 = vld [vmem:[#allocation3 + $0x22] sm:$0xff]  ;;  %v8831_v20 = vld [vmem:[#allocation3 + $0x32] sm:$0xff] }
 0x14a   :  { %v895_v32 = vld [vmem:[#allocation2 + $0x1d0] ss:$2 sm:$0xff]  ;;  %v959_v33 = vld [vmem:[#allocation2 + $0x1d1] ss:$2 sm:$0xff]  ;;  %v6101_v22 = vld [vmem:[%s10717_s4 + $0x68] sm:$0xff] }
 0x14b   :  { %v993_v36 = vmax.f32 %v895_v32, %v959_v33  ;;  %835 = vst.msk [vmem:[#allocation2 + $0x1f0] sm:$0xff] %vm772_vm2, %v770_v31  ;;  %v8839_v24 = vld [vmem:[#allocation3 + $0x42] sm:$0xff]  ;;  %v8845_v25 = vld [vmem:[#allocation3 + $0x52] sm:$0xff] }
 0x14c   :  { %v6100_v26 = vld [vmem:[%s10717_s4 + $0x60] sm:$0xff]  ;;  %v8860_v29 = vld [vmem:[#allocation3 + $0x72] sm:$0xff] }
 0x14d   :  { %v1010_v37 = vmax.f32 %v992_v34, %v993_v36  ;;  %v8854_v28 = vld [vmem:[#allocation3 + $0x62] sm:$0xff]  ;;  %v8872_v31 = vld [vmem:[#allocation3 + $0xb2] sm:$0xff] }
 0x14e   :  { %v897_v38 = vld [vmem:[#allocation2 + $0x1e0] ss:$2 sm:$0xff]  ;;  %v961_v13 = vld [vmem:[#allocation2 + $0x1e1] ss:$2 sm:$0xff]  ;;  %v2885_v34 = vld [vmem:[#allocation3 + $0x92] sm:$0xff] }
 0x14f   :  { %v8686_v39 = vld [vmem:[#allocation3 + $0x101] sm:$0xff]  ;;  %1068 = vst.msk [vmem:[#allocation3 + $0x111] sm:$0xff] %vm772_vm2, %v1010_v37  ;;  %v994_v40 = vmax.f32 %v897_v38, %v961_v13  ;;  %v8886_v36 = vld [vmem:[#allocation3 + $0xd2] sm:$0xff] }
 0x150   :  { %7053 = vmatprep.mubr.msk.f32.mxu1 %vm772_vm2, %v8686_v39  ;;  %7179 = vmatmul.mubr.msk.f32.gmra.mxu0 %vm772_vm2, %v8686_v39  ;;  %v8799_v9 = vld [vmem:[#allocation3 + $0x100] sm:$0xff]  ;;  %v8897_v38 = vld [vmem:[#allocation3 + $0xf2] sm:$0xff] }
 0x151   :  { %v1505_v14 = vld [vmem:[#allocation3 + $0xa2] sm:$0xff] }
 0x152   :  { %v899_v42 = vld [vmem:[#allocation2 + $0x1f0] ss:$2 sm:$0xff]  ;;  %v963_v43 = vld [vmem:[#allocation2 + $0x1f1] ss:$2 sm:$0xff]  ;;  %v8878_v32 = vld [vmem:[#allocation3 + $0xc2] sm:$0xff] }
 0x153   :  { %v995_v45 = vmax.f32 %v899_v42, %v963_v43  ;;  %v8880_v33 = vld [vmem:[#allocation3 + $0x82] sm:$0xff]  ;;  %v6142_v42 = vld [vmem:[%s10717_s4 + $0xb0] sm:$0xff] }
 0x154   :  { %v8891_v37 = vld [vmem:[#allocation3 + $0xe2] sm:$0xff] }
 0x155   :  { %v1011_v46 = vmax.f32 %v994_v40, %v995_v45  ;;  %v8903_v13 = vld [vmem:[#allocation3 + $0x102] sm:$0xff] }
 0x156   :  { %v8693_v48 = vld [vmem:[#allocation3 + $0x111] sm:$0xff]  ;;  %v6141_v45 = vld [vmem:[%s10717_s4 + $0xa8] sm:$0xff] }
 0x157   :  { %1069 = vst.msk [vmem:[#allocation3 + $0x121] sm:$0xff] %vm772_vm2, %v1011_v46  ;;  %7054 = vmatmul.mubr.msk.f32.gmra.mxu1 %vm772_vm2, %v8693_v48  ;;  %7181 = vmatprep.mubr.msk.f32.mxu0 %vm772_vm2, %v8693_v48  ;;  %v8805_v11 = vld [vmem:[#allocation3 + $0x110] sm:$0xff]  ;;  %v6140_v46 = vld [vmem:[%s10717_s4 + $0xa0] sm:$0xff] }
 0x158   :  { %7064 = vmatprep.mubr.msk.f32.mxu1 %vm772_vm2, %v1070_v47  ;;  %v1512_v40 = vld [vmem:[#allocation3 + $0x112] sm:$0xff] }
 0x159   :  { %v2893_v47 = vld [vmem:[#allocation3 + $0x132] sm:$0xff] }
 0x15b   :  { %7065 = vmatmul.mubr.msk.f32.vlgmr.msra.gmra.mxu1 %vm772_vm2, %v8701_v49 }
 0x15c   :  { %7089 = vmatpush3.msra.mxu1 %v8512_v35  ;;  %7067 = vmatprep.mubr.msk.f32.mxu1 %vm772_vm2, %v8708_v53  ;;  %v8724_v35 = vld [vmem:[#allocation3 + $0x40] sm:$0xff] }
 0x15d   :  { %7090 = vmatprep.subr.mxu1 %v6082_v52 }
 0x15e   :  { %v8715_v54 = vld [vmem:[#allocation3 + $0x121] sm:$0xff]  ;;  %7091 = vmatpush3.msra.mxu1 %v6082_v52  ;;  %v6182_v52 = vld [vmem:[%s10717_s4 + $0xf0] sm:$0xff] }
 0x15f   :  { %7068 = vmatmul.mubr.msk.f32.gmra.mxu1 %vm772_vm2, %v8713_v50  ;;  %7182 = vmatmul.mubr.msk.f32.gmra.mxu0 %vm772_vm2, %v8715_v54  ;;  %v8816_v16 = vld [vmem:[#allocation3 + $0x120] sm:$0xff] }
 0x160   :  { %7070 = vmatprep.mubr.msk.f32.mxu1 %vm772_vm2, %v8724_v35  ;;  %7224 = vmatprep.mubr.msk.f32.mxu0 %vm772_vm2, %v8708_v53  ;;  %v2892_v43 = vld [vmem:[#allocation3 + $0x122] sm:$0xff] }
 0x161   :  { %7092 = vmatprep.subr.mxu1 %v6081_v55 }
 0x162   :  { %7093 = vmatpush3.msra.mxu1 %v6081_v55  ;;  %v2648_v55 = vld [vmem:[#allocation3 + $0x21] sm:$0xff] }
 0x163   :  { %7071 = vmatmul.mubr.msk.f32.gmra.mxu1 %vm772_vm2, %v8730_v56  ;;  %7225 = vmatmul.mubr.msk.f32.vlgmr.msra.gmra.mxu0 %vm772_vm2, %v8713_v50 }
 0x164   :  { %7073 = vmatprep.mubr.msk.f32.mxu1 %vm772_vm2, %v8739_v58  ;;  %7227 = vmatprep.mubr.msk.f32.mxu0 %vm772_vm2, %v8724_v35 }
 0x165   :  { %7094 = vmatprep.subr.mxu1 %v6080_v57  ;;  %7281 = vmatpush3.msra.mxu0 %v8548_v12  ;;  %v8764_v12 = vld [vmem:[#allocation3 + $0xb0] sm:$0xff] }
 0x166   :  { %7095 = vmatpush3.msra.mxu1 %v6080_v57  ;;  %7282 = vmatprep.subr.mxu0 %v6202_v59  ;;  %v2651_v57 = vld [vmem:[#allocation3 + $0x51] sm:$0xff] }
 0x167   :  { %7074 = vmatmul.mubr.msk.f32.gmra.mxu1 %vm772_vm2, %v8749_v62  ;;  %7228 = vmatmul.mubr.msk.f32.gmra.mxu0 %vm772_vm2, %v8730_v56 }
 0x168   :  { %7230 = vmatprep.mubr.msk.f32.mxu0 %vm772_vm2, %v8739_v58  ;;  %7076 = vmatprep.mubr.msk.f32.mxu1 %vm772_vm2, %v1078_v60 }
 0x169   :  { %7120 = vmatprep.subr.mxu1 %v6103_v63  ;;  %7283 = vmatpush3.msra.mxu0 %v6202_v59 }
 0x16a   :  { %7284 = vmatprep.subr.mxu0 %v6201_v0 }
 0x16b   :  { %7077 = vmatmul.mubr.msk.f32.gmra.mxu1 %vm772_vm2, %v8764_v12  ;;  %7231 = vmatmul.mubr.msk.f32.gmra.mxu0 %vm772_vm2, %v8749_v62 }
 0x16c   :  { %7079 = vmatprep.mubr.msk.f32.mxu1 %vm772_vm2, %v8770_v1  ;;  %7233 = vmatprep.mubr.msk.f32.mxu0 %vm772_vm2, %v8772_v3 }
 0x16d   :  { %7285 = vmatpush3.msra.mxu0 %v6201_v0 }
 0x16e   :  { %7286 = vmatprep.subr.mxu0 %v6200_v4 }
 0x16f   :  { %7080 = vmatmul.mubr.msk.f32.gmra.mxu1 %vm772_vm2, %v8781_v6  ;;  %7234 = vmatmul.mubr.msk.f32.gmra.mxu0 %vm772_vm2, %v2425_v5 }
 0x170   :  { %7082 = vmatprep.mubr.msk.f32.mxu1 %vm772_vm2, %v8786_v7  ;;  %7236 = vmatprep.mubr.msk.f32.mxu0 %vm772_vm2, %v8770_v1 }
 0x171   :  { %7287 = vmatpush3.msra.mxu0 %v6200_v4 }
 0x172   :  { %7350 = vmatprep.subr.mxu0 %v10729_v51 }
 0x173   :  { %7083 = vmatmul.mubr.msk.f32.gmra.mxu1 %vm772_vm2, %v8792_v8  ;;  %7237 = vmatmul.mubr.msk.f32.gmra.mxu0 %vm772_vm2, %v8781_v6 }
 0x174   :  { %7085 = vmatprep.mubr.msk.f32.mxu1 %vm772_vm2, %v8799_v9  ;;  %7239 = vmatprep.mubr.msk.f32.mxu0 %vm772_vm2, %v8786_v7 }
 0x177   :  { %7086 = vmatmul.mubr.msk.f32.gmra.mxu1 %vm772_vm2, %v8805_v11  ;;  %7240 = vmatmul.mubr.msk.f32.gmra.mxu0 %vm772_vm2, %v8792_v8 }
 0x178   :  { %7242 = vmatprep.mubr.msk.f32.mxu0 %vm772_vm2, %v8799_v9  ;;  %7096 = vmatprep.mubr.msk.f32.mxu1 %vm772_vm2, %v1497_v10 }
 0x17b   :  { %7097 = vmatmul.mubr.msk.f32.vlgmr.msra.gmra.mxu1 %vm772_vm2, %v8814_v15  ;;  %7243 = vmatmul.mubr.msk.f32.gmra.mxu0 %vm772_vm2, %v8805_v11 }
 0x17c   :  { %7121 = vmatpush3.msra.mxu1 %v6103_v63  ;;  %7099 = vmatprep.mubr.msk.f32.mxu1 %vm772_vm2, %v8825_v18 }
 0x17d   :  { %7245 = vmatprep.mubr.msk.f32.mxu0 %vm772_vm2, %v8816_v16  ;;  %7122 = vmatprep.subr.mxu1 %v6102_v17 }
 0x17e   :  { %7123 = vmatpush3.msra.mxu1 %v6102_v17 }
 0x17f   :  { %7100 = vmatmul.mubr.msk.f32.gmra.mxu1 %vm772_vm2, %v8831_v20  ;;  %7246 = vmatmul.mubr.msk.f32.gmra.mxu0 %vm772_vm2, %v2433_v19 }
 0x180   :  { %7102 = vmatprep.mubr.msk.f32.mxu1 %vm772_vm2, %v8839_v24  ;;  %7288 = vmatprep.mubr.msk.f32.mxu0 %vm772_vm2, %v8825_v18 }
 0x181   :  { %7124 = vmatprep.subr.mxu1 %v6101_v22 }
 0x182   :  { %7125 = vmatpush3.msra.mxu1 %v6101_v22  ;;  %v3241_v22 = vld [vmem:[%s10719_s6 + $0x28] sm:$0xff] }
 0x183   :  { %7103 = vmatmul.mubr.msk.f32.gmra.mxu1 %vm772_vm2, %v8845_v25  ;;  %7289 = vmatmul.mubr.msk.f32.vlgmr.msra.gmra.mxu0 %vm772_vm2, %v8831_v20 }
 0x184   :  { %7105 = vmatprep.mubr.msk.f32.mxu1 %vm772_vm2, %v8854_v28  ;;  %7291 = vmatprep.mubr.msk.f32.mxu0 %vm772_vm2, %v8839_v24 }
 0x185   :  { %7126 = vmatprep.subr.mxu1 %v6100_v26 }
 0x186   :  { %7127 = vmatpush3.msra.mxu1 %v6100_v26 }
 0x187   :  { %7106 = vmatmul.mubr.msk.f32.gmra.mxu1 %vm772_vm2, %v8860_v29  ;;  %7292 = vmatmul.mubr.msk.f32.gmra.mxu0 %vm772_vm2, %v8845_v25 }
 0x188   :  { %7294 = vmatprep.mubr.msk.f32.mxu0 %vm772_vm2, %v8854_v28  ;;  %7108 = vmatprep.mubr.msk.f32.mxu1 %vm772_vm2, %v1505_v14  ;;  %v6238_v14 = vld [vmem:[%s10719_s6 + $0xb8] sm:$0xff] }
 0x189   :  { %7184 = vmatprep.subr.mxu1 %v6143_v30  ;;  %7351 = vmatpush3.msra.mxu0 %v6238_v14 }
 0x18a   :  { %7352 = vmatprep.subr.mxu0 %v10729_v51 }
 0x18b   :  { %7109 = vmatmul.mubr.msk.f32.gmra.mxu1 %vm772_vm2, %v8872_v31  ;;  %7295 = vmatmul.mubr.msk.f32.gmra.mxu0 %vm772_vm2, %v8860_v29 }
 0x18c   :  { %7111 = vmatprep.mubr.msk.f32.mxu1 %vm772_vm2, %v8878_v32  ;;  %7297 = vmatprep.mubr.msk.f32.mxu0 %vm772_vm2, %v8880_v33 }
 0x18f   :  { %7112 = vmatmul.mubr.msk.f32.gmra.mxu1 %vm772_vm2, %v8886_v36  ;;  %7298 = vmatmul.mubr.msk.f32.gmra.mxu0 %vm772_vm2, %v2885_v34  ;;  %v3239_v34 = vld [vmem:[%s10719_s6 + $0x18] sm:$0xff] }
 0x190   :  { %7114 = vmatprep.mubr.msk.f32.mxu1 %vm772_vm2, %v8891_v37  ;;  %7300 = vmatprep.mubr.msk.f32.mxu0 %vm772_vm2, %v8878_v32 }
 0x193   :  { %7115 = vmatmul.mubr.msk.f32.gmra.mxu1 %vm772_vm2, %v8897_v38  ;;  %7301 = vmatmul.mubr.msk.f32.gmra.mxu0 %vm772_vm2, %v8886_v36 }
 0x194   :  { %7117 = vmatprep.mubr.msk.f32.mxu1 %vm772_vm2, %v8903_v13  ;;  %7303 = vmatprep.mubr.msk.f32.mxu0 %vm772_vm2, %v8891_v37 }
 0x197   :  { %7118 = vmatmul.mubr.msk.f32.gmra.mxu1 %vm772_vm2, %v1512_v40  ;;  %7304 = vmatmul.mubr.msk.f32.gmra.mxu0 %vm772_vm2, %v8897_v38 }
 0x198   :  { %7128 = vmatprep.mubr.msk.f32.mxu1 %vm772_vm2, %v8701_v49  ;;  %7306 = vmatprep.mubr.msk.f32.mxu0 %vm772_vm2, %v8903_v13  ;;  %v6183_v49 = vld [vmem:[%s10717_s4 + $0xf8] sm:$0xff] }
 0x19b   :  { %7129 = vmatmul.mubr.msk.f32.vlgmr.msra.gmra.mxu1 %vm772_vm2, %v8708_v53  ;;  %7307 = vmatmul.mubr.msk.f32.gmra.mxu0 %vm772_vm2, %v1512_v40  ;;  %v6181_v53 = vld [vmem:[%s10717_s4 + $0xe8] sm:$0xff] }
 0x19c   :  { %7185 = vmatpush3.msra.mxu1 %v6143_v30  ;;  %7131 = vmatprep.mubr.msk.f32.mxu1 %vm772_vm2, %v8713_v50  ;;  %v6180_v50 = vld [vmem:[%s10717_s4 + $0xe0] sm:$0xff] }
 0x19d   :  { %7186 = vmatprep.subr.mxu1 %v6142_v42  ;;  %7309 = vmatprep.mubr.msk.f32.mxu0 %vm772_vm2, %v2892_v43 }
 0x19e   :  { %7187 = vmatpush3.msra.mxu1 %v6142_v42 }
 0x19f   :  { %7132 = vmatmul.mubr.msk.f32.gmra.mxu1 %vm772_vm2, %v8724_v35  ;;  %7188 = vmatprep.subr.mxu1 %v6141_v45  ;;  %v2649_v35 = vld [vmem:[#allocation3 + $0x31] sm:$0xff] }
 0x1a0   :  { %7134 = vmatprep.mubr.msk.f32.mxu1 %vm772_vm2, %v8730_v56  ;;  %7189 = vmatpush3.msra.mxu1 %v6141_v45  ;;  %v2650_v56 = vld [vmem:[#allocation3 + $0x41] sm:$0xff]  ;;  %v6234_v45 = vld [vmem:[%s10719_s6 + $0x98] sm:$0xff] }
 0x1a1   :  { %7190 = vmatprep.subr.mxu1 %v6140_v46  ;;  %7310 = vmatmul.mubr.msk.f32.gmra.mxu0 %vm772_vm2, %v2893_v47 }
 0x1a2   :  { %7191 = vmatpush3.msra.mxu1 %v6140_v46  ;;  %7366 = vmatprep.mubr.msk.f32.mxu0 %vm7987_vm4, %v10729_v51 }
 0x1a3   :  { %7135 = vmatmul.mubr.msk.f32.gmra.mxu1 %vm772_vm2, %v8739_v58  ;;  %7248 = vmatprep.subr.mxu1 %v6183_v49  ;;  %v2655_v58 = vld [vmem:[#allocation3 + $0x91] sm:$0xff] }
 0x1a4   :  { %7137 = vmatprep.mubr.msk.f32.mxu1 %vm772_vm2, %v8749_v62 }
 0x1a7   :  { %7138 = vmatmul.mubr.msk.f32.gmra.mxu1 %vm772_vm2, %v8772_v3  ;;  %v9018_v59 = vpop.f32.mrf.mxu1  ;;  %v3243_v3 = vld [vmem:[%s10719_s6 + $0x38] sm:$0xff] }
 0x1a8   :  { %7140 = vmatprep.mubr.msk.f32.mxu1 %vm772_vm2, %v8764_v12 }
 0x1ab   :  { %7141 = vmatmul.mubr.msk.f32.gmra.mxu1 %vm772_vm2, %v8770_v1 }
 0x1ac   :  { %7143 = vmatprep.mubr.msk.f32.mxu1 %vm772_vm2, %v8781_v6 }
 0x1af   :  { %7144 = vmatmul.mubr.msk.f32.gmra.mxu1 %vm772_vm2, %v8786_v7  ;;  %v9047_v63 = vpop.f32.mrf.mxu0  ;;  %v3242_v7 = vld [vmem:[%s10719_s6 + $0x30] sm:$0xff] }
 0x1b0   :  { %7146 = vmatprep.mubr.msk.f32.mxu1 %vm772_vm2, %v8792_v8 }
 0x1b1   :  { %v9051_v0 = vpop.f32.mrf.mxu0 }
 0x1b3   :  { %7147 = vmatmul.mubr.msk.f32.gmra.mxu1 %vm772_vm2, %v8799_v9 }
 0x1b4   :  { %7149 = vmatprep.mubr.msk.f32.mxu1 %vm772_vm2, %v8805_v11 }
 0x1b7   :  { %7150 = vmatmul.mubr.msk.f32.gmra.mxu1 %vm772_vm2, %v8816_v16 }
 0x1b8   :  { %7192 = vmatprep.mubr.msk.f32.mxu1 %vm772_vm2, %v8814_v15 }
 0x1bb   :  { %7193 = vmatmul.mubr.msk.f32.vlgmr.msra.gmra.mxu1 %vm772_vm2, %v8825_v18 }
 0x1bc   :  { %7249 = vmatpush3.msra.mxu1 %v6183_v49  ;;  %7195 = vmatprep.mubr.msk.f32.mxu1 %vm772_vm2, %v8831_v20  ;;  %v3237_v49 = vld [vmem:[%s10719_s6 + $0x8] sm:$0xff] }
 0x1bd   :  { %7250 = vmatprep.subr.mxu1 %v6182_v52 }
 0x1be   :  { %7251 = vmatpush3.msra.mxu1 %v6182_v52  ;;  %v6233_v52 = vld [vmem:[%s10719_s6 + $0x90] sm:$0xff] }
 0x1bf   :  { %7196 = vmatmul.mubr.msk.f32.gmra.mxu1 %vm772_vm2, %v8839_v24  ;;  %7252 = vmatprep.subr.mxu1 %v6181_v53  ;;  %v9055_v1 = vpop.f32.mrf.mxu0 }
 0x1c0   :  { %7198 = vmatprep.mubr.msk.f32.mxu1 %vm772_vm2, %v8845_v25  ;;  %7253 = vmatpush3.msra.mxu1 %v6181_v53 }
 0x1c1   :  { %7254 = vmatprep.subr.mxu1 %v6180_v50  ;;  %v9063_v5 = vpop.f32.mrf.mxu0 }
 0x1c2   :  { %7255 = vmatpush3.msra.mxu1 %v6180_v50 }
 0x1c3   :  { %7199 = vmatmul.mubr.msk.f32.gmra.mxu1 %vm772_vm2, %v8854_v28  ;;  %7312 = vmatprep.subr.mxu1 %v10729_v51  ;;  %v3240_v28 = vld [vmem:[%s10719_s6 + $0x20] sm:$0xff] }
 0x1c4   :  { %7201 = vmatprep.mubr.msk.f32.mxu1 %vm772_vm2, %v8860_v29 }
 0x1c7   :  { %7202 = vmatmul.mubr.msk.f32.gmra.mxu1 %vm772_vm2, %v8880_v33 }
 0x1c8   :  { %7204 = vmatprep.mubr.msk.f32.mxu1 %vm772_vm2, %v8872_v31  ;;  %v6237_v31 = vld [vmem:[%s10719_s6 + $0xb0] sm:$0xff] }
 0x1c9   :  { %7353 = vmatpush3.msra.mxu0 %v6237_v31 }
 0x1ca   :  { %7354 = vmatprep.subr.mxu0 %v10729_v51 }
 0x1cb   :  { %7205 = vmatmul.mubr.msk.f32.gmra.mxu1 %vm772_vm2, %v8878_v32 }
 0x1cc   :  { %7207 = vmatprep.mubr.msk.f32.mxu1 %vm772_vm2, %v8886_v36  ;;  %v6236_v36 = vld [vmem:[%s10719_s6 + $0xa8] sm:$0xff] }
 0x1cd   :  { %7355 = vmatpush3.msra.mxu0 %v6236_v36 }
 0x1ce   :  { %7356 = vmatprep.subr.mxu0 %v10729_v51 }
 0x1cf   :  { %7208 = vmatmul.mubr.msk.f32.gmra.mxu1 %vm772_vm2, %v8891_v37  ;;  %v9070_v8 = vpop.f32.mrf.mxu0 }
 0x1d0   :  { %7210 = vmatprep.mubr.msk.f32.mxu1 %vm772_vm2, %v8897_v38  ;;  %v6235_v38 = vld [vmem:[%s10719_s6 + $0xa0] sm:$0xff] }
 0x1d1   :  { %v9077_v11 = vpop.f32.mrf.mxu0  ;;  %7357 = vmatpush3.msra.mxu0 %v6235_v38 }
 0x1d2   :  { %7358 = vmatprep.subr.mxu0 %v10729_v51 }
 0x1d3   :  { %7211 = vmatmul.mubr.msk.f32.gmra.mxu1 %vm772_vm2, %v8903_v13  ;;  %7359 = vmatpush3.msra.mxu0 %v6234_v45 }
 0x1d4   :  { %7213 = vmatprep.mubr.msk.f32.mxu1 %vm772_vm2, %v1512_v40  ;;  %7360 = vmatprep.subr.mxu0 %v10729_v51 }
 0x1d5   :  { %7361 = vmatpush3.msra.mxu0 %v6233_v52 }
 0x1d6   :  { %7362 = vmatprep.subr.mxu0 %v10729_v51 }
 0x1d7   :  { %7214 = vmatmul.mubr.msk.f32.gmra.mxu1 %vm772_vm2, %v2892_v43  ;;  %v3238_v43 = vld [vmem:[%s10719_s6 + $0x10] sm:$0xff] }
 0x1d8   :  { %7256 = vmatprep.mubr.msk.f32.mxu1 %vm772_vm2, %v2648_v55  ;;  %v3236_v55 = vld [vmem:[%s10719_s6] sm:$0xff] }
 0x1db   :  { %7257 = vmatmul.mubr.msk.f32.vlgmr.msra.gmra.mxu1 %vm772_vm2, %v2649_v35  ;;  %v6232_v35 = vld [vmem:[%s10719_s6 + $0x88] sm:$0xff] }
 0x1dc   :  { %7259 = vmatprep.mubr.msk.f32.mxu1 %vm772_vm2, %v2650_v56  ;;  %7313 = vmatpush3.msra.mxu1 %v3243_v3 }
 0x1dd   :  { %7314 = vmatprep.subr.mxu1 %v10729_v51  ;;  %7363 = vmatpush3.msra.mxu0 %v6232_v35 }
 0x1de   :  { %7315 = vmatpush3.msra.mxu1 %v3242_v7  ;;  %7364 = vmatprep.subr.mxu0 %v10729_v51 }
 0x1df   :  { %7260 = vmatmul.mubr.msk.f32.gmra.mxu1 %vm772_vm2, %v2651_v57  ;;  %7316 = vmatprep.subr.mxu1 %v10729_v51  ;;  %v9081_v16 = vpop.f32.mrf.mxu0 }
 0x1e0   :  { %7262 = vmatprep.mubr.msk.f32.mxu1 %vm772_vm2, %v8575_v61  ;;  %v9024_v61 = vpop.f32.mrf.mxu1  ;;  %7317 = vmatpush3.msra.mxu1 %v3241_v22 }
 0x1e1   :  { %v9087_v19 = vpop.f32.mrf.mxu0  ;;  %7318 = vmatprep.subr.mxu1 %v10729_v51 }
 0x1e2   :  { %7319 = vmatpush3.msra.mxu1 %v3240_v28 }
 0x1e3   :  { %7263 = vmatmul.mubr.msk.f32.gmra.mxu1 %vm772_vm2, %v8590_v21  ;;  %v9026_v21 = vpop.f32.mrf.mxu1  ;;  %7320 = vmatprep.subr.mxu1 %v10729_v51 }
 0x1e4   :  { %7265 = vmatprep.mubr.msk.f32.mxu1 %vm772_vm2, %v8606_v41  ;;  %v2663_v41 = vld [vmem:[#allocation3 + $0x131] sm:$0xff]  ;;  %7321 = vmatpush3.msra.mxu1 %v3239_v34 }
 0x1e5   :  { %7322 = vmatprep.subr.mxu1 %v10729_v51 }
 0x1e6   :  { %7323 = vmatpush3.msra.mxu1 %v3238_v43 }
 0x1e7   :  { %7266 = vmatmul.mubr.msk.f32.gmra.mxu1 %vm772_vm2, %v2655_v58  ;;  %7324 = vmatprep.subr.mxu1 %v10729_v51  ;;  %v6231_v58 = vld [vmem:[%s10719_s6 + $0x80] sm:$0xff] }
 0x1e8   :  { %7268 = vmatprep.mubr.msk.f32.mxu1 %vm772_vm2, %v8630_v23  ;;  %v9032_v23 = vpop.f32.mrf.mxu1  ;;  %7325 = vmatpush3.msra.mxu1 %v3237_v49 }
 0x1e9   :  { %7326 = vmatprep.subr.mxu1 %v10729_v51  ;;  %7365 = vmatpush3.msra.mxu0 %v6231_v58 }
 0x1ea   :  { %7327 = vmatpush3.msra.mxu1 %v3236_v55  ;;  %7388 = vmatprep.subr.mxu0 %v10729_v51 }
 0x1eb   :  { %7269 = vmatmul.mubr.msk.f32.gmra.mxu1 %vm772_vm2, %v8645_v44  ;;  %v9035_v44 = vpop.f32.mrf.mxu1  ;;  %7331 = vmatprep.subr.mxu1 %v10729_v51 }
 0x1ec   :  { %7271 = vmatprep.mubr.msk.f32.mxu1 %vm772_vm2, %v8660_v2 }
 0x1ed   :  { %v9037_v2 = vpop.f32.mrf.mxu1 }
 0x1ef   :  { %7272 = vmatmul.mubr.msk.f32.gmra.mxu1 %vm772_vm2, %v8675_v27  ;;  %v9039_v27 = vpop.f32.mrf.mxu1  ;;  %v9094_v24 = vpop.f32.mrf.mxu0 }
 0x1f0   :  { %7274 = vmatprep.mubr.msk.f32.mxu1 %vm772_vm2, %v8686_v39 }
 0x1f1   :  { %v9041_v39 = vpop.f32.mrf.mxu1  ;;  %v9107_v29 = vpop.f32.mrf.mxu0 }
 0x1f2   :  { %10785 = vst [vmem:[#allocation9_spill] sm:$0xff] %v9107_v29 }
 0x1f3   :  { %7275 = vmatmul.mubr.msk.f32.gmra.mxu1 %vm772_vm2, %v8693_v48  ;;  %v9043_v60 = vpop.f32.mrf.mxu1 }
 0x1f4   :  { %7277 = vmatprep.mubr.msk.f32.mxu1 %vm772_vm2, %v8715_v54 }
 0x1f5   :  { %v9045_v62 = vpop.f32.mrf.mxu1 }
 0x1f7   :  { %7278 = vmatmul.mubr.msk.f32.gmra.mxu1 %vm772_vm2, %v2663_v41  ;;  %v7049_v48 = vpop.f32.mrf.mxu1 }
 0x1f8   :  { %7328 = vmatprep.mubr.msk.f32.mxu1 %vm7987_vm4, %v10729_v51 }
 0x1f9   :  { %v9049_v54 = vpop.f32.mrf.mxu1 }
 0x1ff   :  { %v9116_v32 = vpop.f32.mrf.mxu0 }
 0x200   :  { %10786 = vst [vmem:[#allocation10_spill] sm:$0xff] %v9116_v32 }
 0x201   :  { %v9134_v13 = vpop.f32.mrf.mxu0 }
 0x202   :  { %10787 = vst [vmem:[#allocation11_spill] sm:$0xff] %v9134_v13 }
 0x207   :  { %v9053_v12 = vpop.f32.mrf.mxu1 }
 0x209   :  { %v9060_v4 = vpop.f32.mrf.mxu1 }
 0x210   :  { %v9145_v46 = vpop.f32.mrf.mxu0 }
 0x211   :  { %10788 = vst [vmem:[#allocation12_spill] sm:$0xff] %v9145_v46 }
 0x212   :  { %v9166_v56 = vpop.f32.mrf.mxu0 }
 0x213   :  { %10789 = vst [vmem:[#allocation13_spill] sm:$0xff] %v9166_v56 }
 0x217   :  { %v9065_v6 = vpop.f32.mrf.mxu1 }
 0x219   :  { %v9072_v9 = vpop.f32.mrf.mxu1 }
 0x21b   :  { %v9075_v10 = vpop.f32.mrf.mxu1 }
 0x21c   :  { %v1424_v7 = vadd.f32 %v9075_v10, %v9018_v59 }
 0x21d   :  { %v9079_v15 = vpop.f32.mrf.mxu1 }
 0x21f   :  { %v9083_v17 = vpop.f32.mrf.mxu1  ;;  %v9174_v41 = vpop.f32.mrf.mxu0 }
 0x220   :  { %10790 = vst [vmem:[#allocation14_spill] sm:$0xff] %v9174_v41  ;;  %v1434_v34 = vadd.f32 %v9083_v17, %v9026_v21 }
 0x221   :  { %v9085_v18 = vpop.f32.mrf.mxu1  ;;  %v9183_v22 = vpop.f32.mrf.mxu0 }
 0x222   :  { %10791 = vst [vmem:[#allocation15_spill] sm:$0xff] %v9183_v22  ;;  %v1429_v29 = vadd.f32 %v9085_v18, %v9032_v23 }
 0x223   :  { %v9089_v20 = vpop.f32.mrf.mxu1  ;;  %v9191_v36 = vpop.f32.mrf.mxu0 }
 0x224   :  { %v1444_v59 = vadd.f32 %v9089_v20, %v9035_v44 }
 0x225   :  { %v9096_v25 = vpop.f32.mrf.mxu1  ;;  %v9199_v10 = vpop.f32.mrf.mxu0 }
 0x226   :  { %v1439_v45 = vadd.f32 %v9096_v25, %v9037_v2 }
 0x227   :  { %v9099_v26 = vpop.f32.mrf.mxu1 }
 0x228   :  { %v1454_v21 = vadd.f32 %v9099_v26, %v9039_v27 }
 0x229   :  { %v9109_v30 = vpop.f32.mrf.mxu1 }
 0x22a   :  { %v1449_v44 = vadd.f32 %v9109_v30, %v9041_v39 }
 0x22b   :  { %v9118_v33 = vpop.f32.mrf.mxu1 }
 0x22c   :  { %v1464_v2 = vadd.f32 %v9118_v33, %v9043_v60 }
 0x22d   :  { %v9127_v37 = vpop.f32.mrf.mxu1 }
 0x22e   :  { %v1459_v27 = vadd.f32 %v9127_v37, %v9045_v62 }
 0x22f   :  { %v7081_v40 = vpop.f32.mrf.mxu1 }
 0x230   :  { %v9136_v42 = vadd.f32 %v7081_v40, %v7049_v48 }
 0x231   :  { %v9147_v47 = vpop.f32.mrf.mxu1 }
 0x233   :  { %v7084_v53 = vpop.f32.mrf.mxu1 }
 0x234   :  { %v1484_v50 = vadd.f32 %v7084_v53, %v9053_v12  ;;  %v9209_v53 = vpop.f32.mrf.mxu0 }
 0x235   :  { %v1478_v57 = vpop.f32.mrf.mxu1 }
 0x236   :  { %v9219_v58 = vpop.f32.mrf.mxu0  ;;  %v1479_v37 = vadd.f32 %v1478_v57, %v9060_v4 }
 0x237   :  { %v7087_v48 = vpop.f32.mrf.mxu1 }
 0x238   :  { %v1494_v12 = vadd.f32 %v7087_v48, %v9065_v6  ;;  %v9227_v39 = vpop.f32.mrf.mxu0 }
 0x239   :  { %v1488_v3 = vpop.f32.mrf.mxu1 }
 0x23b   :  { %v7098_v28 = vpop.f32.mrf.mxu1 }
 0x23c   :  { %v9185_v14 = vadd.f32 %v7098_v28, %v1424_v7 }
 0x23d   :  { %v9187_v31 = vpop.f32.mrf.mxu1 }
 0x23f   :  { %v7101_v6 = vpop.f32.mrf.mxu1 }
 0x240   :  { %v9193_v38 = vadd.f32 %v7101_v6, %v1434_v34  ;;  %v1469_v34 = vadd.f32 %v9147_v47, %v9049_v54  ;;  %v1489_v54 = vadd.f32 %v1488_v3, %v9072_v9 }
 0x241   :  { %v9195_v40 = vpop.f32.mrf.mxu1 }
 0x243   :  { %v7104_v43 = vpop.f32.mrf.mxu1 }
 0x244   :  { %v9203_v49 = vadd.f32 %v7104_v43, %v1444_v59  ;;  %v9236_v59 = vpop.f32.mrf.mxu0 }
 0x245   :  { %v1652_v52 = vpop.f32.mrf.mxu1 }
 0x246   :  { %v9207_v17 = vadd.f32 %v1652_v52, %v1439_v45 }
 0x247   :  { %v7107_v55 = vpop.f32.mrf.mxu1 }
 0x248   :  { %v9213_v20 = vadd.f32 %v7107_v55, %v1454_v21  ;;  %v9243_v21 = vpop.f32.mrf.mxu0 }
 0x249   :  { %v1662_v35 = vpop.f32.mrf.mxu1  ;;  %10794 = vst [vmem:[#allocation18_spill] sm:$0xff] %v9243_v21 }
 0x24a   :  { %v9217_v25 = vadd.f32 %v1662_v35, %v1449_v44  ;;  %v9250_v35 = vpop.f32.mrf.mxu0 }
 0x24b   :  { %v7110_v48 = vpop.f32.mrf.mxu1  ;;  %10797 = vst [vmem:[#allocation21_spill] sm:$0xff] %v9250_v35 }
 0x24c   :  { %v9223_v26 = vadd.f32 %v7110_v48, %v1464_v2  ;;  %v9252_v4 = vpop.f32.mrf.mxu0 }
 0x24d   :  { %v1672_v7 = vpop.f32.mrf.mxu1  ;;  %10798 = vst [vmem:[#allocation22_spill] sm:$0xff] %v9252_v4 }
 0x24e   :  { %v9225_v28 = vadd.f32 %v1672_v7, %v1459_v27  ;;  %v9254_v27 = vpop.f32.mrf.mxu0 }
 0x24f   :  { %v7113_v30 = vpop.f32.mrf.mxu1  ;;  %10799 = vst [vmem:[#allocation23_spill] sm:$0xff] %v9254_v27 }
 0x250   :  { %v9232_v60 = vadd.f32 %v7113_v30, %v9136_v42 }
 0x251   :  { %v1682_v33 = vpop.f32.mrf.mxu1 }
 0x252   :  { %v9234_v6 = vadd.f32 %v1682_v33, %v1469_v34  ;;  %v9256_v34 = vpop.f32.mrf.mxu0 }
 0x253   :  { %v7116_v62 = vpop.f32.mrf.mxu1  ;;  %10800 = vst [vmem:[#allocation24_spill] sm:$0xff] %v9256_v34 }
 0x254   :  { %v9239_v43 = vadd.f32 %v7116_v62, %v1484_v50  ;;  %v9258_v3 = vpop.f32.mrf.mxu0 }
 0x255   :  { %v1692_v45 = vpop.f32.mrf.mxu1  ;;  %10801 = vst [vmem:[#allocation25_spill] sm:$0xff] %v9258_v3 }
 0x256   :  { %10792 = vst [vmem:[#allocation16_spill] sm:$0xff] %v9239_v43  ;;  %v9241_v52 = vadd.f32 %v1692_v45, %v1479_v37  ;;  %v9264_v37 = vpop.f32.mrf.mxu0 }
 0x257   :  { %v7119_v55 = vpop.f32.mrf.mxu1  ;;  %10802 = vst [vmem:[#allocation26_spill] sm:$0xff] %v9264_v37 }
 0x258   :  { %10793 = vst [vmem:[#allocation17_spill] sm:$0xff] %v9241_v52  ;;  %v9246_v42 = vadd.f32 %v7119_v55, %v1494_v12 }
 0x259   :  { %v1702_v47 = vpop.f32.mrf.mxu1 }
 0x25a   :  { %10795 = vst [vmem:[#allocation19_spill] sm:$0xff] %v9246_v42  ;;  %v9248_v44 = vadd.f32 %v1702_v47, %v1489_v54  ;;  %v9270_v54 = vpop.f32.mrf.mxu0 }
 0x25b   :  { %v7130_v2 = vpop.f32.mrf.mxu1  ;;  %10804 = vst [vmem:[#allocation28_spill] sm:$0xff] %v9270_v54 }
 0x25c   :  { %10796 = vst [vmem:[#allocation20_spill] sm:$0xff] %v9248_v44  ;;  %v9276_v22 = vpop.f32.mrf.mxu0  ;;  %v1942_v43 = vadd.f32 %v7130_v2, %v9185_v14 }
 0x25d   :  { %v1862_v48 = vpop.f32.mrf.mxu1  ;;  %10807 = vst [vmem:[#allocation31_spill] sm:$0xff] %v9276_v22 }
 0x25e   :  { %v9282_v34 = vpop.f32.mrf.mxu0 }
 0x25f   :  { %v7133_v50 = vpop.f32.mrf.mxu1  ;;  %10810 = vst [vmem:[#allocation34_spill] sm:$0xff] %v9282_v34  ;;  %v1419_v34 = vadd.f32 %v9079_v15, %v9024_v61  ;;  %v1713_v61 = vadd.f32 %v9195_v40, %v1429_v29 }
 0x260   :  { %v7290_v44 = vpop.f32.mrf.mxu0  ;;  %v1944_v15 = vadd.f32 %v7133_v50, %v9193_v38 }
 0x261   :  { %v1872_v57 = vpop.f32.mrf.mxu1 }
 0x262   :  { %v3013_v42 = vpop.f32.mrf.mxu0 }
 0x263   :  { %v7136_v7 = vpop.f32.mrf.mxu1 }
 0x264   :  { %v9284_v13 = vpop.f32.mrf.mxu0  ;;  %v1946_v23 = vadd.f32 %v7136_v7, %v9203_v49 }
 0x265   :  { %v1882_v30 = vpop.f32.mrf.mxu1 }
 0x266   :  { %v9288_v22 = vpop.f32.mrf.mxu0  ;;  %v1945_v29 = vadd.f32 %v1882_v30, %v9207_v17  ;;  %v2176_v49 = vadd.f32 %v9070_v8, %v1946_v23 }
 0x267   :  { %v7139_v9 = vpop.f32.mrf.mxu1 }
 0x268   :  { %v9296_v35 = vpop.f32.mrf.mxu0 }
 0x269   :  { %v1892_v12 = vpop.f32.mrf.mxu1  ;;  %10813 = vst [vmem:[#allocation37_spill] sm:$0xff] %v9296_v35 }
 0x26a   :  { %v1947_v17 = vadd.f32 %v1892_v12, %v9217_v25 }
 0x26b   :  { %v9260_v33 = vpop.f32.mrf.mxu1 }
 0x26d   :  { %v9262_v62 = vpop.f32.mrf.mxu1 }
 0x26f   :  { %v9266_v45 = vpop.f32.mrf.mxu1 }
 0x271   :  { %v9268_v55 = vpop.f32.mrf.mxu1 }
 0x272   :  { %10803 = vst [vmem:[#allocation27_spill] sm:$0xff] %v9268_v55 }
 0x273   :  { %v9272_v47 = vpop.f32.mrf.mxu1 }
 0x274   :  { %10805 = vst [vmem:[#allocation29_spill] sm:$0xff] %v9272_v47  ;;  %v1711_v47 = vadd.f32 %v9187_v31, %v1419_v34  ;;  %v1943_v31 = vadd.f32 %v1872_v57, %v1713_v61  ;;  %v2177_v61 = vadd.f32 %v9087_v19, %v1947_v17  ;;  %v10823_v17 = vld [vmem:[#allocation10_spill] sm:$0xff] }
 0x275   :  { %v9274_v51 = vpop.f32.mrf.mxu1 }
 0x276   :  { %10806 = vst [vmem:[#allocation30_spill] sm:$0xff] %v9274_v51  ;;  %v1941_v55 = vadd.f32 %v1862_v48, %v1711_v47  ;;  %v2174_v47 = vadd.f32 %v9055_v1, %v1944_v15  ;;  %v2173_v40 = vadd.f32 %v9063_v5, %v1943_v31  ;;  %v9337_v5 = vld [vmem:[%s10718_s5] ss:$0 sm:$0xff] }
 0x277   :  { %v9278_v41 = vpop.f32.mrf.mxu1 }
 0x278   :  { %10808 = vst [vmem:[#allocation32_spill] sm:$0xff] %v9278_v41  ;;  %v2171_v2 = vadd.f32 %v9051_v0, %v1941_v55  ;;  %v1948_v0 = vadd.f32 %v7139_v9, %v9213_v20 }
 0x279   :  { %v9280_v3 = vpop.f32.mrf.mxu1  ;;  %v10815_v23 = vld [vmem:[#allocation27_spill] sm:$0xff] }
 0x27a   :  { %10809 = vst [vmem:[#allocation33_spill] sm:$0xff] %v9280_v3  ;;  %v2178_v25 = vadd.f32 %v9081_v16, %v1948_v0 }
 0x27b   :  { %v7194_v56 = vpop.f32.mrf.mxu1 }
 0x27d   :  { %v2322_v37 = vpop.f32.mrf.mxu1 }
 0x27e   :  { %v2401_v48 = vadd.f32 %v2322_v37, %v2171_v2 }
 0x27f   :  { %v7197_v27 = vpop.f32.mrf.mxu1 }
 0x280   :  { %v2632_v1 = vadd.f32 %v9199_v10, %v2401_v48  ;;  %v1951_v48 = vadd.f32 %v10815_v23, %v9234_v6 }
 0x281   :  { %v2332_v46 = vpop.f32.mrf.mxu1 }
 0x282   :  { %v2403_v50 = vadd.f32 %v2332_v46, %v2173_v40  ;;  %v1950_v46 = vadd.f32 %v9260_v33, %v9223_v26 }
 0x283   :  { %v7200_v4 = vpop.f32.mrf.mxu1 }
 0x284   :  { %v2406_v7 = vadd.f32 %v7200_v4, %v2176_v49  ;;  %v2634_v55 = vadd.f32 %v9219_v58, %v2403_v50  ;;  %v1952_v58 = vadd.f32 %v9266_v45, %v9232_v60  ;;  %v10817_v45 = vld [vmem:[#allocation9_spill] sm:$0xff] }
 0x285   :  { %v2342_v54 = vpop.f32.mrf.mxu1  ;;  %v10821_v50 = vld [vmem:[#allocation29_spill] sm:$0xff] }
 0x286   :  { %v2637_v26 = vadd.f32 %v9227_v39, %v2406_v7  ;;  %v2182_v7 = vadd.f32 %v10823_v17, %v1952_v58  ;;  %v10831_v58 = vld [vmem:[#allocation32_spill] sm:$0xff]  ;;  %v10839_v17 = vld [vmem:[#allocation25_spill] sm:$0xff] }
 0x287   :  { %v7203_v52 = vpop.f32.mrf.mxu1 }
 0x289   :  { %v9286_v51 = vpop.f32.mrf.mxu1 }
 0x28b   :  { %v9290_v41 = vpop.f32.mrf.mxu1 }
 0x28c   :  { %10811 = vst [vmem:[#allocation35_spill] sm:$0xff] %v9290_v41  ;;  %v9306_v41 = vpop.f32.mrf.mxu0 }
 0x28d   :  { %v9292_v3 = vpop.f32.mrf.mxu1 }
 0x28e   :  { %10812 = vst [vmem:[#allocation36_spill] sm:$0xff] %v9292_v3  ;;  %v9316_v34 = vpop.f32.mrf.mxu0 }
 0x28f   :  { %v9298_v32 = vpop.f32.mrf.mxu1 }
 0x290   :  { %10814 = vst [vmem:[#allocation38_spill] sm:$0xff] %v9298_v32  ;;  %v2172_v32 = vadd.f32 %v9047_v63, %v1942_v43  ;;  %v2404_v63 = vadd.f32 %v7197_v27, %v2174_v47  ;;  %v2175_v27 = vadd.f32 %v9077_v11, %v1945_v29 }
 0x291   :  { %v9302_v21 = vpop.f32.mrf.mxu1 }
 0x292   :  { %v2402_v14 = vadd.f32 %v7194_v56, %v2172_v32  ;;  %v9327_v56 = vpop.f32.mrf.mxu0  ;;  %v2635_v8 = vadd.f32 %v9209_v53, %v2404_v63  ;;  %v2405_v10 = vadd.f32 %v2342_v54, %v2175_v27  ;;  %v2408_v53 = vadd.f32 %v7203_v52, %v2178_v25  ;;  %v10825_v25 = vld [vmem:[#allocation17_spill] sm:$0xff] }
 0x293   :  { %v9308_v3 = vpop.f32.mrf.mxu1  ;;  %v10816_v47 = vld [vmem:[#allocation35_spill] sm:$0xff] }
 0x294   :  { %v2633_v32 = vadd.f32 %v9191_v36, %v2402_v14  ;;  %v9340_v9 = vpop.f32.mrf.mxu0  ;;  %v2636_v19 = vadd.f32 %v9236_v59, %v2405_v10 }
 0x295   :  { %v9313_v35 = vpop.f32.mrf.mxu1 }
 0x296   :  { %v9353_v14 = vpop.f32.mrf.mxu0 }
 0x297   :  { %v9319_v18 = vpop.f32.mrf.mxu1 }
 0x299   :  { %v9323_v38 = vpop.f32.mrf.mxu1 }
 0x29b   :  { %v7258_v43 = vpop.f32.mrf.mxu1 }
 0x29c   :  { %v2863_v57 = vadd.f32 %v7258_v43, %v2633_v32  ;;  %v10819_v32 = vld [vmem:[#allocation37_spill] sm:$0xff]  ;;  %v10820_v43 = vld [vmem:[#allocation16_spill] sm:$0xff] }
 0x29d   :  { %v2783_v36 = vpop.f32.mrf.mxu1  ;;  %v1954_v6 = vadd.f32 %v10821_v50, %v10820_v43 }
 0x29e   :  { %v3093_v30 = vadd.f32 %v7290_v44, %v2863_v57  ;;  %v2862_v20 = vadd.f32 %v2783_v36, %v2632_v1  ;;  %v1949_v44 = vadd.f32 %v9262_v62, %v9225_v28  ;;  %v2180_v28 = vadd.f32 %v9094_v24, %v1950_v46  ;;  %v10818_v24 = vld [vmem:[#allocation18_spill] sm:$0xff]  ;;  %v10822_v57 = vld [vmem:[#allocation36_spill] sm:$0xff]  ;;  %v10824_v36 = vld [vmem:[#allocation21_spill] sm:$0xff] }
 0x29f   :  { %v7261_v11 = vpop.f32.mrf.mxu1  ;;  %v2639_v63 = vadd.f32 %v10818_v24, %v2408_v53 }
 0x2a0   :  { %v3116_v4 = vadd.f32 %v9337_v5, %v3093_v30  ;;  %v3092_v12 = vadd.f32 %v3013_v42, %v2862_v20  ;;  %v2865_v37 = vadd.f32 %v7261_v11, %v2635_v8  ;;  %v2407_v42 = vadd.f32 %v9286_v51, %v2177_v61  ;;  %v10826_v11 = vld [vmem:[#allocation30_spill] sm:$0xff] }
 0x2a1   :  { %v2793_v15 = vpop.f32.mrf.mxu1  ;;  %v2410_v60 = vadd.f32 %v10816_v47, %v2180_v28  ;;  %v2179_v51 = vadd.f32 %v10817_v45, %v1949_v44  ;;  %v10829_v61 = vld [vmem:[#allocation22_spill] sm:$0xff]  ;;  %v10834_v47 = vld [vmem:[#allocation20_spill] sm:$0xff] }
 0x2a2   :  { %v3132_v33 = vmax.f32 %v3116_v4, 0.0  ;;  %v3115_v16 = vadd.f32 %v9337_v5, %v3092_v12  ;;  %v3095_v54 = vadd.f32 %v9284_v13, %v2865_v37  ;;  %v2864_v31 = vadd.f32 %v2793_v15, %v2634_v55  ;;  %v10827_v12 = vld [vmem:[#allocation38_spill] sm:$0xff]  ;;  %v10828_v55 = vld [vmem:[#allocation11_spill] sm:$0xff] }
 0x2a3   :  { %v7264_v52 = vpop.f32.mrf.mxu1  ;;  %v2409_v1 = vadd.f32 %v10822_v57, %v2179_v51  ;;  %v2638_v30 = vadd.f32 %v10824_v36, %v2407_v42  ;;  %v1953_v4 = vadd.f32 %v10826_v11, %v10825_v25  ;;  %v2412_v37 = vadd.f32 %v10827_v12, %v2182_v7  ;;  %v10838_v57 = vld [vmem:[#allocation14_spill] sm:$0xff] }
 0x2a4   :  { %3149 = vst.msk [vmem:[#allocation4 + $0x8] sm:$0xff] %vm3147_vm5, %v3132_v33  ;;  %v3131_v39 = vmax.f32 %v3115_v16, 0.0  ;;  %v3118_v62 = vadd.f32 %v9337_v5, %v3095_v54  ;;  %v3094_v13 = vadd.f32 %v9288_v22, %v2864_v31  ;;  %v2867_v2 = vadd.f32 %v7264_v52, %v2637_v26  ;;  %v9371_v22 = vpop.f32.mrf.mxu0  ;;  %v10830_v31 = vld [vmem:[#allocation19_spill] sm:$0xff]  ;;  %v10832_v52 = vld [vmem:[#allocation12_spill] sm:$0xff] }
 0x2a5   :  { %v2803_v29 = vpop.f32.mrf.mxu1  ;;  %v2181_v44 = vadd.f32 %v10828_v55, %v1951_v48  ;;  %v2641_v15 = vadd.f32 %v10829_v61, %v2410_v60  ;;  %v1956_v42 = vadd.f32 %v10831_v58, %v10830_v31  ;;  %v10835_v60 = vld [vmem:[#allocation33_spill] sm:$0xff]  ;;  %v9433_v58 = vld [vmem:[%s10719_s6 + $0x70] sm:$0xff] }
 0x2a6   :  { %3148 = vst.msk [vmem:[#allocation4] sm:$0xff] %vm3147_vm5, %v3131_v39  ;;  %v3134_v59 = vmax.f32 %v3118_v62, 0.0  ;;  %v3117_v40 = vadd.f32 %v9337_v5, %v3094_v13  ;;  %v3097_v0 = vadd.f32 %v10819_v32, %v2867_v2  ;;  %v2866_v49 = vadd.f32 %v2803_v29, %v2636_v19  ;;  %v10833_v62 = vld [vmem:[#allocation23_spill] sm:$0xff]  ;;  %v10836_v29 = vld [vmem:[#allocation13_spill] sm:$0xff] }
 0x2a7   :  { %v7267_v27 = vpop.f32.mrf.mxu1  ;;  %v2411_v28 = vadd.f32 %v9302_v21, %v2181_v44  ;;  %v2184_v19 = vadd.f32 %v10832_v52, %v1954_v6  ;;  %v2640_v13 = vadd.f32 %v10833_v62, %v2409_v1  ;;  %v1955_v45 = vadd.f32 %v10835_v60, %v10834_v47  ;;  %v10843_v52 = vld [vmem:[#allocation31_spill] sm:$0xff]  ;;  %v10845_v60 = vld [vmem:[#allocation34_spill] sm:$0xff] }
 0x2a8   :  { %3151 = vst.msk [vmem:[#allocation4 + $0x18] sm:$0xff] %vm3147_vm5, %v3134_v59  ;;  %v3133_v20 = vmax.f32 %v3117_v40, 0.0  ;;  %v3120_v8 = vadd.f32 %v9337_v5, %v3097_v0  ;;  %v3096_v46 = vadd.f32 %v9306_v41, %v2866_v49  ;;  %v2869_v10 = vadd.f32 %v7267_v27, %v2639_v63  ;;  %v3063_v41 = vpop.f32.mrf.mxu0  ;;  %v10837_v63 = vld [vmem:[#allocation24_spill] sm:$0xff]  ;;  %v9457_v47 = vld [vmem:[%s10719_s6 + $0x130] sm:$0xff] }
 0x2a9   :  { %v2813_v53 = vpop.f32.mrf.mxu1  ;;  %v2414_v51 = vadd.f32 %v9308_v3, %v2184_v19  ;;  %v2183_v21 = vadd.f32 %v10836_v29, %v1953_v4  ;;  %v2643_v59 = vadd.f32 %v10837_v63, %v2412_v37  ;;  %v2186_v3 = vadd.f32 %v10838_v57, %v1956_v42 }
 0x2aa   :  { %3150 = vst.msk [vmem:[#allocation4 + $0x10] sm:$0xff] %vm3147_vm5, %v3133_v20  ;;  %v3136_v26 = vmax.f32 %v3120_v8, 0.0  ;;  %v3119_v33 = vadd.f32 %v9337_v5, %v3096_v46  ;;  %v3099_v16 = vadd.f32 %v9316_v34, %v2869_v10  ;;  %v2868_v54 = vadd.f32 %v2813_v53, %v2638_v30  ;;  %v7308_v50 = vpop.f32.mrf.mxu0  ;;  %v10840_v46 = vld [vmem:[#allocation15_spill] sm:$0xff] }
 0x2ab   :  { %v7270_v39 = vpop.f32.mrf.mxu1  ;;  %v2413_v6 = vadd.f32 %v9313_v35, %v2183_v21  ;;  %v2642_v7 = vadd.f32 %v10839_v17, %v2411_v28  ;;  %v2185_v10 = vadd.f32 %v10840_v46, %v1955_v45  ;;  %v10841_v35 = vld [vmem:[#allocation26_spill] sm:$0xff]  ;;  %v9439_v28 = vld [vmem:[%s10719_s6 + $0x138] sm:$0xff] }
 0x2ac   :  { %3153 = vst.msk [vmem:[#allocation4 + $0x28] sm:$0xff] %vm3147_vm5, %v3136_v26  ;;  %v3135_v2 = vmax.f32 %v3119_v33, 0.0  ;;  %v3122_v23 = vadd.f32 %v9337_v5, %v3099_v16  ;;  %v3098_v48 = vadd.f32 %v9327_v56, %v2868_v54  ;;  %v2871_v34 = vadd.f32 %v7270_v39, %v2641_v15  ;;  %v3073_v53 = vpop.f32.mrf.mxu0  ;;  %v10842_v26 = vld [vmem:[#allocation28_spill] sm:$0xff]  ;;  %v9522_v46 = vld [vmem:[%s10719_s6 + $0x110] sm:$0xff] }
 0x2ad   :  { %v2823_v24 = vpop.f32.mrf.mxu1  ;;  %v3164_v40 = vld [vmem:[#allocation4] ss:$2 sm:$0xff]  ;;  %v3180_v32 = vld [vmem:[#allocation4 + $0x1] ss:$2 sm:$0xff]  ;;  %v2645_v11 = vadd.f32 %v10841_v35, %v2414_v51  ;;  %v2644_v33 = vadd.f32 %v10842_v26, %v2413_v6 }
 0x2ae   :  { %3152 = vst.msk [vmem:[#allocation4 + $0x20] sm:$0xff] %vm3147_vm5, %v3135_v2  ;;  %v3138_v0 = vmax.f32 %v3122_v23, 0.0  ;;  %v3121_v49 = vadd.f32 %v9337_v5, %v3098_v48  ;;  %v3101_v56 = vadd.f32 %v9340_v9, %v2871_v34  ;;  %v2870_v43 = vadd.f32 %v2823_v24, %v2640_v13  ;;  %v9452_v34 = vld [vmem:[%s10719_s6 + $0x68] sm:$0xff]  ;;  %v9490_v6 = vld [vmem:[%s10719_s6 + $0x120] sm:$0xff] }
 0x2af   :  { %v7273_v1 = vpop.f32.mrf.mxu1  ;;  %v3195_v27 = vmax.f32 %v3164_v40, %v3180_v32  ;;  %v2416_v9 = vadd.f32 %v9319_v18, %v2186_v3  ;;  %v9423_v18 = vld [vmem:[%s10719_s6 + $0x78] sm:$0xff]  ;;  %v10844_v23 = vmov 0.0   ;;  %v9474_v40 = vld [vmem:[%s10719_s6 + $0x128] sm:$0xff] }
 0x2b0   :  { %3155 = vst.msk [vmem:[#allocation4 + $0x38] sm:$0xff] %vm3147_vm5, %v3138_v0  ;;  %v3137_v36 = vmax.f32 %v3121_v49, 0.0  ;;  %v3124_v30 = vadd.f32 %v9337_v5, %v3101_v56  ;;  %v3100_v20 = vadd.f32 %v9353_v14, %v2870_v43  ;;  %v2873_v8 = vadd.f32 %v7273_v1, %v2643_v59  ;;  %v9469_v59 = vld [vmem:[%s10719_s6 + $0x60] sm:$0xff]  ;;  %v9603_v26 = vld [vmem:[%s10719_s6 + $0x1a8] sm:$0xff] }
 0x2b1   :  { %v2833_v25 = vpop.f32.mrf.mxu1  ;;  %v3211_v4 = vrot.slane %v3195_v27, 4  ;;  %v2415_v14 = vadd.f32 %v9323_v38, %v2185_v10  ;;  %v2647_v19 = vadd.f32 %v10843_v52, %v2416_v9  ;;  %v3166_v57 = vld [vmem:[#allocation4 + $0x10] ss:$2 sm:$0xff]  ;;  %v3182_v3 = vld [vmem:[#allocation4 + $0x11] ss:$2 sm:$0xff]  ;;  %v9517_v9 = vld [vmem:[%s10719_s6 + $0x48] sm:$0xff] }
 0x2b2   :  { %3154 = vst.msk [vmem:[#allocation4 + $0x30] sm:$0xff] %vm3147_vm5, %v3137_v36  ;;  %v3140_v12 = vmax.f32 %v3124_v30, 0.0  ;;  %v3123_v37 = vadd.f32 %v9337_v5, %v3100_v20  ;;  %v3103_v55 = vadd.f32 %v9371_v22, %v2873_v8  ;;  %v2872_v44 = vadd.f32 %v2833_v25, %v2642_v7  ;;  %v9506_v36 = vld [vmem:[%s10719_s6 + $0x118] sm:$0xff]  ;;  %v9532_v10 = vld [vmem:[%s10719_s6 + $0x40] sm:$0xff]  ;;  %v9537_v25 = vld [vmem:[%s10719_s6 + $0x108] sm:$0xff] }
 0x2b3   :  { %v7276_v61 = vpop.f32.mrf.mxu1  ;;  %v9418_v15 = vmax.f32 %v3195_v27, %v3211_v4  ;;  %v2646_v45 = vadd.f32 %v10845_v60, %v2415_v14  ;;  %v9501_v27 = vld [vmem:[%s10719_s6 + $0x50] sm:$0xff]  ;;  %v3196_v8 = vmax.f32 %v3166_v57, %v3182_v3  ;;  %v9548_v4 = vld [vmem:[%s10719_s6 + $0xf8] sm:$0xff]  ;;  %v9659_v52 = vld [vmem:[%s10719_s6 + $0x188] sm:$0xff] }
 0x2b4   :  { %3157 = vst.msk [vmem:[#allocation4 + $0x48] sm:$0xff] %vm3147_vm5, %v3140_v12  ;;  %v3139_v16 = vmax.f32 %v3123_v37, 0.0  ;;  %v3126_v54 = vadd.f32 %v9337_v5, %v3103_v55  ;;  %v3102_v22 = vadd.f32 %v3063_v41, %v2872_v44  ;;  %v2875_v31 = vadd.f32 %v7276_v61, %v2645_v11  ;;  %v7311_v41 = vpop.f32.mrf.mxu0  ;;  %v9555_v12 = vld [vmem:[%s10719_s6 + $0x100] sm:$0xff]  ;;  %v9566_v55 = vld [vmem:[%s10719_s6 + $0xf0] sm:$0xff]  ;;  %v9574_v44 = vld [vmem:[%s10719_s6 + $0x1b8] sm:$0xff] }
 0x2b5   :  { %7329 = vmatmul.mubr.msk.f32.vlgmr.msra.gmra.mxu1 %vm3147_vm5, %v9418_v15  ;;  %v2843_v38 = vpop.f32.mrf.mxu1  ;;  %v3410_v42 = vrot.slane %v9418_v15, 2  ;;  %v3212_v35 = vrot.slane %v3196_v8, 4  ;;  %v3327_v11 = vrot.slane %v9418_v15, 1  ;;  %v9589_v14 = vld [vmem:[%s10719_s6 + $0x1b0] sm:$0xff]  ;;  %v9596_v61 = vld [vmem:[%s10719_s6 + $0xe0] sm:$0xff]  ;;  %v9779_v57 = vld [vmem:[%s10719_s6 + $0x208] sm:$0xff] }
 0x2b6   :  { %3156 = vst.msk [vmem:[#allocation4 + $0x40] sm:$0xff] %vm3147_vm5, %v3139_v16  ;;  %v3142_v39 = vmax.f32 %v3126_v54, 0.0  ;;  %v3125_v62 = vadd.f32 %v9337_v5, %v3102_v22  ;;  %v3105_v13 = vadd.f32 %v7308_v50, %v2875_v31  ;;  %7332 = vmatpush3.msra.mxu1 %v9423_v18  ;;  %v2874_v2 = vadd.f32 %v2843_v38, %v2644_v33  ;;  %v3083_v32 = vpop.f32.mrf.mxu0  ;;  %v9483_v50 = vld [vmem:[%s10719_s6 + $0x58] sm:$0xff]  ;;  %v9617_v16 = vld [vmem:[%s10719_s6 + $0x1a0] sm:$0xff]  ;;  %v9624_v54 = vld [vmem:[%s10719_s6 + $0xd0] sm:$0xff] }
 0x2b7   :  { %7347 = vmatprep.mubr.msk.f32.mxu1 %vm7987_vm4, %v10844_v23  ;;  %7333 = vmatprep.subr.mxu1 %v10844_v23  ;;  %v7279_v48 = vpop.f32.mrf.mxu1  ;;  %v9561_v37 = vmax.f32 %v3196_v8, %v3212_v35  ;;  %v9610_v33 = vld [vmem:[%s10719_s6 + $0xd8] sm:$0xff]  ;;  %v9638_v31 = vld [vmem:[%s10719_s6 + $0xc8] sm:$0xff]  ;;  %v9645_v38 = vld [vmem:[%s10719_s6 + $0x190] sm:$0xff] }
 0x2b8   :  { %7367 = vmatmul.mubr.msk.f32.vlgmr.msra.gmra.mxu0 %vm3147_vm5, %v3410_v42  ;;  %3159 = vst.msk [vmem:[#allocation4 + $0x58] sm:$0xff] %vm3147_vm5, %v3142_v39  ;;  %v3141_v51 = vmax.f32 %v3125_v62, 0.0  ;;  %v3128_v29 = vadd.f32 %v9337_v5, %v3105_v13  ;;  %v3104_v21 = vadd.f32 %v3073_v53, %v2874_v2  ;;  %7334 = vmatpush3.msra.mxu1 %v9433_v58  ;;  %v9582_v53 = vld [vmem:[%s10719_s6 + $0xe8] sm:$0xff]  ;;  %v9631_v22 = vld [vmem:[%s10719_s6 + $0x198] sm:$0xff]  ;;  %v9652_v42 = vld [vmem:[%s10719_s6 + $0xc0] sm:$0xff] }
 0x2b9   :  { %7389 = vmatpush3.msra.mxu0 %v9439_v28  ;;  %v2877_v24 = vadd.f32 %v7279_v48, %v2647_v19  ;;  %7335 = vmatprep.subr.mxu1 %v10844_v23  ;;  %v2853_v63 = vpop.f32.mrf.mxu1  ;;  %v3493_v19 = vrot.slane %v9418_v15, 3  ;;  %v9677_v39 = vld [vmem:[%s10719_s6 + $0x180] sm:$0xff]  ;;  %v3742_v15 = vrot.slane %v9561_v37, 2  ;;  %v9687_v62 = vld [vmem:[%s10719_s6 + $0x170] sm:$0xff]  ;;  %v9695_v13 = vld [vmem:[%s10719_s6 + $0x238] sm:$0xff] }
 0x2ba   :  { %7390 = vmatprep.subr.mxu0 %v10844_v23  ;;  %3158 = vst.msk [vmem:[#allocation4 + $0x50] sm:$0xff] %vm3147_vm5, %v3141_v51  ;;  %v3144_v0 = vmax.f32 %v3128_v29, 0.0  ;;  %v3127_v49 = vadd.f32 %v9337_v5, %v3104_v21  ;;  %7336 = vmatpush3.msra.mxu1 %v9452_v34  ;;  %v2876_v56 = vadd.f32 %v2853_v63, %v2646_v45  ;;  %v9702_v2 = vld [vmem:[%s10719_s6 + $0x168] sm:$0xff]  ;;  %v9709_v48 = vld [vmem:[%s10719_s6 + $0x230] sm:$0xff]  ;;  %v9716_v60 = vld [vmem:[%s10719_s6 + $0x160] sm:$0xff] }
 0x2bb   :  { %7391 = vmatpush3.msra.mxu0 %v9457_v47  ;;  %v3107_v43 = vadd.f32 %v7311_v41, %v2877_v24  ;;  %7337 = vmatprep.subr.mxu1 %v10844_v23  ;;  %v9669_v41 = vld [vmem:[%s10719_s6 + $0x178] sm:$0xff]  ;;  %v9723_v45 = vld [vmem:[%s10719_s6 + $0x228] sm:$0xff]  ;;  %v9737_v29 = vld [vmem:[%s10719_s6 + $0x220] sm:$0xff] }
 0x2bc   :  { %7392 = vmatprep.subr.mxu0 %v10844_v23  ;;  %3161 = vst.msk [vmem:[#allocation4 + $0x68] sm:$0xff] %vm3147_vm5, %v3144_v0  ;;  %v3143_v1 = vmax.f32 %v3127_v49, 0.0  ;;  %7338 = vmatpush3.msra.mxu1 %v9469_v59  ;;  %v3106_v7 = vadd.f32 %v3083_v32, %v2876_v56  ;;  %v9730_v51 = vld [vmem:[%s10719_s6 + $0x158] sm:$0xff]  ;;  %v3168_v21 = vld [vmem:[#allocation4 + $0x20] ss:$2 sm:$0xff]  ;;  %v9744_v63 = vld [vmem:[%s10719_s6 + $0x150] sm:$0xff] }
 0x2bd   :  { %v3130_v17 = vadd.f32 %v9337_v5, %v3107_v43  ;;  %7393 = vmatpush3.msra.mxu0 %v9474_v40  ;;  %7339 = vmatprep.subr.mxu1 %v10844_v23  ;;  %v3184_v24 = vld [vmem:[#allocation4 + $0x21] ss:$2 sm:$0xff]  ;;  %v9751_v32 = vld [vmem:[%s10719_s6 + $0x218] sm:$0xff]  ;;  %v9765_v56 = vld [vmem:[%s10719_s6 + $0x210] sm:$0xff] }
 0x2be   :  { %7394 = vmatprep.subr.mxu0 %v10844_v23  ;;  %3160 = vst.msk [vmem:[#allocation4 + $0x60] sm:$0xff] %vm3147_vm5, %v3143_v1  ;;  %v3129_v20 = vadd.f32 %v9337_v5, %v3106_v7  ;;  %7340 = vmatpush3.msra.mxu1 %v9483_v50  ;;  %v9758_v0 = vld [vmem:[%s10719_s6 + $0x148] sm:$0xff]  ;;  %v3197_v49 = vmax.f32 %v3168_v21, %v3184_v24  ;;  %v9772_v43 = vld [vmem:[%s10719_s6 + $0x140] sm:$0xff]  ;;  %v3659_v1 = vrot.slane %v9561_v37, 1  ;;  %v9816_v8 = vld [vmem:[%s10719_s6 + $0x2b8] sm:$0xff] }
 0x2bf   :  { %v3146_v30 = vmax.f32 %v3130_v17, 0.0  ;;  %7395 = vmatpush3.msra.mxu0 %v9490_v6  ;;  %7341 = vmatprep.subr.mxu1 %v10844_v23  ;;  %v9789_v17 = vld [vmem:[%s10719_s6 + $0x1f8] sm:$0xff]  ;;  %v9797_v7 = vld [vmem:[%s10719_s6 + $0x200] sm:$0xff]  ;;  %v9831_v35 = vld [vmem:[%s10719_s6 + $0x2b0] sm:$0xff] }
 0x2c0   :  { %7396 = vmatprep.subr.mxu0 %v10844_v23  ;;  %v3145_v5 = vmax.f32 %v3129_v20, 0.0  ;;  %7342 = vmatpush3.msra.mxu1 %v9501_v27  ;;  %v3213_v3 = vrot.slane %v3197_v49, 4  ;;  %v9808_v20 = vld [vmem:[%s10719_s6 + $0x1f0] sm:$0xff]  ;;  %v9859_v21 = vld [vmem:[%s10719_s6 + $0x2a0] sm:$0xff] }
 0x2c1   :  { %3163 = vst.msk [vmem:[#allocation4 + $0x78] sm:$0xff] %vm3147_vm5, %v3146_v30  ;;  %7397 = vmatpush3.msra.mxu0 %v9506_v36  ;;  %7343 = vmatprep.subr.mxu1 %v10844_v23  ;;  %10848 = vst [vmem:[#allocation9_spill] sm:$0xff] %v9859_v21  ;;  %v9866_v24 = vld [vmem:[%s10719_s6 + $0x1d0] sm:$0xff] }
 0x2c2   :  { %7398 = vmatprep.subr.mxu0 %v10844_v23  ;;  %3162 = vst.msk [vmem:[#allocation4 + $0x70] sm:$0xff] %vm3147_vm5, %v3145_v5  ;;  %7344 = vmatpush3.msra.mxu1 %v9517_v9  ;;  %v9803_v30 = vmax.f32 %v3197_v49, %v3213_v3  ;;  %v9824_v5 = vld [vmem:[%s10719_s6 + $0x1e8] sm:$0xff]  ;;  %10849 = vst [vmem:[#allocation18_spill] sm:$0xff] %v9866_v24  ;;  %v9873_v49 = vld [vmem:[%s10719_s6 + $0x298] sm:$0xff] }
 0x2c3   :  { %7399 = vmatpush3.msra.mxu0 %v9522_v46  ;;  %7345 = vmatprep.subr.mxu1 %v10844_v23  ;;  %10850 = vst [vmem:[#allocation37_spill] sm:$0xff] %v9873_v49  ;;  %v9880_v3 = vld [vmem:[%s10719_s6 + $0x1c8] sm:$0xff] }
 0x2c4   :  { %7400 = vmatprep.subr.mxu0 %v10844_v23  ;;  %7346 = vmatpush3.msra.mxu1 %v9532_v10  ;;  %10851 = vst [vmem:[#allocation16_spill] sm:$0xff] %v9880_v3 }
 0x2c5   :  { %7401 = vmatpush3.msra.mxu0 %v9537_v25  ;;  %7348 = vmatmul.mubr.msk.f32.vlgmr.msra.gmra.mxu1 %vm3147_vm5, %v3327_v11  ;;  %v9838_v11 = vld [vmem:[%s10719_s6 + $0x1e0] sm:$0xff] }
 0x2c6   :  { %7369 = vmatprep.subr.mxu1 %v10844_v23  ;;  %7402 = vmatprep.subr.mxu0 %v10844_v23 }
 0x2c7   :  { %7370 = vmatpush3.msra.mxu1 %v9548_v4  ;;  %7403 = vmatpush3.msra.mxu0 %v9555_v12 }
 0x2c8   :  { %7404 = vmatprep.mubr.msk.f32.mxu0 %vm7987_vm4, %v10844_v23  ;;  %7371 = vmatprep.subr.mxu1 %v10844_v23 }
 0x2c9   :  { %7405 = vmatmul.mubr.msk.f32.vlgmr.msra.gmra.mxu0 %vm3147_vm5, %v9561_v37  ;;  %7426 = vmatprep.subr.mxu0 %v10844_v23 }
 0x2ca   :  { %7372 = vmatpush3.msra.mxu1 %v9566_v55  ;;  %7427 = vmatpush3.msra.mxu0 %v9574_v44 }
 0x2cb   :  { %7373 = vmatprep.subr.mxu1 %v10844_v23  ;;  %7428 = vmatprep.subr.mxu0 %v10844_v23 }
 0x2cc   :  { %7374 = vmatpush3.msra.mxu1 %v9582_v53  ;;  %7429 = vmatpush3.msra.mxu0 %v9589_v14 }
 0x2cd   :  { %7375 = vmatprep.subr.mxu1 %v10844_v23  ;;  %7430 = vmatprep.subr.mxu0 %v10844_v23 }
 0x2ce   :  { %7376 = vmatpush3.msra.mxu1 %v9596_v61  ;;  %7431 = vmatpush3.msra.mxu0 %v9603_v26 }
 0x2cf   :  { %7377 = vmatprep.subr.mxu1 %v10844_v23  ;;  %7432 = vmatprep.subr.mxu0 %v10844_v23 }
 0x2d0   :  { %7378 = vmatpush3.msra.mxu1 %v9610_v33  ;;  %7433 = vmatpush3.msra.mxu0 %v9617_v16 }
 0x2d1   :  { %7379 = vmatprep.subr.mxu1 %v10844_v23  ;;  %7434 = vmatprep.subr.mxu0 %v10844_v23 }
 0x2d2   :  { %7380 = vmatpush3.msra.mxu1 %v9624_v54  ;;  %7435 = vmatpush3.msra.mxu0 %v9631_v22 }
 0x2d3   :  { %7381 = vmatprep.subr.mxu1 %v10844_v23  ;;  %7436 = vmatprep.subr.mxu0 %v10844_v23 }
 0x2d4   :  { %7382 = vmatpush3.msra.mxu1 %v9638_v31  ;;  %7437 = vmatpush3.msra.mxu0 %v9645_v38 }
 0x2d5   :  { %7383 = vmatprep.subr.mxu1 %v10844_v23  ;;  %7438 = vmatprep.subr.mxu0 %v10844_v23 }
 0x2d6   :  { %7384 = vmatpush3.msra.mxu1 %v9652_v42  ;;  %7385 = vmatprep.mubr.msk.f32.mxu1 %vm7987_vm4, %v10844_v23 }
 0x2d7   :  { %7439 = vmatpush3.msra.mxu0 %v9659_v52  ;;  %7386 = vmatmul.mubr.msk.f32.vlgmr.msra.gmra.mxu1 %vm3147_vm5, %v3493_v19  ;;  %v9845_v19 = vld [vmem:[%s10719_s6 + $0x2a8] sm:$0xff] }
 0x2d8   :  { %7407 = vmatprep.subr.mxu1 %v10844_v23  ;;  %7440 = vmatprep.subr.mxu0 %v10844_v23  ;;  %10846 = vst [vmem:[#allocation27_spill] sm:$0xff] %v9845_v19 }
 0x2d9   :  { %7408 = vmatpush3.msra.mxu1 %v9669_v41  ;;  %7441 = vmatpush3.msra.mxu0 %v9677_v39 }
 0x2da   :  { %7442 = vmatprep.mubr.msk.f32.mxu0 %vm7987_vm4, %v10844_v23  ;;  %7409 = vmatprep.subr.mxu1 %v10844_v23 }
 0x2db   :  { %7443 = vmatmul.mubr.msk.f32.vlgmr.msra.gmra.mxu0 %vm3147_vm5, %v3742_v15  ;;  %7464 = vmatprep.subr.mxu0 %v10844_v23  ;;  %v9852_v15 = vld [vmem:[%s10719_s6 + $0x1d8] sm:$0xff] }
 0x2dc   :  { %7410 = vmatpush3.msra.mxu1 %v9687_v62  ;;  %7465 = vmatpush3.msra.mxu0 %v9695_v13  ;;  %10847 = vst [vmem:[#allocation35_spill] sm:$0xff] %v9852_v15 }
 0x2dd   :  { %7411 = vmatprep.subr.mxu1 %v10844_v23  ;;  %7466 = vmatprep.subr.mxu0 %v10844_v23 }
 0x2de   :  { %7412 = vmatpush3.msra.mxu1 %v9702_v2  ;;  %7467 = vmatpush3.msra.mxu0 %v9709_v48 }
 0x2df   :  { %7413 = vmatprep.subr.mxu1 %v10844_v23  ;;  %7468 = vmatprep.subr.mxu0 %v10844_v23 }
 0x2e0   :  { %7414 = vmatpush3.msra.mxu1 %v9716_v60  ;;  %7469 = vmatpush3.msra.mxu0 %v9723_v45 }
 0x2e1   :  { %7415 = vmatprep.subr.mxu1 %v10844_v23  ;;  %7470 = vmatprep.subr.mxu0 %v10844_v23 }
 0x2e2   :  { %7416 = vmatpush3.msra.mxu1 %v9730_v51  ;;  %7471 = vmatpush3.msra.mxu0 %v9737_v29 }
 0x2e3   :  { %7417 = vmatprep.subr.mxu1 %v10844_v23  ;;  %7472 = vmatprep.subr.mxu0 %v10844_v23 }
 0x2e4   :  { %7418 = vmatpush3.msra.mxu1 %v9744_v63  ;;  %7473 = vmatpush3.msra.mxu0 %v9751_v32 }
 0x2e5   :  { %7419 = vmatprep.subr.mxu1 %v10844_v23  ;;  %7474 = vmatprep.subr.mxu0 %v10844_v23 }
 0x2e6   :  { %7420 = vmatpush3.msra.mxu1 %v9758_v0  ;;  %7475 = vmatpush3.msra.mxu0 %v9765_v56 }
 0x2e7   :  { %7421 = vmatprep.subr.mxu1 %v10844_v23  ;;  %7476 = vmatprep.subr.mxu0 %v10844_v23 }
 0x2e8   :  { %7422 = vmatpush3.msra.mxu1 %v9772_v43  ;;  %7423 = vmatprep.mubr.msk.f32.mxu1 %vm7987_vm4, %v10844_v23 }
 0x2e9   :  { %7477 = vmatpush3.msra.mxu0 %v9779_v57  ;;  %7424 = vmatmul.mubr.msk.f32.vlgmr.msra.gmra.mxu1 %vm3147_vm5, %v3659_v1  ;;  %v9887_v1 = vld [vmem:[%s10719_s6 + $0x290] sm:$0xff] }
 0x2ea   :  { %7445 = vmatprep.subr.mxu1 %v10844_v23  ;;  %7478 = vmatprep.subr.mxu0 %v10844_v23  ;;  %10852 = vst [vmem:[#allocation29_spill] sm:$0xff] %v9887_v1 }
 0x2eb   :  { %7446 = vmatpush3.msra.mxu1 %v9789_v17  ;;  %7479 = vmatpush3.msra.mxu0 %v9797_v7 }
 0x2ec   :  { %7480 = vmatprep.mubr.msk.f32.mxu0 %vm7987_vm4, %v10844_v23  ;;  %7447 = vmatprep.subr.mxu1 %v10844_v23 }
 0x2ed   :  { %7481 = vmatmul.mubr.msk.f32.vlgmr.msra.gmra.mxu0 %vm3147_vm5, %v9803_v30  ;;  %7502 = vmatprep.subr.mxu0 %v10844_v23 }
 0x2ee   :  { %7448 = vmatpush3.msra.mxu1 %v9808_v20  ;;  %7503 = vmatpush3.msra.mxu0 %v9816_v8 }
 0x2ef   :  { %7449 = vmatprep.subr.mxu1 %v10844_v23  ;;  %7504 = vmatprep.subr.mxu0 %v10844_v23 }
 0x2f0   :  { %7450 = vmatpush3.msra.mxu1 %v9824_v5  ;;  %7505 = vmatpush3.msra.mxu0 %v9831_v35 }
 0x2f1   :  { %7451 = vmatprep.subr.mxu1 %v10844_v23  ;;  %7506 = vmatprep.subr.mxu0 %v10844_v23 }
 0x2f2   :  { %7452 = vmatpush3.msra.mxu1 %v9838_v11  ;;  %7507 = vmatpush3.msra.mxu0 %v9845_v19 }
 0x2f3   :  { %7453 = vmatprep.subr.mxu1 %v10844_v23  ;;  %7508 = vmatprep.subr.mxu0 %v10844_v23 }
 0x2f4   :  { %7454 = vmatpush3.msra.mxu1 %v9852_v15  ;;  %7509 = vmatpush3.msra.mxu0 %v9859_v21  ;;  %v9894_v21 = vld [vmem:[%s10719_s6 + $0x1c0] sm:$0xff]  ;;  %v9911_v15 = vld [vmem:[%s10719_s6 + $0x278] sm:$0xff] }
 0x2f5   :  { %7455 = vmatprep.subr.mxu1 %v10844_v23  ;;  %7510 = vmatprep.subr.mxu0 %v10844_v23  ;;  %10853 = vst [vmem:[#allocation36_spill] sm:$0xff] %v9894_v21  ;;  %10855 = vst [vmem:[#allocation21_spill] sm:$0xff] %v9911_v15 }
 0x2f6   :  { %7456 = vmatpush3.msra.mxu1 %v9866_v24  ;;  %7511 = vmatpush3.msra.mxu0 %v9873_v49  ;;  %v9901_v24 = vld [vmem:[%s10719_s6 + $0x288] sm:$0xff]  ;;  %v3825_v49 = vrot.slane %v9561_v37, 3  ;;  %v4074_v37 = vrot.slane %v9803_v30, 2 }
 0x2f7   :  { %7457 = vmatprep.subr.mxu1 %v10844_v23  ;;  %7512 = vmatprep.subr.mxu0 %v10844_v23  ;;  %10854 = vst [vmem:[#allocation10_spill] sm:$0xff] %v9901_v24 }
 0x2f8   :  { %7458 = vmatpush3.msra.mxu1 %v9880_v3  ;;  %7513 = vmatpush3.msra.mxu0 %v9887_v1  ;;  %v9919_v1 = vld [vmem:[%s10719_s6 + $0x280] sm:$0xff]  ;;  %v3186_v3 = vld [vmem:[#allocation4 + $0x31] ss:$2 sm:$0xff] }
 0x2f9   :  { %7459 = vmatprep.subr.mxu1 %v10844_v23  ;;  %7514 = vmatprep.subr.mxu0 %v10844_v23  ;;  %10856 = vst [vmem:[#allocation17_spill] sm:$0xff] %v9919_v1 }
 0x2fa   :  { %7460 = vmatpush3.msra.mxu1 %v9894_v21  ;;  %7461 = vmatprep.mubr.msk.f32.mxu1 %vm7987_vm4, %v10844_v23  ;;  %v9929_v21 = vld [vmem:[%s10719_s6 + $0x270] sm:$0xff] }
 0x2fb   :  { %7515 = vmatpush3.msra.mxu0 %v9901_v24  ;;  %7462 = vmatmul.mubr.msk.f32.vlgmr.msra.gmra.mxu1 %vm3147_vm5, %v3825_v49  ;;  %10857 = vst [vmem:[#allocation30_spill] sm:$0xff] %v9929_v21  ;;  %v9937_v49 = vld [vmem:[%s10719_s6 + $0x338] sm:$0xff] }
 0x2fc   :  { %7483 = vmatprep.subr.mxu1 %v10844_v23  ;;  %7516 = vmatprep.subr.mxu0 %v10844_v23  ;;  %10858 = vst [vmem:[#allocation38_spill] sm:$0xff] %v9937_v49  ;;  %v3170_v24 = vld [vmem:[#allocation4 + $0x30] ss:$2 sm:$0xff] }
 0x2fd   :  { %7484 = vmatpush3.msra.mxu1 %v9911_v15  ;;  %7517 = vmatpush3.msra.mxu0 %v9919_v1  ;;  %v9944_v15 = vld [vmem:[%s10719_s6 + $0x268] sm:$0xff]  ;;  %v9951_v1 = vld [vmem:[%s10719_s6 + $0x330] sm:$0xff]  ;;  %v3198_v19 = vmax.f32 %v3170_v24, %v3186_v3 }
 0x2fe   :  { %7518 = vmatprep.mubr.msk.f32.mxu0 %vm7987_vm4, %v10844_v23  ;;  %7485 = vmatprep.subr.mxu1 %v10844_v23  ;;  %10859 = vst [vmem:[#allocation11_spill] sm:$0xff] %v9944_v15  ;;  %10860 = vst [vmem:[#allocation22_spill] sm:$0xff] %v9951_v1  ;;  %v10021_v24 = vld [vmem:[%s10719_s6 + $0x308] sm:$0xff] }
 0x2ff   :  { %7519 = vmatmul.mubr.msk.f32.vlgmr.msra.gmra.mxu0 %vm3147_vm5, %v4074_v37  ;;  %7540 = vmatprep.subr.mxu0 %v10844_v23  ;;  %v9958_v37 = vld [vmem:[%s10719_s6 + $0x260] sm:$0xff]  ;;  %10870 = vst [vmem:[#allocation25_spill] sm:$0xff] %v10021_v24  ;;  %v3214_v3 = vrot.slane %v3198_v19, 4 }
 0x300   :  { %7486 = vmatpush3.msra.mxu1 %v9929_v21  ;;  %7541 = vmatpush3.msra.mxu0 %v9937_v49  ;;  %10861 = vst [vmem:[#allocation19_spill] sm:$0xff] %v9958_v37  ;;  %v9965_v21 = vld [vmem:[%s10719_s6 + $0x328] sm:$0xff]  ;;  %v9972_v49 = vld [vmem:[%s10719_s6 + $0x258] sm:$0xff] }
 0x301   :  { %7487 = vmatprep.subr.mxu1 %v10844_v23  ;;  %7542 = vmatprep.subr.mxu0 %v10844_v23  ;;  %10862 = vst [vmem:[#allocation32_spill] sm:$0xff] %v9965_v21  ;;  %10863 = vst [vmem:[#allocation12_spill] sm:$0xff] %v9972_v49 }
 0x302   :  { %7488 = vmatpush3.msra.mxu1 %v9944_v15  ;;  %7543 = vmatpush3.msra.mxu0 %v9951_v1  ;;  %v9979_v15 = vld [vmem:[%s10719_s6 + $0x320] sm:$0xff]  ;;  %v9986_v1 = vld [vmem:[%s10719_s6 + $0x250] sm:$0xff] }
 0x303   :  { %7489 = vmatprep.subr.mxu1 %v10844_v23  ;;  %7544 = vmatprep.subr.mxu0 %v10844_v23  ;;  %10864 = vst [vmem:[#allocation23_spill] sm:$0xff] %v9979_v15  ;;  %10865 = vst [vmem:[#allocation20_spill] sm:$0xff] %v9986_v1 }
 0x304   :  { %7490 = vmatpush3.msra.mxu1 %v9958_v37  ;;  %7545 = vmatpush3.msra.mxu0 %v9965_v21  ;;  %v9993_v37 = vld [vmem:[%s10719_s6 + $0x318] sm:$0xff]  ;;  %v10000_v21 = vld [vmem:[%s10719_s6 + $0x248] sm:$0xff] }
 0x305   :  { %7491 = vmatprep.subr.mxu1 %v10844_v23  ;;  %7546 = vmatprep.subr.mxu0 %v10844_v23  ;;  %10866 = vst [vmem:[#allocation33_spill] sm:$0xff] %v9993_v37  ;;  %10867 = vst [vmem:[#allocation13_spill] sm:$0xff] %v10000_v21 }
 0x306   :  { %7492 = vmatpush3.msra.mxu1 %v9972_v49  ;;  %7547 = vmatpush3.msra.mxu0 %v9979_v15  ;;  %v10007_v49 = vld [vmem:[%s10719_s6 + $0x310] sm:$0xff]  ;;  %v10014_v15 = vld [vmem:[%s10719_s6 + $0x240] sm:$0xff] }
 0x307   :  { %7493 = vmatprep.subr.mxu1 %v10844_v23  ;;  %7548 = vmatprep.subr.mxu0 %v10844_v23  ;;  %10868 = vst [vmem:[#allocation24_spill] sm:$0xff] %v10007_v49  ;;  %10869 = vst [vmem:[#allocation14_spill] sm:$0xff] %v10014_v15 }
 0x308   :  { %7494 = vmatpush3.msra.mxu1 %v9986_v1  ;;  %7549 = vmatpush3.msra.mxu0 %v9993_v37  ;;  %v3991_v37 = vrot.slane %v9803_v30, 1  ;;  %v10050_v1 = vld [vmem:[%s10719_s6 + $0x2f0] sm:$0xff] }
 0x309   :  { %7495 = vmatprep.subr.mxu1 %v10844_v23  ;;  %7550 = vmatprep.subr.mxu0 %v10844_v23  ;;  %10873 = vst [vmem:[#allocation28_spill] sm:$0xff] %v10050_v1 }
 0x30a   :  { %7496 = vmatpush3.msra.mxu1 %v10000_v21  ;;  %7551 = vmatpush3.msra.mxu0 %v10007_v49  ;;  %v10031_v21 = vld [vmem:[%s10719_s6 + $0x2f8] sm:$0xff]  ;;  %v10039_v49 = vld [vmem:[%s10719_s6 + $0x300] sm:$0xff] }
 0x30b   :  { %7497 = vmatprep.subr.mxu1 %v10844_v23  ;;  %7552 = vmatprep.subr.mxu0 %v10844_v23  ;;  %10871 = vst [vmem:[#allocation15_spill] sm:$0xff] %v10031_v21  ;;  %10872 = vst [vmem:[#allocation26_spill] sm:$0xff] %v10039_v49 }
 0x30c   :  { %7498 = vmatpush3.msra.mxu1 %v10014_v15  ;;  %7499 = vmatprep.mubr.msk.f32.mxu1 %vm7987_vm4, %v10844_v23  ;;  %v10045_v15 = vmax.f32 %v3198_v19, %v3214_v3  ;;  %v10066_v19 = vld [vmem:[%s10719_s6 + $0x2e8] sm:$0xff]  ;;  %v10073_v3 = vld [vmem:[%s10719_s6 + $0x3b0] sm:$0xff] }
 0x30d   :  { %7553 = vmatpush3.msra.mxu0 %v10021_v24  ;;  %7500 = vmatmul.mubr.msk.f32.vlgmr.msra.gmra.mxu1 %vm3147_vm5, %v3991_v37  ;;  %v10058_v37 = vld [vmem:[%s10719_s6 + $0x3b8] sm:$0xff]  ;;  %10875 = vst [vmem:[#allocation34_spill] sm:$0xff] %v10066_v19  ;;  %10876 = vst [vmem:[#allocation39_spill] sm:$0xff] %v10073_v3  ;;  %v7955_v24 = vld [vmem:[%s10719_s6] sm:$0xff] }
 0x30e   :  { %7521 = vmatprep.subr.mxu1 %v10844_v23  ;;  %7554 = vmatprep.subr.mxu0 %v10844_v23  ;;  %10874 = vst [vmem:[#allocation31_spill] sm:$0xff] %v10058_v37 }
 0x30f   :  { %7522 = vmatpush3.msra.mxu1 %v10031_v21  ;;  %7555 = vmatpush3.msra.mxu0 %v10039_v49  ;;  %v10080_v49 = vld [vmem:[%s10719_s6 + $0x2e0] sm:$0xff]  ;;  %v10153_v21 = vld [vmem:[%s10719_s6 + $0x378] sm:$0xff] }
 0x310   :  { %7556 = vmatprep.mubr.msk.f32.mxu0 %vm7987_vm4, %v10844_v23  ;;  %7523 = vmatprep.subr.mxu1 %v10844_v23  ;;  %10877 = vst [vmem:[#allocation40_spill] sm:$0xff] %v10080_v49  ;;  %10887 = vst [vmem:[#allocation50_spill] sm:$0xff] %v10153_v21 }
 0x311   :  { %7557 = vmatmul.mubr.msk.f32.vlgmr.msra.gmra.mxu0 %vm3147_vm5, %v10045_v15  ;;  %7578 = vmatprep.subr.mxu0 %v10844_v23 }
 0x312   :  { %7524 = vmatpush3.msra.mxu1 %v10050_v1  ;;  %7579 = vmatpush3.msra.mxu0 %v10058_v37  ;;  %v10087_v1 = vld [vmem:[%s10719_s6 + $0x3a8] sm:$0xff]  ;;  %v10094_v37 = vld [vmem:[%s10719_s6 + $0x2d8] sm:$0xff] }
 0x313   :  { %7525 = vmatprep.subr.mxu1 %v10844_v23  ;;  %7580 = vmatprep.subr.mxu0 %v10844_v23  ;;  %10878 = vst [vmem:[#allocation41_spill] sm:$0xff] %v10087_v1  ;;  %10879 = vst [vmem:[#allocation42_spill] sm:$0xff] %v10094_v37 }
 0x314   :  { %7526 = vmatpush3.msra.mxu1 %v10066_v19  ;;  %7581 = vmatpush3.msra.mxu0 %v10073_v3  ;;  %v10101_v19 = vld [vmem:[%s10719_s6 + $0x3a0] sm:$0xff]  ;;  %v10108_v3 = vld [vmem:[%s10719_s6 + $0x2d0] sm:$0xff] }
 0x315   :  { %7527 = vmatprep.subr.mxu1 %v10844_v23  ;;  %7582 = vmatprep.subr.mxu0 %v10844_v23  ;;  %10880 = vst [vmem:[#allocation43_spill] sm:$0xff] %v10101_v19  ;;  %10881 = vst [vmem:[#allocation44_spill] sm:$0xff] %v10108_v3 }
 0x316   :  { %7528 = vmatpush3.msra.mxu1 %v10080_v49  ;;  %7583 = vmatpush3.msra.mxu0 %v10087_v1  ;;  %v10115_v49 = vld [vmem:[%s10719_s6 + $0x398] sm:$0xff]  ;;  %v10122_v1 = vld [vmem:[%s10719_s6 + $0x2c8] sm:$0xff] }
 0x317   :  { %7529 = vmatprep.subr.mxu1 %v10844_v23  ;;  %7584 = vmatprep.subr.mxu0 %v10844_v23  ;;  %10882 = vst [vmem:[#allocation45_spill] sm:$0xff] %v10115_v49  ;;  %10883 = vst [vmem:[#allocation46_spill] sm:$0xff] %v10122_v1 }
 0x318   :  { %7530 = vmatpush3.msra.mxu1 %v10094_v37  ;;  %7585 = vmatpush3.msra.mxu0 %v10101_v19  ;;  %v10129_v37 = vld [vmem:[%s10719_s6 + $0x390] sm:$0xff]  ;;  %v10136_v19 = vld [vmem:[%s10719_s6 + $0x2c0] sm:$0xff] }
 0x319   :  { %7531 = vmatprep.subr.mxu1 %v10844_v23  ;;  %7586 = vmatprep.subr.mxu0 %v10844_v23  ;;  %10884 = vst [vmem:[#allocation47_spill] sm:$0xff] %v10129_v37  ;;  %10885 = vst [vmem:[#allocation48_spill] sm:$0xff] %v10136_v19 }
 0x31a   :  { %7532 = vmatpush3.msra.mxu1 %v10108_v3  ;;  %7587 = vmatpush3.msra.mxu0 %v10115_v49  ;;  %v10143_v3 = vld [vmem:[%s10719_s6 + $0x388] sm:$0xff]  ;;  %v4157_v49 = vrot.slane %v9803_v30, 3  ;;  %v4406_v30 = vrot.slane %v10045_v15, 2 }
 0x31b   :  { %7533 = vmatprep.subr.mxu1 %v10844_v23  ;;  %7588 = vmatprep.subr.mxu0 %v10844_v23  ;;  %10886 = vst [vmem:[#allocation49_spill] sm:$0xff] %v10143_v3 }
 0x31c   :  { %7534 = vmatpush3.msra.mxu1 %v10122_v1  ;;  %7589 = vmatpush3.msra.mxu0 %v10129_v37  ;;  %v10161_v37 = vld [vmem:[%s10719_s6 + $0x380] sm:$0xff] }
 0x31d   :  { %7535 = vmatprep.subr.mxu1 %v10844_v23  ;;  %7590 = vmatprep.subr.mxu0 %v10844_v23  ;;  %10888 = vst [vmem:[#allocation51_spill] sm:$0xff] %v10161_v37 }
 0x31e   :  { %7536 = vmatpush3.msra.mxu1 %v10136_v19  ;;  %7537 = vmatprep.mubr.msk.f32.mxu1 %vm7987_vm4, %v10844_v23  ;;  %v10171_v19 = vld [vmem:[%s10719_s6 + $0x370] sm:$0xff] }
 0x31f   :  { %7591 = vmatpush3.msra.mxu0 %v10143_v3  ;;  %7538 = vmatmul.mubr.msk.f32.vlgmr.msra.gmra.mxu1 %vm3147_vm5, %v4157_v49  ;;  %10889 = vst [vmem:[#allocation52_spill] sm:$0xff] %v10171_v19  ;;  %v10181_v49 = vld [vmem:[%s10719_s6 + $0x368] sm:$0xff] }
 0x320   :  { %7559 = vmatprep.subr.mxu1 %v10844_v23  ;;  %7592 = vmatprep.subr.mxu0 %v10844_v23  ;;  %10890 = vst [vmem:[#allocation53_spill] sm:$0xff] %v10181_v49  ;;  %v3188_v3 = vld [vmem:[#allocation4 + $0x41] ss:$2 sm:$0xff] }
 0x321   :  { %7560 = vmatpush3.msra.mxu1 %v10153_v21  ;;  %7593 = vmatpush3.msra.mxu0 %v10161_v37  ;;  %v7948_v37 = vld [vmem:[%s10719_s6 + $0x38] sm:$0xff]  ;;  %v3172_v21 = vld [vmem:[#allocation4 + $0x40] ss:$2 sm:$0xff] }
 0x322   :  { %7594 = vmatprep.mubr.msk.f32.mxu0 %vm7987_vm4, %v10844_v23  ;;  %7561 = vmatprep.subr.mxu1 %v10844_v23  ;;  %v3199_v1 = vmax.f32 %v3172_v21, %v3188_v3  ;;  %v7953_v21 = vld [vmem:[%s10719_s6 + $0x10] sm:$0xff] }
 0x323   :  { %7595 = vmatmul.mubr.msk.f32.vlgmr.msra.gmra.mxu0 %vm3147_vm5, %v4406_v30  ;;  %7616 = vmatprep.subr.mxu0 %v10844_v23  ;;  %v10192_v30 = vld [vmem:[%s10719_s6 + $0x360] sm:$0xff] }
 0x324   :  { %7562 = vmatpush3.msra.mxu1 %v10171_v19  ;;  %7617 = vmatpush3.msra.mxu0 %v7948_v37  ;;  %10891 = vst [vmem:[#allocation54_spill] sm:$0xff] %v10192_v30  ;;  %v7949_v19 = vld [vmem:[%s10719_s6 + $0x30] sm:$0xff]  ;;  %v10203_v37 = vld [vmem:[%s10719_s6 + $0x358] sm:$0xff]  ;;  %v3215_v3 = vrot.slane %v3199_v1, 4 }
 0x325   :  { %7563 = vmatprep.subr.mxu1 %v10844_v23  ;;  %7618 = vmatprep.subr.mxu0 %v10844_v23  ;;  %10892 = vst [vmem:[#allocation55_spill] sm:$0xff] %v10203_v37 }
 0x326   :  { %7564 = vmatpush3.msra.mxu1 %v10181_v49  ;;  %7619 = vmatpush3.msra.mxu0 %v7949_v19  ;;  %v7950_v49 = vld [vmem:[%s10719_s6 + $0x28] sm:$0xff]  ;;  %v10214_v19 = vld [vmem:[%s10719_s6 + $0x350] sm:$0xff] }
 0x327   :  { %7565 = vmatprep.subr.mxu1 %v10844_v23  ;;  %7620 = vmatprep.subr.mxu0 %v10844_v23  ;;  %10893 = vst [vmem:[#allocation56_spill] sm:$0xff] %v10214_v19 }
 0x328   :  { %7566 = vmatpush3.msra.mxu1 %v10192_v30  ;;  %7621 = vmatpush3.msra.mxu0 %v7950_v49  ;;  %v7951_v30 = vld [vmem:[%s10719_s6 + $0x20] sm:$0xff]  ;;  %v10225_v49 = vld [vmem:[%s10719_s6 + $0x348] sm:$0xff] }
 0x329   :  { %7567 = vmatprep.subr.mxu1 %v10844_v23  ;;  %7622 = vmatprep.subr.mxu0 %v10844_v23  ;;  %10894 = vst [vmem:[#allocation57_spill] sm:$0xff] %v10225_v49 }
 0x32a   :  { %7568 = vmatpush3.msra.mxu1 %v10203_v37  ;;  %7623 = vmatpush3.msra.mxu0 %v7951_v30  ;;  %v7952_v37 = vld [vmem:[%s10719_s6 + $0x18] sm:$0xff]  ;;  %v10236_v30 = vld [vmem:[%s10719_s6 + $0x340] sm:$0xff] }
 0x32b   :  { %7569 = vmatprep.subr.mxu1 %v10844_v23  ;;  %7624 = vmatprep.subr.mxu0 %v10844_v23  ;;  %10895 = vst [vmem:[#allocation58_spill] sm:$0xff] %v10236_v30 }
 0x32c   :  { %7570 = vmatpush3.msra.mxu1 %v10214_v19  ;;  %7625 = vmatpush3.msra.mxu0 %v7952_v37  ;;  %v4323_v37 = vrot.slane %v10045_v15, 1  ;;  %v10250_v19 = vld [vmem:[%s10719_s6 + $0x3f8] sm:$0xff] }
 0x32d   :  { %7571 = vmatprep.subr.mxu1 %v10844_v23  ;;  %7626 = vmatprep.subr.mxu0 %v10844_v23 }
 0x32e   :  { %7572 = vmatpush3.msra.mxu1 %v10225_v49  ;;  %7627 = vmatpush3.msra.mxu0 %v7953_v21  ;;  %v7954_v21 = vld [vmem:[%s10719_s6 + $0x8] sm:$0xff]  ;;  %v10266_v49 = vld [vmem:[%s10719_s6 + $0x3f0] sm:$0xff] }
 0x32f   :  { %7573 = vmatprep.subr.mxu1 %v10844_v23  ;;  %7628 = vmatprep.subr.mxu0 %v10844_v23 }
 0x330   :  { %7574 = vmatpush3.msra.mxu1 %v10236_v30  ;;  %7575 = vmatprep.mubr.msk.f32.mxu1 %vm7987_vm4, %v10844_v23  ;;  %v10261_v30 = vmax.f32 %v3199_v1, %v3215_v3  ;;  %v10279_v1 = vld [vmem:[%s10719_s6 + $0x3e8] sm:$0xff]  ;;  %v10290_v3 = vld [vmem:[%s10719_s6 + $0x3e0] sm:$0xff] }
 0x331   :  { %7629 = vmatpush3.msra.mxu0 %v7954_v21  ;;  %7576 = vmatmul.mubr.msk.f32.vlgmr.msra.gmra.mxu1 %vm3147_vm5, %v4323_v37  ;;  %10896 = vst [vmem:[#allocation59_spill] sm:$0xff] %v10290_v3  ;;  %v7957_v37 = vld [vmem:[%s10719_s6 + $0xb0] sm:$0xff]  ;;  %v10301_v21 = vld [vmem:[%s10719_s6 + $0x3d8] sm:$0xff] }
 0x332   :  { %7597 = vmatprep.subr.mxu1 %v10844_v23  ;;  %7630 = vmatprep.subr.mxu0 %v10844_v23  ;;  %10897 = vst [vmem:[#allocation60_spill] sm:$0xff] %v10301_v21 }
 0x333   :  { %7598 = vmatpush3.msra.mxu1 %v10250_v19  ;;  %7631 = vmatpush3.msra.mxu0 %v7955_v24  ;;  %v7956_v24 = vld [vmem:[%s10719_s6 + $0xb8] sm:$0xff] }
 0x334   :  { %7632 = vmatprep.mubr.msk.f32.mxu0 %vm7987_vm4, %v10844_v23  ;;  %7599 = vmatprep.subr.mxu1 %v10844_v23 }
 0x335   :  { %7633 = vmatmul.mubr.msk.f32.vlgmr.msra.gmra.mxu0 %vm3147_vm5, %v10261_v30  ;;  %7654 = vmatprep.subr.mxu0 %v10844_v23 }
 0x336   :  { %7600 = vmatpush3.msra.mxu1 %v10266_v49  ;;  %7655 = vmatpush3.msra.mxu0 %v7956_v24  ;;  %v7958_v24 = vld [vmem:[%s10719_s6 + $0xa8] sm:$0xff] }
 0x337   :  { %7601 = vmatprep.subr.mxu1 %v10844_v23  ;;  %7656 = vmatprep.subr.mxu0 %v10844_v23 }
 0x338   :  { %7602 = vmatpush3.msra.mxu1 %v10279_v1  ;;  %7657 = vmatpush3.msra.mxu0 %v7957_v37  ;;  %v10312_v37 = vld [vmem:[%s10719_s6 + $0x3d0] sm:$0xff] }
 0x339   :  { %7603 = vmatprep.subr.mxu1 %v10844_v23  ;;  %7658 = vmatprep.subr.mxu0 %v10844_v23  ;;  %10898 = vst [vmem:[#allocation61_spill] sm:$0xff] %v10312_v37 }
 0x33a   :  { %7604 = vmatpush3.msra.mxu1 %v10290_v3  ;;  %7659 = vmatpush3.msra.mxu0 %v7958_v24  ;;  %v7959_v3 = vld [vmem:[%s10719_s6 + $0xa0] sm:$0xff]  ;;  %v10323_v24 = vld [vmem:[%s10719_s6 + $0x3c8] sm:$0xff] }
 0x33b   :  { %7605 = vmatprep.subr.mxu1 %v10844_v23  ;;  %7660 = vmatprep.subr.mxu0 %v10844_v23  ;;  %10899 = vst [vmem:[#allocation62_spill] sm:$0xff] %v10323_v24 }
 0x33c   :  { %7606 = vmatpush3.msra.mxu1 %v10301_v21  ;;  %7661 = vmatpush3.msra.mxu0 %v7959_v3  ;;  %v7960_v21 = vld [vmem:[%s10719_s6 + $0x98] sm:$0xff]  ;;  %v10334_v3 = vld [vmem:[%s10719_s6 + $0x3c0] sm:$0xff] }
 0x33d   :  { %7607 = vmatprep.subr.mxu1 %v10844_v23  ;;  %7662 = vmatprep.subr.mxu0 %v10844_v23 }
 0x33e   :  { %7608 = vmatpush3.msra.mxu1 %v10312_v37  ;;  %7663 = vmatpush3.msra.mxu0 %v7960_v21  ;;  %v7961_v37 = vld [vmem:[%s10719_s6 + $0x90] sm:$0xff]  ;;  %v4489_v21 = vrot.slane %v10045_v15, 3  ;;  %v7963_v15 = vld [vmem:[%s10719_s6 + $0x80] sm:$0xff] }
 0x33f   :  { %7609 = vmatprep.subr.mxu1 %v10844_v23  ;;  %7664 = vmatprep.subr.mxu0 %v10844_v23 }
 0x340   :  { %7610 = vmatpush3.msra.mxu1 %v10323_v24  ;;  %7665 = vmatpush3.msra.mxu0 %v7961_v37  ;;  %v7962_v24 = vld [vmem:[%s10719_s6 + $0x88] sm:$0xff]  ;;  %v4711_v37 = vrot.slane %v10261_v30, 2  ;;  %s7989_s6 = smov [#allocation6]  }
 0x341   :  { %7611 = vmatprep.subr.mxu1 %v10844_v23  ;;  %7666 = vmatprep.subr.mxu0 %v10844_v23  ;;  %s5970_s2 = sshll.u32 %s7989_s6, 4  ;;  %s5971_s2 = int_to_ptr.vmem [resolvable:$true] %s5970_s2 }
 0x342   :  { %7612 = vmatpush3.msra.mxu1 %v10334_v3  ;;  %7613 = vmatprep.mubr.msk.f32.mxu1 %vm7987_vm4, %v10844_v23  ;;  %p7969_p1 = scmp.lt.s32.totalorder %s5971_s2, %s5971_s2 }
 0x343   :  { %7667 = vmatpush3.msra.mxu0 %v7962_v24  ;;  %7614 = vmatmul.mubr.msk.f32.vlgmr.msra.gmra.mxu1 %vm3147_vm5, %v4489_v21  ;;  %v3190_v24 = vld [vmem:[#allocation4 + $0x51] ss:$2 sm:$0xff] }
 0x344   :  { %7635 = vmatprep.subr.mxu1 %v10844_v23  ;;  %7668 = vmatprep.subr.mxu0 %v10844_v23  ;;  %v10922_v21 = vld [vmem:[#allocation24_spill] sm:$0xff] }
 0x345   :  { %7636 = vmatpush3.msra.mxu1 %v9423_v18  ;;  %7669 = vmatpush3.msra.mxu0 %v7963_v15  ;;  %v3174_v18 = vld [vmem:[#allocation4 + $0x50] ss:$2 sm:$0xff] }
 0x346   :  { %7670 = vmatprep.mubr.msk.f32.mxu0 %vm7987_vm4, %v10844_v23  ;;  %7637 = vmatprep.subr.mxu1 %v10844_v23 }
 0x347   :  { %7671 = vmatmul.mubr.msk.f32.vlgmr.msra.gmra.mxu0 %vm3147_vm5, %v4711_v37  ;;  %7692 = vmatprep.subr.mxu0 %v10844_v23 }
 0x348   :  { %7638 = vmatpush3.msra.mxu1 %v9433_v58  ;;  %7693 = vmatpush3.msra.mxu0 %v9439_v28  ;;  %v3200_v58 = vmax.f32 %v3174_v18, %v3190_v24  ;;  %v10923_v24 = vld [vmem:[#allocation14_spill] sm:$0xff] }
 0x349   :  { %7639 = vmatprep.subr.mxu1 %v10844_v23  ;;  %7694 = vmatprep.subr.mxu0 %v10844_v23 }
 0x34a   :  { %7640 = vmatpush3.msra.mxu1 %v9452_v34  ;;  %7695 = vmatpush3.msra.mxu0 %v9457_v47  ;;  %v3216_v28 = vrot.slane %v3200_v58, 4  ;;  %v4637_v34 = vrot.slane %v10261_v30, 1 }
 0x34b   :  { %7641 = vmatprep.subr.mxu1 %v10844_v23  ;;  %7696 = vmatprep.subr.mxu0 %v10844_v23 }
 0x34c   :  { %7642 = vmatpush3.msra.mxu1 %v9469_v59  ;;  %7697 = vmatpush3.msra.mxu0 %v9474_v40  ;;  %v10396_v47 = vmax.f32 %v3200_v58, %v3216_v28  ;;  %v4785_v59 = vrot.slane %v10261_v30, 3  ;;  %v10924_v28 = vld [vmem:[#allocation25_spill] sm:$0xff] }
 0x34d   :  { %7643 = vmatprep.subr.mxu1 %v10844_v23  ;;  %7698 = vmatprep.subr.mxu0 %v10844_v23 }
 0x34e   :  { %7644 = vmatpush3.msra.mxu1 %v9483_v50  ;;  %7699 = vmatpush3.msra.mxu0 %v9490_v6  ;;  %v5007_v40 = vrot.slane %v10396_v47, 2  ;;  %v3176_v50 = vld [vmem:[#allocation4 + $0x60] ss:$2 sm:$0xff]  ;;  %v3192_v6 = vld [vmem:[#allocation4 + $0x61] ss:$2 sm:$0xff] }
 0x34f   :  { %7645 = vmatprep.subr.mxu1 %v10844_v23  ;;  %7700 = vmatprep.subr.mxu0 %v10844_v23 }
 0x350   :  { %7646 = vmatpush3.msra.mxu1 %v9501_v27  ;;  %7701 = vmatpush3.msra.mxu0 %v9506_v36  ;;  %v3201_v27 = vmax.f32 %v3176_v50, %v3192_v6  ;;  %v10927_v50 = vld [vmem:[#allocation28_spill] sm:$0xff]  ;;  %v10928_v6 = vld [vmem:[#allocation31_spill] sm:$0xff] }
 0x351   :  { %7647 = vmatprep.subr.mxu1 %v10844_v23  ;;  %7702 = vmatprep.subr.mxu0 %v10844_v23 }
 0x352   :  { %7648 = vmatpush3.msra.mxu1 %v9517_v9  ;;  %7703 = vmatpush3.msra.mxu0 %v9522_v46  ;;  %v3217_v9 = vrot.slane %v3201_v27, 4  ;;  %v4933_v46 = vrot.slane %v10396_v47, 1 }
 0x353   :  { %7649 = vmatprep.subr.mxu1 %v10844_v23  ;;  %7704 = vmatprep.subr.mxu0 %v10844_v23 }
 0x354   :  { %7650 = vmatpush3.msra.mxu1 %v9532_v10  ;;  %7651 = vmatprep.mubr.msk.f32.mxu1 %vm7987_vm4, %v10844_v23 }
 0x355   :  { %7705 = vmatpush3.msra.mxu0 %v9537_v25  ;;  %7652 = vmatmul.mubr.msk.f32.vlgmr.msra.gmra.mxu1 %vm3147_vm5, %v4637_v34 }
 0x356   :  { %7673 = vmatprep.subr.mxu1 %v10844_v23  ;;  %7706 = vmatprep.subr.mxu0 %v10844_v23 }
 0x357   :  { %7674 = vmatpush3.msra.mxu1 %v9548_v4  ;;  %7707 = vmatpush3.msra.mxu0 %v9555_v12  ;;  %v10478_v12 = vmax.f32 %v3201_v27, %v3217_v9  ;;  %v10929_v27 = vld [vmem:[#allocation34_spill] sm:$0xff]  ;;  %v10931_v9 = vld [vmem:[#allocation40_spill] sm:$0xff] }
 0x358   :  { %7708 = vmatprep.mubr.msk.f32.mxu0 %vm7987_vm4, %v10844_v23  ;;  %7675 = vmatprep.subr.mxu1 %v10844_v23 }
 0x359   :  { %7709 = vmatmul.mubr.msk.f32.vlgmr.msra.gmra.mxu0 %vm3147_vm5, %v10396_v47  ;;  %7730 = vmatprep.subr.mxu0 %v10844_v23  ;;  %v5229_v58 = vrot.slane %v10478_v12, 1 }
 0x35a   :  { %7676 = vmatpush3.msra.mxu1 %v9566_v55  ;;  %7731 = vmatpush3.msra.mxu0 %v9574_v44  ;;  %v10499_v55 = vld [vmem:[%s10720_s7] sm:$0x1]  ;;  %v10900_v44 = vld [vmem:[#allocation27_spill] sm:$0xff] }
 0x35b   :  { %7677 = vmatprep.subr.mxu1 %v10844_v23  ;;  %7732 = vmatprep.subr.mxu0 %v10844_v23 }
 0x35c   :  { %7678 = vmatpush3.msra.mxu1 %v9582_v53  ;;  %7733 = vmatpush3.msra.mxu0 %v9589_v14  ;;  %v10901_v53 = vld [vmem:[#allocation35_spill] sm:$0xff]  ;;  %v10902_v14 = vld [vmem:[#allocation9_spill] sm:$0xff] }
 0x35d   :  { %7679 = vmatprep.subr.mxu1 %v10844_v23  ;;  %7734 = vmatprep.subr.mxu0 %v10844_v23 }
 0x35e   :  { %7680 = vmatpush3.msra.mxu1 %v9596_v61  ;;  %7735 = vmatpush3.msra.mxu0 %v9603_v26  ;;  %v10903_v26 = vld [vmem:[#allocation18_spill] sm:$0xff] }
 0x35f   :  { %7681 = vmatprep.subr.mxu1 %v10844_v23  ;;  %7736 = vmatprep.subr.mxu0 %v10844_v23 }
 0x360   :  { %7682 = vmatpush3.msra.mxu1 %v9610_v33  ;;  %7737 = vmatpush3.msra.mxu0 %v9617_v16  ;;  %v10904_v16 = vld [vmem:[#allocation37_spill] sm:$0xff] }
 0x361   :  { %7683 = vmatprep.subr.mxu1 %v10844_v23  ;;  %7738 = vmatprep.subr.mxu0 %v10844_v23 }
 0x362   :  { %7684 = vmatpush3.msra.mxu1 %v9624_v54  ;;  %7739 = vmatpush3.msra.mxu0 %v9631_v22  ;;  %v10905_v22 = vld [vmem:[#allocation16_spill] sm:$0xff] }
 0x363   :  { %7685 = vmatprep.subr.mxu1 %v10844_v23  ;;  %7740 = vmatprep.subr.mxu0 %v10844_v23 }
 0x364   :  { %7686 = vmatpush3.msra.mxu1 %v9638_v31  ;;  %7741 = vmatpush3.msra.mxu0 %v9645_v38  ;;  %v10906_v38 = vld [vmem:[#allocation29_spill] sm:$0xff] }
 0x365   :  { %7687 = vmatprep.subr.mxu1 %v10844_v23  ;;  %7742 = vmatprep.subr.mxu0 %v10844_v23 }
 0x366   :  { %7688 = vmatpush3.msra.mxu1 %v9652_v42  ;;  %7689 = vmatprep.mubr.msk.f32.mxu1 %vm7987_vm4, %v10844_v23 }
 0x367   :  { %7743 = vmatpush3.msra.mxu0 %v9659_v52  ;;  %7690 = vmatmul.mubr.msk.f32.vlgmr.msra.gmra.mxu1 %vm3147_vm5, %v4785_v59 }
 0x368   :  { %7711 = vmatprep.subr.mxu1 %v10844_v23  ;;  %7744 = vmatprep.subr.mxu0 %v10844_v23 }
 0x369   :  { %7712 = vmatpush3.msra.mxu1 %v9669_v41  ;;  %7745 = vmatpush3.msra.mxu0 %v9677_v39  ;;  %v10907_v41 = vld [vmem:[#allocation36_spill] sm:$0xff]  ;;  %v5081_v39 = vrot.slane %v10396_v47, 3  ;;  %v10925_v47 = vld [vmem:[#allocation15_spill] sm:$0xff] }
 0x36a   :  { %7746 = vmatprep.mubr.msk.f32.mxu0 %vm7987_vm4, %v10844_v23  ;;  %7713 = vmatprep.subr.mxu1 %v10844_v23 }
 0x36b   :  { %7747 = vmatmul.mubr.msk.f32.vlgmr.msra.gmra.mxu0 %vm3147_vm5, %v5007_v40  ;;  %7768 = vmatprep.subr.mxu0 %v10844_v23  ;;  %v10926_v40 = vld [vmem:[#allocation26_spill] sm:$0xff] }
 0x36c   :  { %7714 = vmatpush3.msra.mxu1 %v9687_v62  ;;  %7769 = vmatpush3.msra.mxu0 %v9695_v13  ;;  %v10908_v62 = vld [vmem:[#allocation10_spill] sm:$0xff] }
 0x36d   :  { %7715 = vmatprep.subr.mxu1 %v10844_v23  ;;  %7770 = vmatprep.subr.mxu0 %v10844_v23 }
 0x36e   :  { %7716 = vmatpush3.msra.mxu1 %v9702_v2  ;;  %7771 = vmatpush3.msra.mxu0 %v9709_v48  ;;  %v10909_v2 = vld [vmem:[#allocation21_spill] sm:$0xff]  ;;  %v5303_v48 = vrot.slane %v10478_v12, 2 }
 0x36f   :  { %7717 = vmatprep.subr.mxu1 %v10844_v23  ;;  %7772 = vmatprep.subr.mxu0 %v10844_v23 }
 0x370   :  { %7718 = vmatpush3.msra.mxu1 %v9716_v60  ;;  %7773 = vmatpush3.msra.mxu0 %v9723_v45  ;;  %v10910_v60 = vld [vmem:[#allocation17_spill] sm:$0xff]  ;;  %v10911_v45 = vld [vmem:[#allocation30_spill] sm:$0xff] }
 0x371   :  { %7719 = vmatprep.subr.mxu1 %v10844_v23  ;;  %7774 = vmatprep.subr.mxu0 %v10844_v23 }
 0x372   :  { %7720 = vmatpush3.msra.mxu1 %v9730_v51  ;;  %7775 = vmatpush3.msra.mxu0 %v9737_v29  ;;  %v10912_v51 = vld [vmem:[#allocation38_spill] sm:$0xff]  ;;  %v10913_v29 = vld [vmem:[#allocation11_spill] sm:$0xff] }
 0x373   :  { %7721 = vmatprep.subr.mxu1 %v10844_v23  ;;  %7776 = vmatprep.subr.mxu0 %v10844_v23 }
 0x374   :  { %7722 = vmatpush3.msra.mxu1 %v9744_v63  ;;  %7777 = vmatpush3.msra.mxu0 %v9751_v32  ;;  %v10914_v63 = vld [vmem:[#allocation22_spill] sm:$0xff]  ;;  %v10915_v32 = vld [vmem:[#allocation19_spill] sm:$0xff] }
 0x375   :  { %7723 = vmatprep.subr.mxu1 %v10844_v23  ;;  %7778 = vmatprep.subr.mxu0 %v10844_v23  ;;  %v3313_v36 = vpop.f32.mrf.mxu1 }
 0x376   :  { %7724 = vmatpush3.msra.mxu1 %v9758_v0  ;;  %7779 = vmatpush3.msra.mxu0 %v9765_v56  ;;  %v3317_v61 = vadd.f32 %v3313_v36, %v10499_v55  ;;  %v3178_v0 = vld [vmem:[#allocation4 + $0x70] ss:$2 sm:$0xff]  ;;  %v3194_v56 = vld [vmem:[#allocation4 + $0x71] ss:$2 sm:$0xff] }
 0x377   :  { %7725 = vmatprep.subr.mxu1 %v10844_v23  ;;  %7780 = vmatprep.subr.mxu0 %v10844_v23  ;;  %v7330_v10 = vpop.f32.mrf.mxu1  ;;  %v10930_v36 = vld [vmem:[#allocation39_spill] sm:$0xff] }
 0x378   :  { %7726 = vmatpush3.msra.mxu1 %v9772_v43  ;;  %v3479_v25 = vpop.f32.mrf.mxu0  ;;  %7727 = vmatprep.mubr.msk.f32.mxu1 %vm7987_vm4, %v10844_v23  ;;  %v10916_v43 = vld [vmem:[#allocation32_spill] sm:$0xff]  ;;  %v10933_v10 = vld [vmem:[#allocation42_spill] sm:$0xff] }
 0x379   :  { %7781 = vmatpush3.msra.mxu0 %v9779_v57  ;;  %7728 = vmatmul.mubr.msk.f32.vlgmr.msra.gmra.mxu1 %vm3147_vm5, %v4933_v46  ;;  %v10917_v57 = vld [vmem:[#allocation12_spill] sm:$0xff]  ;;  %v10932_v46 = vld [vmem:[#allocation41_spill] sm:$0xff] }
 0x37a   :  { %7749 = vmatprep.subr.mxu1 %v10844_v23  ;;  %v7368_v4 = vpop.f32.mrf.mxu0  ;;  %7782 = vmatprep.subr.mxu0 %v10844_v23 }
 0x37b   :  { %7750 = vmatpush3.msra.mxu1 %v9789_v17  ;;  %7783 = vmatpush3.msra.mxu0 %v9797_v7  ;;  %v10918_v17 = vld [vmem:[#allocation23_spill] sm:$0xff]  ;;  %v3202_v7 = vmax.f32 %v3178_v0, %v3194_v56  ;;  %v10935_v4 = vld [vmem:[#allocation44_spill] sm:$0xff]  ;;  %v10949_v56 = vld [vmem:[#allocation58_spill] sm:$0xff] }
 0x37c   :  { %7784 = vmatprep.mubr.msk.f32.mxu0 %vm7987_vm4, %v10844_v23  ;;  %7751 = vmatprep.subr.mxu1 %v10844_v23 }
 0x37d   :  { %7785 = vmatmul.mubr.msk.f32.vlgmr.msra.gmra.mxu0 %vm3147_vm5, %v10478_v12  ;;  %7806 = vmatprep.subr.mxu0 %v10844_v23  ;;  %v3218_v37 = vrot.slane %v3202_v7, 4 }
 0x37e   :  { %7752 = vmatpush3.msra.mxu1 %v9808_v20  ;;  %7807 = vmatpush3.msra.mxu0 %v9816_v8  ;;  %v10919_v20 = vld [vmem:[#allocation20_spill] sm:$0xff] }
 0x37f   :  { %7753 = vmatprep.subr.mxu1 %v10844_v23  ;;  %7808 = vmatprep.subr.mxu0 %v10844_v23  ;;  %v10566_v59 = vmax.f32 %v3202_v7, %v3218_v37  ;;  %v10953_v7 = vld [vmem:[#allocation62_spill] sm:$0xff] }
 0x380   :  { %7754 = vmatpush3.msra.mxu1 %v9824_v5  ;;  %7809 = vmatpush3.msra.mxu0 %v9831_v35  ;;  %v10920_v5 = vld [vmem:[#allocation33_spill] sm:$0xff] }
 0x381   :  { %7755 = vmatprep.subr.mxu1 %v10844_v23  ;;  %7810 = vmatprep.subr.mxu0 %v10844_v23 }
 0x382   :  { %7756 = vmatpush3.msra.mxu1 %v9838_v11  ;;  %7811 = vmatpush3.msra.mxu0 %v10900_v44  ;;  %v10921_v11 = vld [vmem:[#allocation13_spill] sm:$0xff] }
 0x383   :  { %7757 = vmatprep.subr.mxu1 %v10844_v23  ;;  %7812 = vmatprep.subr.mxu0 %v10844_v23 }
 0x384   :  { %7758 = vmatpush3.msra.mxu1 %v10901_v53  ;;  %7813 = vmatpush3.msra.mxu0 %v10902_v14  ;;  %v10936_v53 = vld [vmem:[#allocation45_spill] sm:$0xff] }
 0x385   :  { %7759 = vmatprep.subr.mxu1 %v10844_v23  ;;  %7814 = vmatprep.subr.mxu0 %v10844_v23  ;;  %v3396_v33 = vpop.f32.mrf.mxu1 }
 0x386   :  { %7760 = vmatpush3.msra.mxu1 %v10903_v26  ;;  %7815 = vmatpush3.msra.mxu0 %v10904_v16  ;;  %v3400_v54 = vadd.f32 %v3396_v33, %v3317_v61  ;;  %v10937_v61 = vld [vmem:[#allocation46_spill] sm:$0xff]  ;;  %v10938_v33 = vld [vmem:[#allocation47_spill] sm:$0xff] }
 0x387   :  { %7761 = vmatprep.subr.mxu1 %v10844_v23  ;;  %7816 = vmatprep.subr.mxu0 %v10844_v23  ;;  %v7349_v31 = vpop.f32.mrf.mxu1 }
 0x388   :  { %7762 = vmatpush3.msra.mxu1 %v10905_v22  ;;  %7817 = vmatpush3.msra.mxu0 %v10906_v38  ;;  %v3483_v52 = vadd.f32 %v3479_v25, %v3400_v54  ;;  %v10934_v25 = vld [vmem:[#allocation43_spill] sm:$0xff]  ;;  %v10939_v22 = vld [vmem:[#allocation48_spill] sm:$0xff]  ;;  %v5377_v31 = vrot.slane %v10478_v12, 3  ;;  %v10940_v38 = vld [vmem:[#allocation49_spill] sm:$0xff] }
 0x389   :  { %7763 = vmatprep.subr.mxu1 %v10844_v23  ;;  %v3645_v42 = vpop.f32.mrf.mxu0  ;;  %7818 = vmatprep.subr.mxu0 %v10844_v23  ;;  %v10943_v12 = vld [vmem:[#allocation52_spill] sm:$0xff] }
 0x38a   :  { %7764 = vmatpush3.msra.mxu1 %v10907_v41  ;;  %7765 = vmatprep.mubr.msk.f32.mxu1 %vm7987_vm4, %v10844_v23  ;;  %v5599_v41 = vrot.slane %v10566_v59, 2 }
 0x38b   :  { %7819 = vmatpush3.msra.mxu0 %v10908_v62  ;;  %v7406_v13 = vpop.f32.mrf.mxu0  ;;  %7766 = vmatmul.mubr.msk.f32.vlgmr.msra.gmra.mxu1 %vm3147_vm5, %v5081_v39  ;;  %v10942_v39 = vld [vmem:[#allocation51_spill] sm:$0xff]  ;;  %v10944_v62 = vld [vmem:[#allocation53_spill] sm:$0xff] }
 0x38c   :  { %7787 = vmatprep.subr.mxu1 %v10844_v23  ;;  %7820 = vmatprep.subr.mxu0 %v10844_v23  ;;  %v10945_v13 = vld [vmem:[#allocation54_spill] sm:$0xff] }
 0x38d   :  { %7788 = vmatpush3.msra.mxu1 %v10909_v2  ;;  %7821 = vmatpush3.msra.mxu0 %v10910_v60  ;;  %v10946_v2 = vld [vmem:[#allocation55_spill] sm:$0xff] }
 0x38e   :  { %7822 = vmatprep.mubr.msk.f32.mxu0 %vm7987_vm4, %v10844_v23  ;;  %7789 = vmatprep.subr.mxu1 %v10844_v23 }
 0x38f   :  { %7823 = vmatmul.mubr.msk.f32.vlgmr.msra.gmra.mxu0 %vm3147_vm5, %v5303_v48  ;;  %7844 = vmatprep.subr.mxu0 %v10844_v23  ;;  %v10947_v48 = vld [vmem:[#allocation56_spill] sm:$0xff] }
 0x390   :  { %7790 = vmatpush3.msra.mxu1 %v10911_v45  ;;  %7845 = vmatpush3.msra.mxu0 %v10912_v51  ;;  %v10948_v51 = vld [vmem:[#allocation57_spill] sm:$0xff] }
 0x391   :  { %7791 = vmatprep.subr.mxu1 %v10844_v23  ;;  %7846 = vmatprep.subr.mxu0 %v10844_v23 }
 0x392   :  { %7792 = vmatpush3.msra.mxu1 %v10913_v29  ;;  %7847 = vmatpush3.msra.mxu0 %v10914_v63  ;;  %v5525_v63 = vrot.slane %v10566_v59, 1 }
 0x393   :  { %7793 = vmatprep.subr.mxu1 %v10844_v23  ;;  %7848 = vmatprep.subr.mxu0 %v10844_v23 }
 0x394   :  { %7794 = vmatpush3.msra.mxu1 %v10915_v32  ;;  %7849 = vmatpush3.msra.mxu0 %v10916_v43 }
 0x395   :  { %7795 = vmatprep.subr.mxu1 %v10844_v23  ;;  %7850 = vmatprep.subr.mxu0 %v10844_v23 }
 0x396   :  { %7796 = vmatpush3.msra.mxu1 %v10917_v57  ;;  %7851 = vmatpush3.msra.mxu0 %v10918_v17  ;;  %v10950_v57 = vld [vmem:[#allocation59_spill] sm:$0xff]  ;;  %v10951_v17 = vld [vmem:[#allocation60_spill] sm:$0xff] }
 0x397   :  { %7797 = vmatprep.subr.mxu1 %v10844_v23  ;;  %7852 = vmatprep.subr.mxu0 %v10844_v23  ;;  %v3562_v8 = vpop.f32.mrf.mxu1 }
 0x398   :  { %7798 = vmatpush3.msra.mxu1 %v10919_v20  ;;  %7853 = vmatpush3.msra.mxu0 %v10920_v5  ;;  %v3566_v35 = vadd.f32 %v3562_v8, %v3483_v52  ;;  %v10941_v52 = vld [vmem:[#allocation50_spill] sm:$0xff] }
 0x399   :  { %7799 = vmatprep.subr.mxu1 %v10844_v23  ;;  %7854 = vmatprep.subr.mxu0 %v10844_v23  ;;  %v7387_v30 = vpop.f32.mrf.mxu1 }
 0x39a   :  { %7800 = vmatpush3.msra.mxu1 %v10921_v11  ;;  %7855 = vmatpush3.msra.mxu0 %v10922_v21  ;;  %v3649_v18 = vadd.f32 %v3645_v42, %v3566_v35 }
 0x39b   :  { %7801 = vmatprep.subr.mxu1 %v10844_v23  ;;  %v3811_v15 = vpop.f32.mrf.mxu0  ;;  %7856 = vmatprep.subr.mxu0 %v10844_v23 }
 0x39c   :  { %7802 = vmatpush3.msra.mxu1 %v10923_v24  ;;  %7803 = vmatprep.mubr.msk.f32.mxu1 %vm7987_vm4, %v10844_v23 }
 0x39d   :  { %7857 = vmatpush3.msra.mxu0 %v10924_v28  ;;  %v7444_v34 = vpop.f32.mrf.mxu0  ;;  %7804 = vmatmul.mubr.msk.f32.vlgmr.msra.gmra.mxu1 %vm3147_vm5, %v5229_v58 }
 0x39e   :  { %7825 = vmatprep.subr.mxu1 %v10844_v23  ;;  %7858 = vmatprep.subr.mxu0 %v10844_v23 }
 0x39f   :  { %7826 = vmatpush3.msra.mxu1 %v10925_v47  ;;  %7859 = vmatpush3.msra.mxu0 %v10926_v40  ;;  %v5757_v40 = vld [vmem:[%s10722_s9 + $0x18] sm:$0xff] }
 0x3a0   :  { %7860 = vmatprep.mubr.msk.f32.mxu0 %vm7987_vm4, %v10844_v23  ;;  %7827 = vmatprep.subr.mxu1 %v10844_v23 }
 0x3a1   :  { %7861 = vmatmul.mubr.msk.f32.vlgmr.msra.gmra.mxu0 %vm3147_vm5, %v10566_v59  ;;  %7882 = vmatprep.subr.mxu0 %v10844_v23 }
 0x3a2   :  { %7828 = vmatpush3.msra.mxu1 %v10927_v50  ;;  %7883 = vmatpush3.msra.mxu0 %v10928_v6 }
 0x3a3   :  { %7829 = vmatprep.subr.mxu1 %v10844_v23  ;;  %7884 = vmatprep.subr.mxu0 %v10844_v23 }
 0x3a4   :  { %7830 = vmatpush3.msra.mxu1 %v10929_v27  ;;  %7885 = vmatpush3.msra.mxu0 %v10930_v36 }
 0x3a5   :  { %7831 = vmatprep.subr.mxu1 %v10844_v23  ;;  %7886 = vmatprep.subr.mxu0 %v10844_v23 }
 0x3a6   :  { %7832 = vmatpush3.msra.mxu1 %v10931_v9  ;;  %7887 = vmatpush3.msra.mxu0 %v10932_v46  ;;  %v5756_v46 = vld [vmem:[%s10722_s9 + $0x10] sm:$0xff] }
 0x3a7   :  { %7833 = vmatprep.subr.mxu1 %v10844_v23  ;;  %7888 = vmatprep.subr.mxu0 %v10844_v23 }
 0x3a8   :  { %7834 = vmatpush3.msra.mxu1 %v10933_v10  ;;  %7889 = vmatpush3.msra.mxu0 %v10934_v25  ;;  %v5755_v10 = vld [vmem:[%s10722_s9 + $0x8] sm:$0xff] }
 0x3a9   :  { %7835 = vmatprep.subr.mxu1 %v10844_v23  ;;  %7890 = vmatprep.subr.mxu0 %v10844_v23  ;;  %v3728_v44 = vpop.f32.mrf.mxu1 }
 0x3aa   :  { %7836 = vmatpush3.msra.mxu1 %v10935_v4  ;;  %7891 = vmatpush3.msra.mxu0 %v10936_v53  ;;  %v3732_v14 = vadd.f32 %v3728_v44, %v3649_v18  ;;  %v5754_v4 = vld [vmem:[%s10722_s9] sm:$0xff] }
 0x3ab   :  { %7837 = vmatprep.subr.mxu1 %v10844_v23  ;;  %7892 = vmatprep.subr.mxu0 %v10844_v23  ;;  %v7425_v26 = vpop.f32.mrf.mxu1 }
 0x3ac   :  { %7838 = vmatpush3.msra.mxu1 %v10937_v61  ;;  %7893 = vmatpush3.msra.mxu0 %v10938_v33  ;;  %v3815_v54 = vadd.f32 %v3811_v15, %v3732_v14  ;;  %v5758_v14 = vld [vmem:[%s10714_s1] sm:$0x3]  ;;  %v7988_v26 = vmov 0  }
 0x3ad   :  { %7839 = vmatprep.subr.mxu1 %v10844_v23  ;;  %v3977_v16 = vpop.f32.mrf.mxu0  ;;  %7894 = vmatprep.subr.mxu0 %v10844_v23 }
 0x3ae   :  { %7840 = vmatpush3.msra.mxu1 %v10939_v22  ;;  %7841 = vmatprep.mubr.msk.f32.mxu1 %vm7987_vm4, %v10844_v23 }
 0x3af   :  { %7895 = vmatpush3.msra.mxu0 %v10940_v38  ;;  %v7482_v42 = vpop.f32.mrf.mxu0  ;;  %7842 = vmatmul.mubr.msk.f32.vlgmr.msra.gmra.mxu1 %vm3147_vm5, %v5377_v31 }
 0x3b0   :  { %7863 = vmatprep.subr.mxu1 %v10844_v23  ;;  %7896 = vmatprep.subr.mxu0 %v10844_v23 }
 0x3b1   :  { %7864 = vmatpush3.msra.mxu1 %v10941_v52  ;;  %7897 = vmatpush3.msra.mxu0 %v10942_v39 }
 0x3b2   :  { %7898 = vmatprep.mubr.msk.f32.mxu0 %vm7987_vm4, %v10844_v23  ;;  %7865 = vmatprep.subr.mxu1 %v10844_v23 }
 0x3b3   :  { %7899 = vmatmul.mubr.msk.f32.vlgmr.msra.gmra.mxu0 %vm3147_vm5, %v5599_v41  ;;  %7866 = vmatpush3.msra.mxu1 %v10943_v12 }
 0x3b4   :  { %7879 = vmatprep.mubr.msk.f32.mxu1 %vm7987_vm4, %v10844_v23  ;;  %7867 = vmatprep.subr.mxu1 %v10844_v23 }
 0x3b5   :  { %7920 = vmatprep.subr.mxu0 %v10844_v23  ;;  %7868 = vmatpush3.msra.mxu1 %v10944_v62 }
 0x3b6   :  { %7928 = vmatprep.mubr.msk.f32.mxu0 %vm7987_vm4, %v10844_v23  ;;  %7869 = vmatprep.subr.mxu1 %v10844_v23 }
 0x3b7   :  { %7870 = vmatpush3.msra.mxu1 %v10945_v13  ;;  %7921 = vmatpush3.msra.mxu0 %v5757_v40 }
 0x3b8   :  { %7871 = vmatprep.subr.mxu1 %v10844_v23  ;;  %7922 = vmatprep.subr.mxu0 %v10844_v23 }
 0x3b9   :  { %7872 = vmatpush3.msra.mxu1 %v10946_v2  ;;  %7923 = vmatpush3.msra.mxu0 %v5756_v46 }
 0x3ba   :  { %7873 = vmatprep.subr.mxu1 %v10844_v23  ;;  %7924 = vmatprep.subr.mxu0 %v10844_v23 }
 0x3bb   :  { %7874 = vmatpush3.msra.mxu1 %v10947_v48  ;;  %v3894_v60 = vpop.f32.mrf.mxu1  ;;  %7925 = vmatpush3.msra.mxu0 %v5755_v10 }
 0x3bc   :  { %7875 = vmatprep.subr.mxu1 %v10844_v23  ;;  %v3898_v45 = vadd.f32 %v3894_v60, %v3815_v54  ;;  %7926 = vmatprep.subr.mxu0 %v10844_v23 }
 0x3bd   :  { %7876 = vmatpush3.msra.mxu1 %v10948_v51  ;;  %v7463_v29 = vpop.f32.mrf.mxu1  ;;  %7927 = vmatpush3.msra.mxu0 %v5754_v4  ;;  %v5880_v4 = vld [vmem:[%s10726_s13 + $0x10] sm:$0xff] }
 0x3be   :  { %7877 = vmatprep.subr.mxu1 %v10844_v23  ;;  %v3981_v0 = vadd.f32 %v3977_v16, %v3898_v45  ;;  %7946 = vset.pattern.permute.xlu0 %v7988_v26 }
 0x3bf   :  { %v4143_v32 = vpop.f32.mrf.mxu0  ;;  %7878 = vmatpush3.msra.mxu1 %v10949_v56  ;;  %7947 = vset.pattern.permute.xlu1 %v7988_v26 }
 0x3c0   :  { %7880 = vmatmul.mubr.msk.f32.vlgmr.msra.gmra.mxu1 %vm3147_vm5, %v5525_v63  ;;  %7901 = vmatprep.subr.mxu1 %v10844_v23 }
 0x3c1   :  { %v7520_v43 = vpop.f32.mrf.mxu0  ;;  %7902 = vmatpush3.msra.mxu1 %v10250_v19  ;;  %7917 = vmatprep.mubr.msk.f32.mxu1 %vm7987_vm4, %v10844_v23  ;;  %v10952_v19 = vld [vmem:[#allocation61_spill] sm:$0xff] }
 0x3c2   :  { %7903 = vmatprep.subr.mxu1 %v10844_v23  ;;  %5762 = vperm.xlu0 %7946, %v5758_v14   ;;  %v5878_v14 = vld [vmem:[%s10726_s13] sm:$0xff] }
 0x3c3   :  { %7904 = vmatpush3.msra.mxu1 %v10266_v49 }
 0x3c4   :  { %7905 = vmatprep.subr.mxu1 %v10844_v23 }
 0x3c5   :  { %7906 = vmatpush3.msra.mxu1 %v10279_v1  ;;  %v5673_v1 = vrot.slane %v10566_v59, 3 }
 0x3c6   :  { %7907 = vmatprep.subr.mxu1 %v10844_v23 }
 0x3c7   :  { %7908 = vmatpush3.msra.mxu1 %v10950_v57 }
 0x3c8   :  { %7909 = vmatprep.subr.mxu1 %v10844_v23 }
 0x3c9   :  { %7910 = vmatpush3.msra.mxu1 %v10951_v17 }
 0x3ca   :  { %7911 = vmatprep.subr.mxu1 %v10844_v23 }
 0x3cb   :  { %7912 = vmatpush3.msra.mxu1 %v10952_v19 }
 0x3cc   :  { %7913 = vmatprep.subr.mxu1 %v10844_v23 }
 0x3cd   :  { %7914 = vmatpush3.msra.mxu1 %v10953_v7  ;;  %v4060_v49 = vpop.f32.mrf.mxu1 }
 0x3ce   :  { %7915 = vmatprep.subr.mxu1 %v10844_v23  ;;  %v4064_v20 = vadd.f32 %v4060_v49, %v3981_v0 }
 0x3cf   :  { %7916 = vmatpush3.msra.mxu1 %v10334_v3  ;;  %v7501_v8 = vpop.f32.mrf.mxu1 }
 0x3d0   :  { %7918 = vmatmul.mubr.msk.f32.vlgmr.msra.gmra.mxu1 %vm3147_vm5, %v5673_v1  ;;  %v4147_v35 = vadd.f32 %v4143_v32, %v4064_v20  ;;  %7931 = vmatprep.subr.mxu1 %v10844_v23 }
 0x3d1   :  { %v4309_v5 = vpop.f32.mrf.mxu0  ;;  %7939 = vmatprep.mubr.msk.f32.mxu1 %vm7987_vm4, %v10844_v23 }
 0x3d3   :  { %v7558_v11 = vpop.f32.mrf.mxu0 }
 0x3df   :  { %v4226_v30 = vpop.f32.mrf.mxu1 }
 0x3e0   :  { %v4230_v21 = vadd.f32 %v4226_v30, %v4147_v35  ;;  %v5748_v35 = vlaneseq }
 0x3e1   :  { %v7539_v37 = vpop.f32.mrf.mxu1 }
 0x3e2   :  { %v4313_v18 = vadd.f32 %v4309_v5, %v4230_v21  ;;  %v5749_v21 = vshrl.u32 %v5748_v35, 7 }
 0x3e3   :  { %v4475_v15 = vpop.f32.mrf.mxu0 }
 0x3e5   :  { %v7596_v24 = vpop.f32.mrf.mxu0 }
 0x3f1   :  { %v4392_v58 = vpop.f32.mrf.mxu1 }
 0x3f2   :  { %v4396_v28 = vadd.f32 %v4392_v58, %v4313_v18 }
 0x3f3   :  { %v7577_v3 = vpop.f32.mrf.mxu1 }
 0x3f4   :  { %v4479_v47 = vadd.f32 %v4475_v15, %v4396_v28  ;;  %v5750_v15 = vsub.s32 0, %v5749_v21 }
 0x3f5   :  { %v4632_v34 = vpop.f32.mrf.mxu0 }
 0x3f6   :  { %v4636_v25 = vadd.f32 %v4632_v34, %v10499_v55  ;;  %v6373_v34 = vld [vmem:[%s10721_s8] ss:$0 sm:$0xff] }
 0x3f7   :  { %v7634_v59 = vpop.f32.mrf.mxu0 }
 0x403   :  { %v4558_v50 = vpop.f32.mrf.mxu1 }
 0x404   :  { %v10660_v6 = vadd.f32 %v4558_v50, %v4479_v47  ;;  %v6375_v50 = vld [vmem:[%s10723_s10] ss:$0 sm:$0xff] }
 0x405   :  { %v7615_v27 = vpop.f32.mrf.mxu1 }
 0x407   :  { %v4780_v36 = vpop.f32.mrf.mxu0 }
 0x409   :  { %v7672_v9 = vpop.f32.mrf.mxu0 }
 0x40a   :  { %v6376_v9 = vld [vmem:[%s10724_s11] ss:$0 sm:$0xff] }
 0x415   :  { %v4706_v44 = vpop.f32.mrf.mxu1 }
 0x416   :  { %v4710_v53 = vadd.f32 %v4706_v44, %v4636_v25  ;;  %v5881_v25 = vld [vmem:[%s10726_s13 + $0x18] sm:$0xff]  ;;  %v5879_v44 = vld [vmem:[%s10726_s13 + $0x8] sm:$0xff]  ;;  %s7964_s13 = scalar_lea.vmem %s5971_s2, 32 }
 0x417   :  { %v7653_v61 = vpop.f32.mrf.mxu1  ;;  %7932 = vmatpush3.msra.mxu1 %v5881_v25  ;;  %p7965_p0 = scmp.ne.s32.totalorder %s5971_s2, %s7964_s13  ;;  %p7970_p2 = scmp.lt.s32.totalorder %s7964_s13, %s7964_s13 }
 0x418   :  { %v4784_v16 = vadd.f32 %v4780_v36, %v4710_v53  ;;  %7933 = vmatprep.subr.mxu1 %v10844_v23  ;;  %v6377_v53 = vld [vmem:[#allocation5] ss:$0 sm:$0xff] }
 0x419   :  { %v4928_v33 = vpop.f32.mrf.mxu0  ;;  %7934 = vmatpush3.msra.mxu1 %v5880_v4  ;;  %p7971_p3 = por %p7970_p2, %p7969_p1 }
 0x41a   :  { %7935 = vmatprep.subr.mxu1 %v10844_v23 }
 0x41b   :  { %v7710_v55 = vpop.f32.mrf.mxu0  ;;  %7936 = vmatpush3.msra.mxu1 %v5879_v44  ;;  %p7972_p4 = pnand %p7971_p3, %p7965_p0 }
 0x41c   :  { %7937 = vmatprep.subr.mxu1 %v10844_v23  ;;  %v6378_v55 = vld [vmem:[%s10727_s14] ss:$0 sm:$0xff] }
 0x41d   :  { %7938 = vmatpush3.msra.mxu1 %v5878_v14 }
 0x427   :  { %v4854_v54 = vpop.f32.mrf.mxu1 }
 0x428   :  { %v4858_v22 = vadd.f32 %v4854_v54, %v4784_v16 }
 0x429   :  { %v7691_v31 = vpop.f32.mrf.mxu1 }
 0x42a   :  { %v4932_v42 = vadd.f32 %v4928_v33, %v4858_v22 }
 0x42b   :  { %v5076_v38 = vpop.f32.mrf.mxu0 }
 0x42d   :  { %v7748_v52 = vpop.f32.mrf.mxu0 }
 0x439   :  { %v5002_v41 = vpop.f32.mrf.mxu1 }
 0x43a   :  { %v5006_v39 = vadd.f32 %v5002_v41, %v4932_v42 }
 0x43b   :  { %v7729_v12 = vpop.f32.mrf.mxu1 }
 0x43c   :  { %v5080_v13 = vadd.f32 %v5076_v38, %v5006_v39 }
 0x43d   :  { %v5224_v62 = vpop.f32.mrf.mxu0  ;;  %v5763_v47 = vpop.permute.xlu0 %5762 }
 0x43e   :  { %v5771_v59 = vmul.f32 %v6373_v34, %v5763_v47 }
 0x43f   :  { %v7786_v2 = vpop.f32.mrf.mxu0 }
 0x44b   :  { %v5150_v48 = vpop.f32.mrf.mxu1 }
 0x44c   :  { %v5154_v60 = vadd.f32 %v5150_v48, %v5080_v13 }
 0x44d   :  { %v7767_v45 = vpop.f32.mrf.mxu1 }
 0x44e   :  { %v5228_v29 = vadd.f32 %v5224_v62, %v5154_v60 }
 0x44f   :  { %v5372_v51 = vpop.f32.mrf.mxu0 }
 0x451   :  { %v7824_v63 = vpop.f32.mrf.mxu0 }
 0x45d   :  { %v5298_v32 = vpop.f32.mrf.mxu1 }
 0x45e   :  { %v5302_v49 = vadd.f32 %v5298_v32, %v5228_v29 }
 0x45f   :  { %v7805_v0 = vpop.f32.mrf.mxu1 }
 0x460   :  { %v5376_v8 = vadd.f32 %v5372_v51, %v5302_v49 }
 0x461   :  { %v5520_v56 = vpop.f32.mrf.mxu0 }
 0x463   :  { %v7862_v43 = vpop.f32.mrf.mxu0 }
 0x46f   :  { %v5446_v57 = vpop.f32.mrf.mxu1 }
 0x470   :  { %v5450_v5 = vadd.f32 %v5446_v57, %v5376_v8 }
 0x471   :  { %v7843_v17 = vpop.f32.mrf.mxu1 }
 0x472   :  { %v5524_v11 = vadd.f32 %v5520_v56, %v5450_v5 }
 0x473   :  { %v5668_v19 = vpop.f32.mrf.mxu0 }
 0x475   :  { %v7900_v7 = vpop.f32.mrf.mxu0 }
 0x480   :  { %v5594_v1 = vpop.f32.mrf.mxu1 }
 0x481   :  { %v5598_v30 = vadd.f32 %v5594_v1, %v5524_v11 }
 0x482   :  { %v7881_v20 = vpop.f32.mrf.mxu1 }
 0x483   :  { %v5672_v37 = vadd.f32 %v5668_v19, %v5598_v30 }
 0x490   :  { %v5742_v18 = vpop.f32.mrf.mxu1 }
 0x491   :  { %v5746_v24 = vadd.f32 %v5742_v18, %v5672_v37 }
 0x492   :  { %v7919_v58 = vpop.f32.mrf.mxu1 }
 0x493   :  { %v5751_v28 = vrot.slane %v5746_v24, %v5750_v15 }
 0x495   :  { %v5753_v3 = vsel %vm319_vm0, %v10660_v6, %v5751_v28 }
 0x496   :  { %7929 = vmatmul.mubr.msk.f32.vlgmr.msra.gmra.mxu0 %vm772_vm2, %v5753_v3 }
 0x556   :  { %v5841_v40 = vpop.f32.mrf.mxu0 }
 0x557   :  { %v5842_v27 = vadd.f32 %v5841_v40, %v5771_v59 }
 0x558   :  { %v7930_v36 = vpop.f32.mrf.mxu0 }
 0x559   :  { %v5852_v6 = vadd.f32 %v6375_v50, %v5842_v27 }
 0x55b   :  { %v5860_v46 = vmul.f32 %v6376_v9, %v5852_v6 }
 0x55d   :  { %v5861_v10 = vsel %vm1013_vm3, %v5860_v46, 0.0 }
 0x55e   :  { %5862 = vadd.xlane.f32.xlu0 %v5861_v10 }
 0x5e7   :  { %v5863_v61 = vpop.xlane.xlu0 %5862 }
 0x5e8   :  { %v5871_v26 = vadd.f32 %v6377_v53, %v5863_v61 }
 0x5ea   :  { %5874 = vperm.xlu1 %7947, %v5871_v26  }
 0x665   :  { %v5875_v33 = vpop.permute.xlu1 %5874 }
 0x666   :  { %v5877_v16 = vmul.f32 %v5875_v33, %v5753_v3 }
 0x668   :  { %7940 = vmatmul.mubr.msk.f32.vlgmr.msra.gmra.mxu1 %vm772_vm2, %v5877_v16 }
 0x728   :  { %v5958_v23 = vpop.f32.mrf.mxu1 }
 0x729   :  { %v5959_v54 = vadd.f32 %v6378_v55, %v5958_v23 }
 0x72a   :  { %v7941_v22 = vpop.f32.mrf.mxu1 }
 0x72b   :  { %5963 = vst.msk [vmem:[#allocation6] sm:$0x3] %vm5962_vm6, %v5959_v54 }
 0x72c   :  { %7975 = shalt.err (!%p7972_p4)
}
 0x72d   :  { %5973 = dma.vmem_to_hbm [thread:$0]  %s5971_s2, 32, %s10728_s15, [#allocation7]  }
 0x72e   :  { %7984 = dma.done.wait [#allocation7], 32  }
 0x72f   :  { %7985 = vsyncadd [#allocation7], 4294967264 }
 0x730   :  { %5977 = vsyncpa [#allocation7], 1 }

</bundles_post_ra>
